<compile_context>
chip_gen: v7x
topology: tpu7x:2x2x1
jax: 0.10.0
libtpu: 0.0.40
codegen_flags: <defaults>
</compile_context>

<pallas_src>
import functools

import jax
import jax.numpy as jnp
from jax.experimental import pallas as pl
from jax.experimental.pallas import tpu as pltpu


# ----------------------------------------------------------------------------
# Kernels
# ----------------------------------------------------------------------------
def _qt_kernel_direct(x_ref, b_ref, o_ref):
    """Single reduction step: write the dot straight to the output tile."""
    o_ref[...] = jnp.dot(x_ref[...], b_ref[...].astype(jnp.bfloat16),
                         preferred_element_type=jnp.float32)


def _qt_kernel_acc(x_ref, b_ref, o_ref, acc_ref):
    """Blocked (tb, tk) @ (tk, 2*tn) with an f32 VMEM accumulator.

    grid = (Bp//tb, FTp//tn, Np//tk); the last axis is the reduction over time
    samples (kept last, marked "arbitrary").
    """
    k = pl.program_id(2)

    @pl.when(k == 0)
    def _():
        acc_ref[...] = jnp.zeros_like(acc_ref)

    # int8 basis tile -> bf16 on the VPU (hidden under the basis DMA), then one
    # bf16 x bf16 MXU chain with f32 accumulation.
    acc_ref[...] += jnp.dot(x_ref[...], b_ref[...].astype(jnp.bfloat16),
                            preferred_element_type=jnp.float32)

    @pl.when(k == pl.num_programs(2) - 1)
    def _():
        o_ref[...] = acc_ref[...]


# ----------------------------------------------------------------------------
# Basis construction / quantization (runs ONCE, outside the per-call jit)
# ----------------------------------------------------------------------------
def _build_qt_basis(ts_length, sample_rate, duration, q, frange,
                    num_f_bins, num_t_bins, logf=True):
    """Deterministic (no RNG) constant-Q projection basis, plain-JAX glue."""
    n = jnp.arange(ts_length, dtype=jnp.float32) / sample_rate        # (N,)
    if logf:
        freqs = jnp.geomspace(frange[0], frange[1], num_f_bins)
    else:
        freqs = jnp.linspace(frange[0], frange[1], num_f_bins)
    freqs = freqs.astype(jnp.float32)                                  # (F,)
    t_bins = (jnp.arange(num_t_bins, dtype=jnp.float32) + 0.5) * (
        duration / num_t_bins)                                         # (T,)

    sigma = q / (2.0 * jnp.pi * freqs)                                 # (F,)
    dt = n[:, None, None] - t_bins[None, None, :]                      # (N,1,T)
    win = jnp.exp(-0.5 * (dt / sigma[None, :, None]) ** 2)             # (N,F,T)
    norm = 1.0 / (jnp.sqrt(2.0 * jnp.pi) * sigma * sample_rate)        # (F,)
    phase = 2.0 * jnp.pi * freqs[None, :, None] * n[:, None, None]     # (N,F,1)

    br = (win * jnp.cos(phase) * norm[None, :, None]).reshape(
        ts_length, num_f_bins * num_t_bins)
    bi = (-win * jnp.sin(phase) * norm[None, :, None]).reshape(
        ts_length, num_f_bins * num_t_bins)
    return br.astype(jnp.float32), bi.astype(jnp.float32)


def _quantize_per_column(m):
    """Symmetric int8 quantization with a per-column f32 scale."""
    scale = jnp.max(jnp.abs(m), axis=0) / 127.0
    scale = jnp.where(scale > 0.0, scale, 1.0).astype(jnp.float32)
    q = jnp.clip(jnp.round(m / scale[None, :]), -127.0, 127.0).astype(jnp.int8)
    return q, scale


# ----------------------------------------------------------------------------
# Generation-aware tile / VMEM picking
# ----------------------------------------------------------------------------
def _pick_vmem_limit():
    """Scoped VMEM limit from the actual chip (conservative 64 MiB fallback)."""
    cap = 64 << 20
    try:
        info = pltpu.get_tpu_info()
        cap = int(getattr(info, "vmem_capacity_bytes", cap)) or cap
    except Exception:
        pass
    # ~96 MiB on 128-MiB parts (v5e/v6e), ~48 MiB on v7x's 64 MiB per TC.
    return max(32 << 20, min((cap * 3) // 4, cap - (16 << 20)))


def _largest_divisor_tile(total, preferred, align):
    """Largest multiple of `align` that divides `total` and is <= preferred."""
    if total <= preferred:
        return int(total)
    t = (min(preferred, total) // align) * align
    while t >= align:
        if total % t == 0:
            return int(t)
        t -= align
    return int(total)  # unreachable when align | total


def _pick_tn(ft_padded, cap):
    """Column tile: prefer an even number of tiles (v7x 2-TC balance)."""
    best = _largest_divisor_tile(ft_padded, cap, 128)
    t = best
    while t >= 256:
        if ft_padded % t == 0 and (ft_padded // t) % 2 == 0:
            return int(t)
        t -= 128
    return int(best)


def _pick_tiles(n_padded, ft_padded, vmem_limit):
    big_vmem = vmem_limit >= (72 << 20)          # proxy for 128-MiB VMEM parts
    tn_cap = 1024 if big_vmem else 512
    tk_cap = 4096 if big_vmem else 2048
    tn = _pick_tn(ft_padded, tn_cap)
    tk = _largest_divisor_tile(n_padded, tk_cap, 256)

    tb = 256                                     # worst-case batch tile
    budget = vmem_limit // 2                     # headroom for Mosaic scratch

    def footprint(tk_, tn_):
        return (2 * tb * tk_ * 2                 # x bf16, double-buffered
                + 2 * tk_ * 2 * tn_              # basis int8, double-buffered
                + tk_ * 2 * tn_ * 2              # bf16 dequant temporary
                + 2 * tb * 2 * tn_ * 4           # f32 output, double-buffered
                + tb * 2 * tn_ * 4)              # f32 accumulator scratch

    while footprint(tk, tn) > budget and tk > 256:
        tk = _largest_divisor_tile(n_padded, max(tk // 2, 256), 256)
    while footprint(tk, tn) > budget and tn > 128:
        tn = _largest_divisor_tile(ft_padded, max(tn // 2, 128), 128)
    return int(tn), int(tk)


# ----------------------------------------------------------------------------
# Jitted forward (basis passed in pre-fused / pre-quantized)
# ----------------------------------------------------------------------------
@functools.partial(
    jax.jit,
    static_argnames=("B", "N", "FT", "num_f_bins", "num_t_bins",
                     "Bp", "Np", "FTp", "tb", "tn", "tk", "vmem_limit"))
def _qt_forward_impl(x, basis_q, scale_re, scale_im, *, B, N, FT,
                     num_f_bins, num_t_bins, Bp, Np, FTp, tb, tn, tk,
                     vmem_limit):
    nj = FTp // tn
    nk = Np // tk

    xb = jnp.pad(x.astype(jnp.bfloat16), ((0, Bp - B), (0, Np - N)))

    kernel = _qt_kernel_direct if nk == 1 else _qt_kernel_acc
    scratch = [] if nk == 1 else [pltpu.VMEM((tb, 2 * tn), jnp.float32)]

    out = pl.pallas_call(
        kernel,
        out_shape=jax.ShapeDtypeStruct((Bp, 2 * FTp), jnp.float32),
        grid_spec=pltpu.PrefetchScalarGridSpec(
            num_scalar_prefetch=0,
            grid=(Bp // tb, nj, nk),                 # reduction axis last
            in_specs=[
                # x block streamed per (batch tile, reduction chunk).
                pl.BlockSpec((tb, tk), lambda b, j, k: (b, k)),
                # fused int8 [re|im] basis tile.
                pl.BlockSpec((tk, 2 * tn), lambda b, j, k: (k, j)),
            ],
            # single fused output stream; re/im split happens in the wrapper.
            out_specs=pl.BlockSpec((tb, 2 * tn), lambda b, j, k: (b, j)),
            scratch_shapes=scratch,
        ),
        compiler_params=pltpu.CompilerParams(
            dimension_semantics=("parallel", "parallel", "arbitrary"),
            vmem_limit_bytes=vmem_limit,
        ),
    )(xb, basis_q)

    # Un-fuse [re | im] per column tile, drop padding, apply dequant scales.
    out = out.reshape(Bp, nj, 2, tn)
    re = out[:, :, 0, :].reshape(Bp, FTp)[:B, :FT] * scale_re[None, :FT]
    im = out[:, :, 1, :].reshape(Bp, FTp)[:B, :FT] * scale_im[None, :FT]

    energy = (re * re + im * im).reshape(B, num_f_bins, num_t_bins)
    phase = jnp.arctan2(im, re).reshape(B, num_f_bins, num_t_bins)
    # channel 0: Q-tile energy, channel 1: phase  ->  (B, 2, F, T)
    return jnp.stack([energy, phase], axis=1)


# ----------------------------------------------------------------------------
# Setup: build / quantize / fuse the basis once and return a forward closure.
# ----------------------------------------------------------------------------
def make_qt_forward(ts_length, sample_rate, duration, q, frange,
                    num_f_bins, num_t_bins, logf=True,
                    tile_n=None, tile_k=None):
    N = int(ts_length)
    FT = int(num_f_bins * num_t_bins)
    Np = -(-N // 256) * 256            # pad reduction dim with zero samples
    FTp = -(-FT // 128) * 128          # pad column dim with zero bins

    vmem_limit = int(_pick_vmem_limit())
    tn, tk = _pick_tiles(Np, FTp, vmem_limit)
    if tile_n is not None:
        assert FTp % tile_n == 0 and tile_n % 128 == 0
        tn = int(tile_n)
    if tile_k is not None:
        assert Np % tile_k == 0 and tile_k % 256 == 0
        tk = int(tile_k)

    # --- built ONCE, outside the jitted forward (review item 1) ---
    br, bi = _build_qt_basis(ts_length, sample_rate, duration, q, frange,
                             num_f_bins, num_t_bins, logf=logf)
    br = jnp.pad(br, ((0, Np - N), (0, FTp - FT)))
    bi = jnp.pad(bi, ((0, Np - N), (0, FTp - FT)))
    br_q, scale_re = _quantize_per_column(br)
    bi_q, scale_im = _quantize_per_column(bi)
    nj = FTp // tn
    basis_q = jnp.concatenate(
        [br_q.reshape(Np, nj, tn), bi_q.reshape(Np, nj, tn)],
        axis=2).reshape(Np, 2 * FTp)                    # int8, (Np, 2*FTp)
    del br, bi, br_q, bi_q

    def forward(x):
        B, n_in = x.shape
        assert n_in == N, f"expected ts_length={N}, got {n_in}"
        if B <= 256:
            Bp = max(16, -(-B // 16) * 16)   # 16-sublane bf16 packing
            tb = Bp
        else:
            Bp = -(-B // 256) * 256
            tb = 256
        return _qt_forward_impl(
            x, basis_q, scale_re, scale_im,
            B=int(B), N=N, FT=FT,
            num_f_bins=int(num_f_bins), num_t_bins=int(num_t_bins),
            Bp=int(Bp), Np=Np, FTp=FTp,
            tb=int(tb), tn=tn, tk=tk, vmem_limit=vmem_limit)

    return forward


if __name__ == "__main__":
    # Small, self-consistent QT_dataset configuration (whiten=False path).
    ts_length = 2048
    sample_rate = 512.0
    duration = ts_length / sample_rate            # 4.0 s
    q = 12
    frange = (8.0, 200.0)                         # below Nyquist (256 Hz)
    num_f_bins = 16
    num_t_bins = 64                               # FT = 1024

    key = jax.random.PRNGKey(0)
    batch = jax.random.normal(key, (2, ts_length), dtype=jnp.float32)

    # Plain-JAX f32 reference for the loose numerical check.
    br, bi = _build_qt_basis(ts_length, sample_rate, duration, q, frange,
                             num_f_bins, num_t_bins, logf=True)
    ref_re = batch @ br
    ref_im = batch @ bi
    ref_energy = (ref_re ** 2 + ref_im ** 2).reshape(2, num_f_bins, num_t_bins)
    ref_scale = float(jnp.max(jnp.abs(ref_energy))) + 1e-30

    # Auto tiling: for this config N // tk == 1 -> scratch-free direct kernel.
    fwd = make_qt_forward(ts_length, sample_rate, duration, q, frange,
                          num_f_bins, num_t_bins, logf=True)
    out = jax.block_until_ready(fwd(batch))
    assert out.shape == (2, 2, num_f_bins, num_t_bins)
    assert bool(jnp.all(jnp.isfinite(out)))
    rel_err = float(jnp.max(jnp.abs(out[:, 0] - ref_energy))) / ref_scale
    assert rel_err < 1e-1, f"energy mismatch (direct path): rel_err={rel_err}"

    # Forced smaller reduction tile: exercises the multi-step accumulator path.
    fwd_acc = make_qt_forward(ts_length, sample_rate, duration, q, frange,
                              num_f_bins, num_t_bins, logf=True, tile_k=1024)
    out_acc = jax.block_until_ready(fwd_acc(batch))
    assert bool(jnp.all(jnp.isfinite(out_acc)))
    rel_err_acc = float(jnp.max(jnp.abs(out_acc[:, 0] - ref_energy))) / ref_scale
    assert rel_err_acc < 1e-1, f"energy mismatch (acc path): rel_err={rel_err_acc}"

    print("KERNEL_OK")
</pallas_src>

<mosaic_0001>
module attributes {stable_mosaic.version = 11 : i64} {
  func.func @_qt_kernel_direct(%arg0: i32, %arg1: i32, %arg2: i32, %arg3: memref<16x2048xbf16, #tpu.memory_space<vmem>>, %arg4: memref<2048x1024xi8, #tpu.memory_space<vmem>>, %arg5: memref<16x1024xf32, #tpu.memory_space<vmem>>) attributes {dimension_semantics = [#tpu.dimension_semantics<parallel>, #tpu.dimension_semantics<parallel>, #tpu.dimension_semantics<arbitrary>], iteration_bounds = array<i64: 1, 2, 1>, scalar_prefetch = 0 : i64, scratch_operands = 0 : i64, tpu.core_type = #tpu.core_type<tc>, window_params = [{transform_indices = @transform_0, window_bounds = array<i64: 16, 2048>}, {transform_indices = @transform_1, window_bounds = array<i64: 2048, 1024>}, {transform_indices = @transform_2, window_bounds = array<i64: 16, 1024>}]} {
    %c0 = arith.constant 0 : index
    %c0_0 = arith.constant 0 : index
    %0 = vector.load %arg3[%c0, %c0_0] : memref<16x2048xbf16, #tpu.memory_space<vmem>>, vector<16x2048xbf16>
    %c0_1 = arith.constant 0 : index
    %c0_2 = arith.constant 0 : index
    %1 = vector.load %arg4[%c0_1, %c0_2] : memref<2048x1024xi8, #tpu.memory_space<vmem>>, vector<2048x1024xi8>
    %2 = arith.sitofp %1 : vector<2048x1024xi8> to vector<2048x1024xbf16>
    %cst = arith.constant dense<0.000000e+00> : vector<16x1024xf32>
    %3 = tpu.matmul %0, %2, %cst {dimension_numbers = #tpu.dot_dimension_numbers<[1], [0], [0], [1], [0, 0, 1, 1], [], []>} : vector<16x2048xbf16>, vector<2048x1024xbf16>, vector<16x1024xf32> -> vector<16x1024xf32>
    %c0_3 = arith.constant 0 : index
    %c0_4 = arith.constant 0 : index
    %4 = vector.load %arg5[%c0_3, %c0_4] : memref<16x1024xf32, #tpu.memory_space<vmem>>, vector<16x1024xf32>
    tpu.vector_store %arg5[%c0_3, %c0_4], %3 {strides = array<i32>} : memref<16x1024xf32, #tpu.memory_space<vmem>>, vector<16x1024xf32>,
    return
  }
  func.func @transform_0(%arg0: i32, %arg1: i32, %arg2: i32) -> (i32, i32) {
    %c0_i32 = arith.constant 0 : i32
    return %arg0, %arg2 : i32, i32
  }
  func.func @transform_1(%arg0: i32, %arg1: i32, %arg2: i32) -> (i32, i32) {
    %c0_i32 = arith.constant 0 : i32
    return %arg2, %arg1 : i32, i32
  }
  func.func @transform_2(%arg0: i32, %arg1: i32, %arg2: i32) -> (i32, i32) {
    %c0_i32 = arith.constant 0 : i32
    return %arg0, %arg1 : i32, i32
  }
}

</mosaic_0001>

<bundles_post_ra>
// kernel: _qt_forward_impl.1
= control target key start
LH: loop header
LB: loop body
LE: loop exit
PB: predicated region body
PF: predicated region fallthrough
CT: control target
= control target key end

     0   :  { %7 = vsyncpa [#allocation3], 0  ;;  %s4610_s0 = inlined_call_operand.vmem [shape: bf16[16,2048], index: 0, kind: input, shape index: {}]   ;;  %s4611_s1 = inlined_call_operand.hbm [shape: s8[2048,2048], index: 1, kind: input, shape index: {}]   ;;  %s4612_s2 = inlined_call_operand.vmem [shape: f32[16,2048], index: 2, kind: output, shape index: {}]  }
   0x1   :  { %9 = vsyncpa [#allocation3 + $0x1], 0  ;;  %s3718_s9 = smov 0   ;;  %s3720_s10 = smov 0  }
   0x2   :  { %s3722_s11 = smov 0   ;;  %s3724_s12 = smov 0  }
   0x3   :  { %s3726_s13 = smov 0   ;;  %s3728_s14 = smov 0  }
   0x4 LB: > { %s3413_s15 = sadd.s32 4294967295, %s3697_s14   ;;  %s30_s16 = sadd.s32 1, %s3693_s13  ;;  %s3697_s14 = sphi %s3728_s14, %s15_s14   ;;  %s3693_s13 = sphi %s3726_s13, %s4623_s13   ;;  %s3689_s12 = sphi %s3724_s12, %s4622_s12   ;;  %s3685_s11 = sphi %s3722_s11, %s4621_s11   ;;  %s3681_s10 = sphi %s3720_s10, %s4620_s10   ;;  %s3677_s9 = sphi %s3718_s9, %s4619_s9  }
   0x5   : > { %p32_p0 = scmp.ge.s32.totalorder %s30_s16, 2  ;;  %s71_s17 = sadd.s32 1, %s3685_s11 }
   0x6   : > { %p78_p1 = scmp.ne.s32.totalorder %s3685_s11, %s3681_s10  ;;  %p79_p2 = scmp.eq.s32.totalorder %s3697_s14, 0 }
   0x7   : > { %s4625_s16 = smov (%p32_p0, %s30_s16), 0  ;;  %p84_p4 = scmp.ne.s32.totalorder %s3681_s10, %s3677_s9 }
   0x8   : > { %p3754_p3 = por %p79_p2, %p78_p1  ;;  %s67_s19 = ssub.s32 %s3693_s13, %s4625_s16 }
   0x9   : > { %p85_p5 = scmp.eq.s32.totalorder %s3413_s15, 0  ;;  %p69_p6 = scmp.eq.s32.totalorder %s67_s19, 0 }
   0xa   : > { %p110_p7 = scmp.eq.s32.totalorder %s3413_s15, 1  ;;  %p3565_p10 = scmp.lt.s32.totalorder %s3697_s14, 2 }
   0xb   : > { %p3761_p8 = por %p85_p5, %p84_p4  ;;  %s151_s23 = sand.u32 1, %s3685_s11  }
   0xc   : > { %s3766_s21 = scalar_select %p69_p6, %s3685_s11, %s71_s17  }
   0xd   : > { %p3768_p9 = por %p110_p7, %p78_p1  ;;  %s3445_s24 = sshll.u32 %s3693_s13, 10 }
   0xe   : > { %s3418_s25 = sshll.u32 %s151_s23, 12  ;;  %s3778_s28 = scalar_lea.hbm %s4611_s1, %s3445_s24 }
   0xf   : > { %s4615_s22 = scalar_select %p3768_p9, 1, 0 }
  0x10   : > { %s155_s29 = scalar_lea.vmem [#allocation2], %s3418_s25  ;;  %p3782_p11 = pnand %p3565_p10, %p3754_p3 }
  0x11   : > { %s165_s30 = sshll.u32 %s155_s29, 4  ;;  %s3789_s4 = scalar_lea.sflag [#allocation3], %s151_s23  ;;  %s3786_s30 = int_to_ptr.vmem [resolvable:$true] %s165_s30 }
  0x12   : > { %s3617_s5 = scalar_lea.hbm %s3778_s28, 65536  ;;  %p3619_p0 = pneg %p3782_p11 }
  0x13   : > { %p3618_p13 = scmp.ne.s32.totalorder %s3778_s28, %s3617_s5  ;;  %s3622_s8 = scalar_lea.hbm %s4611_s1, 131072 }
  0x14   : > { %p3623_p3 = scmp.lt.u32.totalorder %s3778_s28, %s4611_s1  ;;  %p3624_p4 = scmp.lt.u32.totalorder %s3622_s8, %s3617_s5 }
  0x15   : > { %p3620_p1 = pnand %p3619_p0, %p3618_p13  ;;  %p3626_p6 = scmp.lt.u32.totalorder %s3617_s5, %s3778_s28 }
  0x16   : > { %p3625_p5 = por %p3624_p4, %p3623_p3 }
  0x17   : > { %p3621_p2 = pneg %p3620_p1 }
  0x18   : > { %p3627_p7 = por %p3626_p6, %p3625_p5 }
  0x1a   : > { %p3628_p10 = pnand %p3627_p7, %p3621_p2 }
  0x1c   : > { %3631 = shalt.err (!%p3628_p10)
}
  0x1d   : > { %s3632_s17 = scalar_lea.vmem %s3786_s30, 65536  ;;  %s3699_s18 = smov [#allocation2]  }
  0x1e   : > { %p3633_p13 = scmp.ne.s32.totalorder %s3786_s30, %s3632_s17  ;;  %s3637_s19 = sshll.u32 %s3699_s18, 4  ;;  %s3638_s19 = int_to_ptr.vmem [resolvable:$false] %s3637_s19 }
  0x1f   : > { %s3639_s23 = scalar_lea.vmem %s3638_s19, 131072  ;;  %p3640_p9 = scmp.lt.s32.totalorder %s3786_s30, %s3638_s19 }
  0x20   : > { %p3635_p1 = pnand %p3633_p13, %p3619_p0  ;;  %p3641_p3 = scmp.lt.s32.totalorder %s3639_s23, %s3632_s17 }
  0x22   : > { %p3636_p12 = pneg %p3635_p1  ;;  %p3642_p4 = por %p3641_p3, %p3640_p9 }
  0x24   : > { %p3643_p5 = pnand %p3642_p4, %p3636_p12 }
  0x26   : > { %3646 = shalt.err (!%p3643_p5)
}
  0x27   : > { %s3700_s24 = smov 2048   ;;  %s3701_s25 = smov 1024  }
  0x28   : > { %s3702_s26 = smov 64   ;;  %p173_p0 = scmp.lt.s32.totalorder %s3697_s14, 3 }
  0x29   : > { %3564 = dma.hbm_to_vmem [thread:$0]  (!%p3782_p11), %s3778_s28, 65536, %s3786_s30, %s3789_s4, %s3700_s24, %s3701_s25, %s3702_s26  }
  0x2a   : > { %p4617_p2 = scmp.ge.s32.totalorder %s3697_s14, 1 }
  0x2c   : > { %p174_p6 = pnand %p4617_p2, %p173_p0 }
  0x2d   : > { %s3821_s27 = sand.u32 (!%p174_p6), 1, %s3681_s10  }
  0x2e   : > { %177 = sbr.rel (%p174_p6) target bundleno = 1305 (0x519), region = 28  ;;  %s3422_s29 = sshll.u32 (!%p174_p6), %s3821_s27, 12 }
  0x2f   : > { %s180_s5 = scalar_lea.sflag (!%p174_p6), [#allocation3], %s3821_s27  ;;  %s3825_s6 = scalar_lea.vmem (!%p174_p6), [#allocation2], %s3422_s29 }
  0x35   : > { %3672 = dma.done.wait (%p3761_p8), %s180_s5, 65536  }
  0x36   : > { %3674 = vsyncadd (%p3761_p8), %s180_s5, 4294901760  ;;  %v246_v0 = vld [vmem:[%s3825_s6 + $0x8] sm:$0xff]  ;;  %v248_v1 = vld [vmem:[%s3825_s6 + $0x18] sm:$0xff]  ;;  %s3423_s25 = sshll.u32 %s3821_s27, 7  ;;  %p4618_p8 = scmp.ne.s32.totalorder %s4615_s22, 0 }
  0x37   : > { %v245_v2 = vld [vmem:[%s3825_s6] sm:$0xff]  ;;  %v758_v3 = vunpack.c.l.s8.bf16 %v246_v0  ;;  %v766_v4 = vunpack.c.h.s8.bf16 %v246_v0  ;;  %v760_v5 = vunpack.c.l.s8.bf16 %v248_v1  ;;  %v768_v6 = vunpack.c.h.s8.bf16 %v248_v1  ;;  %v247_v7 = vld [vmem:[%s3825_s6 + $0x10] sm:$0xff]  ;;  %v254_v10 = vld [vmem:[%s3825_s6 + $0x48] sm:$0xff]  ;;  %s4390_s26 = scalar_lea.vmem [#allocation4], %s3423_s25  ;;  %s3446_s27 = sshll.u32 (%p4618_p8), %s3689_s12, 6 }
  0x38   : > { %v757_v8 = vunpack.c.l.s8.bf16 %v245_v2  ;;  %v759_v9 = vunpack.c.l.s8.bf16 %v247_v7  ;;  %v256_v11 = vld [vmem:[%s3825_s6 + $0x58] sm:$0xff]  ;;  %v765_v12 = vunpack.c.h.s8.bf16 %v245_v2  ;;  %v767_v13 = vunpack.c.h.s8.bf16 %v247_v7  ;;  %v253_v16 = vld [vmem:[%s3825_s6 + $0x40] sm:$0xff]  ;;  %v255_v17 = vld [vmem:[%s3825_s6 + $0x50] sm:$0xff]  ;;  %s3265_s5 = scalar_lea.vmem (%p4618_p8), %s4612_s2, %s3446_s27 }
  0x39   : > { %1861 = vmatprep.subr.bf16.mxu0 %v758_v3  ;;  %2205 = vmatprep.subr.bf16.mxu1 %v760_v5  ;;  %v774_v14 = vunpack.c.l.s8.bf16 %v254_v10  ;;  %v776_v15 = vunpack.c.l.s8.bf16 %v256_v11  ;;  %v773_v18 = vunpack.c.l.s8.bf16 %v253_v16  ;;  %v775_v19 = vunpack.c.l.s8.bf16 %v255_v17  ;;  %v262_v22 = vld [vmem:[%s3825_s6 + $0x88] sm:$0xff]  ;;  %v264_v23 = vld [vmem:[%s3825_s6 + $0x98] sm:$0xff]  ;;  %v261_v28 = vld [vmem:[%s3825_s6 + $0x80] sm:$0xff] }
  0x3a   : > { %1862 = vmatpush1.bf16.msra.mxu0 %v757_v8  ;;  %2206 = vmatpush1.bf16.msra.mxu1 %v759_v9  ;;  %v782_v20 = vunpack.c.h.s8.bf16 %v254_v10  ;;  %v784_v21 = vunpack.c.h.s8.bf16 %v256_v11  ;;  %v781_v24 = vunpack.c.h.s8.bf16 %v253_v16  ;;  %v783_v25 = vunpack.c.h.s8.bf16 %v255_v17  ;;  %v263_v29 = vld [vmem:[%s3825_s6 + $0x90] sm:$0xff]  ;;  %v3846_v30 = vld [vmem:[%s4610_s0] sm:$0xff]  ;;  %v270_v37 = vld [vmem:[%s3825_s6 + $0xc8] sm:$0xff] }
  0x3b   : > { %1863 = vmatprep.subr.bf16.mxu0 %v766_v4  ;;  %2207 = vmatprep.subr.bf16.mxu1 %v768_v6  ;;  %v790_v26 = vunpack.c.l.s8.bf16 %v262_v22  ;;  %v792_v27 = vunpack.c.l.s8.bf16 %v264_v23  ;;  %v3851_v31 = vld [vmem:[%s4610_s0 + $0x40] sm:$0xff]  ;;  %v789_v32 = vunpack.c.l.s8.bf16 %v261_v28  ;;  %v791_v33 = vunpack.c.l.s8.bf16 %v263_v29  ;;  %v272_v38 = vld [vmem:[%s3825_s6 + $0xd8] sm:$0xff]  ;;  %v271_v44 = vld [vmem:[%s3825_s6 + $0xd0] sm:$0xff] }
  0x3c   : > { %v798_v34 = vunpack.c.h.s8.bf16 %v262_v22  ;;  %v800_v35 = vunpack.c.h.s8.bf16 %v264_v23  ;;  %v3855_v36 = vcombine.high %v3846_v30, %v3851_v31  ;;  %v797_v39 = vunpack.c.h.s8.bf16 %v261_v28  ;;  %v269_v43 = vld [vmem:[%s3825_s6 + $0xc0] sm:$0xff]  ;;  %v278_v49 = vld [vmem:[%s3825_s6 + $0x108] sm:$0xff]  ;;  %v280_v50 = vld [vmem:[%s3825_s6 + $0x118] sm:$0xff] }
  0x3d   : > { %v799_v40 = vunpack.c.h.s8.bf16 %v263_v29  ;;  %v806_v41 = vunpack.c.l.s8.bf16 %v270_v37  ;;  %v808_v42 = vunpack.c.l.s8.bf16 %v272_v38  ;;  %v805_v45 = vunpack.c.l.s8.bf16 %v269_v43  ;;  %v277_v55 = vld [vmem:[%s3825_s6 + $0x100] sm:$0xff]  ;;  %v279_v56 = vld [vmem:[%s3825_s6 + $0x110] sm:$0xff]  ;;  %v286_v61 = vld [vmem:[%s3825_s6 + $0x148] sm:$0xff] }
  0x3e   : > { %1864 = vmatpush1.bf16.msra.mxu0 %v765_v12  ;;  %2208 = vmatpush1.bf16.msra.mxu1 %v767_v13  ;;  %v807_v46 = vunpack.c.l.s8.bf16 %v271_v44  ;;  %v814_v47 = vunpack.c.h.s8.bf16 %v270_v37  ;;  %v816_v48 = vunpack.c.h.s8.bf16 %v272_v38  ;;  %v813_v51 = vunpack.c.h.s8.bf16 %v269_v43  ;;  %v288_v62 = vld [vmem:[%s3825_s6 + $0x158] sm:$0xff]  ;;  %v285_v3 = vld [vmem:[%s3825_s6 + $0x140] sm:$0xff]  ;;  %v287_v4 = vld [vmem:[%s3825_s6 + $0x150] sm:$0xff] }
  0x3f   : > { %1865 = vmatprep.subr.bf16.mxu0 %v774_v14  ;;  %2209 = vmatprep.subr.bf16.mxu1 %v776_v15  ;;  %v815_v52 = vunpack.c.h.s8.bf16 %v271_v44  ;;  %v822_v53 = vunpack.c.l.s8.bf16 %v278_v49  ;;  %v824_v54 = vunpack.c.l.s8.bf16 %v280_v50  ;;  %v821_v57 = vunpack.c.l.s8.bf16 %v277_v55  ;;  %v294_v9 = vld [vmem:[%s3825_s6 + $0x188] sm:$0xff]  ;;  %v296_v10 = vld [vmem:[%s3825_s6 + $0x198] sm:$0xff]  ;;  %v293_v15 = vld [vmem:[%s3825_s6 + $0x180] sm:$0xff] }
  0x40   : > { %1893 = vmatprep.mubr.bf16.mxu0 %v3855_v36  ;;  %2237 = vmatprep.mubr.bf16.mxu1 %v3855_v36  ;;  %v823_v58 = vunpack.c.l.s8.bf16 %v279_v56  ;;  %v830_v59 = vunpack.c.h.s8.bf16 %v278_v49  ;;  %v832_v60 = vunpack.c.h.s8.bf16 %v280_v50  ;;  %v829_v63 = vunpack.c.h.s8.bf16 %v277_v55  ;;  %v295_v16 = vld [vmem:[%s3825_s6 + $0x190] sm:$0xff]  ;;  %v304_v22 = vld [vmem:[%s3825_s6 + $0x1d8] sm:$0xff] }
  0x41   : > { %v831_v0 = vunpack.c.h.s8.bf16 %v279_v56  ;;  %v838_v1 = vunpack.c.l.s8.bf16 %v286_v61  ;;  %v840_v2 = vunpack.c.l.s8.bf16 %v288_v62  ;;  %v837_v5 = vunpack.c.l.s8.bf16 %v285_v3  ;;  %v303_v28 = vld [vmem:[%s3825_s6 + $0x1d0] sm:$0xff]  ;;  %v312_v37 = vld [vmem:[%s3825_s6 + $0x218] sm:$0xff]  ;;  %v317_v56 = vld [vmem:[%s3825_s6 + $0x240] sm:$0xff] }
  0x42   : > { %1866 = vmatpush1.bf16.msra.mxu0 %v773_v18  ;;  %2210 = vmatpush1.bf16.msra.mxu1 %v775_v19  ;;  %v839_v6 = vunpack.c.l.s8.bf16 %v287_v4  ;;  %v846_v7 = vunpack.c.h.s8.bf16 %v286_v61  ;;  %v848_v8 = vunpack.c.h.s8.bf16 %v288_v62  ;;  %v845_v11 = vunpack.c.h.s8.bf16 %v285_v3  ;;  %v311_v43 = vld [vmem:[%s3825_s6 + $0x210] sm:$0xff]  ;;  %v320_v50 = vld [vmem:[%s3825_s6 + $0x258] sm:$0xff]  ;;  %v326_v62 = vld [vmem:[%s3825_s6 + $0x288] sm:$0xff] }
  0x43   : > { %1867 = vmatprep.subr.bf16.mxu0 %v782_v20  ;;  %2211 = vmatprep.subr.bf16.mxu1 %v784_v21  ;;  %v847_v12 = vunpack.c.h.s8.bf16 %v287_v4  ;;  %v854_v13 = vunpack.c.l.s8.bf16 %v294_v9  ;;  %v856_v14 = vunpack.c.l.s8.bf16 %v296_v10  ;;  %v853_v17 = vunpack.c.l.s8.bf16 %v293_v15  ;;  %v302_v21 = vld [vmem:[%s3825_s6 + $0x1c8] sm:$0xff]  ;;  %v325_v4 = vld [vmem:[%s3825_s6 + $0x280] sm:$0xff] }
  0x44   : > { %v855_v18 = vunpack.c.l.s8.bf16 %v295_v16  ;;  %v862_v19 = vunpack.c.h.s8.bf16 %v294_v9  ;;  %v864_v20 = vunpack.c.h.s8.bf16 %v296_v10  ;;  %v861_v23 = vunpack.c.h.s8.bf16 %v293_v15  ;;  %v334_v10 = vld [vmem:[%s3825_s6 + $0x2c8] sm:$0xff] }
  0x45   : > { %v3885_v44 = vcombine.low %v3846_v30, %v3851_v31  ;;  %v896_v30 = vunpack.c.h.s8.bf16 %v312_v37  ;;  %v318_v31 = vld [vmem:[%s3825_s6 + $0x248] sm:$0xff]  ;;  %v904_v55 = vunpack.c.l.s8.bf16 %v320_v50  ;;  %v912_v61 = vunpack.c.h.s8.bf16 %v320_v50 }
  0x46   : > { %1868 = vmatpush1.bf16.msra.mxu0 %v781_v24  ;;  %2212 = vmatpush1.bf16.msra.mxu1 %v783_v25  ;;  %v863_v24 = vunpack.c.h.s8.bf16 %v295_v16  ;;  %v870_v25 = vunpack.c.l.s8.bf16 %v302_v21  ;;  %v333_v16 = vld [vmem:[%s3825_s6 + $0x2c0] sm:$0xff]  ;;  %v358_v50 = vld [vmem:[%s3825_s6 + $0x388] sm:$0xff] }
  0x47   : > { %1869 = vmatprep.subr.bf16.mxu0 %v790_v26  ;;  %2213 = vmatprep.subr.bf16.mxu1 %v792_v27  ;;  %v872_v26 = vunpack.c.l.s8.bf16 %v304_v22  ;;  %v301_v27 = vld [vmem:[%s3825_s6 + $0x1c0] sm:$0xff] }
  0x48   : > { %v869_v29 = vunpack.c.l.s8.bf16 %v301_v27  ;;  %v877_v38 = vunpack.c.h.s8.bf16 %v301_v27 }
  0x4a   : > { %1870 = vmatpush1.bf16.msra.mxu0 %v789_v32  ;;  %2214 = vmatpush1.bf16.msra.mxu1 %v791_v33  ;;  %v871_v32 = vunpack.c.l.s8.bf16 %v303_v28  ;;  %v878_v33 = vunpack.c.h.s8.bf16 %v302_v21 }
  0x4b   : > { %1871 = vmatprep.subr.bf16.mxu0 %v798_v34  ;;  %2215 = vmatprep.subr.bf16.mxu1 %v800_v35  ;;  %v880_v34 = vunpack.c.h.s8.bf16 %v304_v22  ;;  %v310_v35 = vld [vmem:[%s3825_s6 + $0x208] sm:$0xff] }
  0x4c   : > { %v894_v49 = vunpack.c.h.s8.bf16 %v310_v35  ;;  %v342_v22 = vld [vmem:[%s3825_s6 + $0x308] sm:$0xff] }
  0x4e   : > { %1872 = vmatpush1.bf16.msra.mxu0 %v797_v39  ;;  %2216 = vmatpush1.bf16.msra.mxu1 %v799_v40  ;;  %v879_v39 = vunpack.c.h.s8.bf16 %v303_v28  ;;  %v886_v40 = vunpack.c.l.s8.bf16 %v310_v35  ;;  %v341_v28 = vld [vmem:[%s3825_s6 + $0x300] sm:$0xff] }
  0x4f   : > { %1873 = vmatprep.subr.bf16.mxu0 %v806_v41  ;;  %2217 = vmatprep.subr.bf16.mxu1 %v808_v42  ;;  %v888_v41 = vunpack.c.l.s8.bf16 %v312_v37  ;;  %v309_v42 = vld [vmem:[%s3825_s6 + $0x200] sm:$0xff]  ;;  %v350_v37 = vld [vmem:[%s3825_s6 + $0x348] sm:$0xff] }
  0x52   : > { %1874 = vmatpush1.bf16.msra.mxu0 %v805_v45  ;;  %2218 = vmatpush1.bf16.msra.mxu1 %v807_v46  ;;  %v3890_v45 = vld [vmem:[%s4610_s0 + $0x8] sm:$0xff] }
  0x53   : > { %1875 = vmatprep.subr.bf16.mxu0 %v814_v47  ;;  %2219 = vmatprep.subr.bf16.mxu1 %v816_v48  ;;  %v3895_v46 = vld [vmem:[%s4610_s0 + $0x48] sm:$0xff]  ;;  %v885_v47 = vunpack.c.l.s8.bf16 %v309_v42  ;;  %v887_v48 = vunpack.c.l.s8.bf16 %v311_v43 }
  0x56   : > { %1876 = vmatpush1.bf16.msra.mxu0 %v813_v51  ;;  %2220 = vmatpush1.bf16.msra.mxu1 %v815_v52  ;;  %v3901_v51 = vcombine.high %v3890_v45, %v3895_v46  ;;  %v893_v52 = vunpack.c.h.s8.bf16 %v309_v42 }
  0x57   : > { %1877 = vmatprep.subr.bf16.mxu0 %v822_v53  ;;  %2221 = vmatprep.subr.bf16.mxu1 %v824_v54  ;;  %v895_v53 = vunpack.c.h.s8.bf16 %v311_v43  ;;  %v902_v54 = vunpack.c.l.s8.bf16 %v318_v31  ;;  %v349_v43 = vld [vmem:[%s3825_s6 + $0x340] sm:$0xff] }
  0x5a   : > { %1878 = vmatpush1.bf16.msra.mxu0 %v821_v57  ;;  %2222 = vmatpush1.bf16.msra.mxu1 %v823_v58  ;;  %v319_v57 = vld [vmem:[%s3825_s6 + $0x250] sm:$0xff]  ;;  %v901_v58 = vunpack.c.l.s8.bf16 %v317_v56 }
  0x5b   : > { %1879 = vmatprep.subr.bf16.mxu0 %v830_v59  ;;  %2223 = vmatprep.subr.bf16.mxu1 %v832_v60  ;;  %v903_v59 = vunpack.c.l.s8.bf16 %v319_v57  ;;  %v910_v60 = vunpack.c.h.s8.bf16 %v318_v31 }
  0x5e   : > { %1880 = vmatpush1.bf16.msra.mxu0 %v829_v63  ;;  %2224 = vmatpush1.bf16.msra.mxu1 %v831_v0  ;;  %v328_v63 = vld [vmem:[%s3825_s6 + $0x298] sm:$0xff]  ;;  %v909_v0 = vunpack.c.h.s8.bf16 %v317_v56 }
  0x5f   : > { %1881 = vmatprep.subr.bf16.mxu0 %v838_v1  ;;  %2225 = vmatprep.subr.bf16.mxu1 %v840_v2  ;;  %v911_v1 = vunpack.c.h.s8.bf16 %v319_v57  ;;  %v918_v2 = vunpack.c.l.s8.bf16 %v326_v62  ;;  %v920_v3 = vunpack.c.l.s8.bf16 %v328_v63  ;;  %v928_v9 = vunpack.c.h.s8.bf16 %v328_v63  ;;  %v357_v57 = vld [vmem:[%s3825_s6 + $0x380] sm:$0xff]  ;;  %v366_v63 = vld [vmem:[%s3825_s6 + $0x3c8] sm:$0xff] }
  0x62   : > { %1882 = vmatpush1.bf16.msra.mxu0 %v837_v5  ;;  %2226 = vmatpush1.bf16.msra.mxu1 %v839_v6  ;;  %v327_v5 = vld [vmem:[%s3825_s6 + $0x290] sm:$0xff]  ;;  %v917_v6 = vunpack.c.l.s8.bf16 %v325_v4 }
  0x63   : > { %1883 = vmatprep.subr.bf16.mxu0 %v846_v7  ;;  %2227 = vmatprep.subr.bf16.mxu1 %v848_v8  ;;  %v919_v7 = vunpack.c.l.s8.bf16 %v327_v5  ;;  %v926_v8 = vunpack.c.h.s8.bf16 %v326_v62 }
  0x66   : > { %1884 = vmatpush1.bf16.msra.mxu0 %v845_v11  ;;  %2228 = vmatpush1.bf16.msra.mxu1 %v847_v12  ;;  %v336_v11 = vld [vmem:[%s3825_s6 + $0x2d8] sm:$0xff]  ;;  %v925_v12 = vunpack.c.h.s8.bf16 %v325_v4 }
  0x67   : > { %1885 = vmatprep.subr.bf16.mxu0 %v854_v13  ;;  %2229 = vmatprep.subr.bf16.mxu1 %v856_v14  ;;  %v927_v13 = vunpack.c.h.s8.bf16 %v327_v5  ;;  %v934_v14 = vunpack.c.l.s8.bf16 %v334_v10  ;;  %v936_v15 = vunpack.c.l.s8.bf16 %v336_v11  ;;  %v944_v21 = vunpack.c.h.s8.bf16 %v336_v11  ;;  %v365_v5 = vld [vmem:[%s3825_s6 + $0x3c0] sm:$0xff]  ;;  %v374_v11 = vld [vmem:[%s3825_s6 + $0x408] sm:$0xff] }
  0x6a   : > { %1886 = vmatpush1.bf16.msra.mxu0 %v853_v17  ;;  %2230 = vmatpush1.bf16.msra.mxu1 %v855_v18  ;;  %v335_v17 = vld [vmem:[%s3825_s6 + $0x2d0] sm:$0xff]  ;;  %v933_v18 = vunpack.c.l.s8.bf16 %v333_v16 }
  0x6b   : > { %1887 = vmatprep.subr.bf16.mxu0 %v862_v19  ;;  %2231 = vmatprep.subr.bf16.mxu1 %v864_v20  ;;  %v935_v19 = vunpack.c.l.s8.bf16 %v335_v17  ;;  %v942_v20 = vunpack.c.h.s8.bf16 %v334_v10 }
  0x6e   : > { %1888 = vmatpush1.bf16.msra.mxu0 %v861_v23  ;;  %2232 = vmatpush1.bf16.msra.mxu1 %v863_v24  ;;  %v344_v23 = vld [vmem:[%s3825_s6 + $0x318] sm:$0xff]  ;;  %v941_v24 = vunpack.c.h.s8.bf16 %v333_v16 }
  0x6f   : > { %1889 = vmatprep.subr.bf16.mxu0 %v870_v25  ;;  %2233 = vmatprep.subr.bf16.mxu1 %v872_v26  ;;  %v943_v25 = vunpack.c.h.s8.bf16 %v335_v17  ;;  %v950_v26 = vunpack.c.l.s8.bf16 %v342_v22  ;;  %v952_v27 = vunpack.c.l.s8.bf16 %v344_v23  ;;  %v960_v35 = vunpack.c.h.s8.bf16 %v344_v23  ;;  %v373_v17 = vld [vmem:[%s3825_s6 + $0x400] sm:$0xff] }
  0x72   : > { %1890 = vmatpush1.bf16.msra.mxu0 %v869_v29  ;;  %2234 = vmatpush1.bf16.msra.mxu1 %v871_v32  ;;  %v343_v29 = vld [vmem:[%s3825_s6 + $0x310] sm:$0xff]  ;;  %v949_v32 = vunpack.c.l.s8.bf16 %v341_v28 }
  0x73   : > { %1891 = vmatprep.subr.bf16.mxu0 %v878_v33  ;;  %2235 = vmatprep.subr.bf16.mxu1 %v880_v34  ;;  %v951_v33 = vunpack.c.l.s8.bf16 %v343_v29  ;;  %v958_v34 = vunpack.c.h.s8.bf16 %v342_v22  ;;  %v1013_v22 = vunpack.c.l.s8.bf16 %v373_v17 }
  0x76   : > { %1892 = vmatpush1.bf16.msra.mxu0 %v877_v38  ;;  %2236 = vmatpush1.bf16.msra.mxu1 %v879_v39  ;;  %v352_v38 = vld [vmem:[%s3825_s6 + $0x358] sm:$0xff]  ;;  %v957_v39 = vunpack.c.h.s8.bf16 %v341_v28 }
  0x77   : > { %1904 = vmatprep.subr.bf16.mxu0 %v886_v40  ;;  %2248 = vmatprep.subr.bf16.mxu1 %v888_v41  ;;  %v959_v40 = vunpack.c.h.s8.bf16 %v343_v29  ;;  %v966_v41 = vunpack.c.l.s8.bf16 %v350_v37  ;;  %v968_v42 = vunpack.c.l.s8.bf16 %v352_v38  ;;  %v976_v31 = vunpack.c.h.s8.bf16 %v352_v38 }
  0x79   : > { %1894 = vmatmul.mubr.bf16.vlgmr.msra.gmra.mrb[0].mxu0 %v3885_v44  ;;  %2238 = vmatmul.mubr.bf16.vlgmr.msra.gmra.mrb[0].mxu1 %v3885_v44 }
  0x7a   : > { %1905 = vmatpush1.bf16.msra.mxu0 %v885_v47  ;;  %2249 = vmatpush1.bf16.msra.mxu1 %v887_v48  ;;  %v351_v47 = vld [vmem:[%s3825_s6 + $0x350] sm:$0xff]  ;;  %v965_v48 = vunpack.c.l.s8.bf16 %v349_v43 }
  0x7b   : > { %1906 = vmatprep.subr.bf16.mxu0 %v894_v49  ;;  %2250 = vmatprep.subr.bf16.mxu1 %v896_v30  ;;  %v967_v49 = vunpack.c.l.s8.bf16 %v351_v47  ;;  %v974_v30 = vunpack.c.h.s8.bf16 %v350_v37 }
  0x7c   : > { %1936 = vmatprep.mubr.bf16.mxu0 %v3901_v51  ;;  %2280 = vmatprep.mubr.bf16.mxu1 %v3901_v51 }
  0x7e   : > { %1907 = vmatpush1.bf16.msra.mxu0 %v893_v52  ;;  %2251 = vmatpush1.bf16.msra.mxu1 %v895_v53  ;;  %v360_v52 = vld [vmem:[%s3825_s6 + $0x398] sm:$0xff]  ;;  %v973_v53 = vunpack.c.h.s8.bf16 %v349_v43 }
  0x7f   : > { %1908 = vmatprep.subr.bf16.mxu0 %v902_v54  ;;  %2252 = vmatprep.subr.bf16.mxu1 %v904_v55  ;;  %v975_v54 = vunpack.c.h.s8.bf16 %v351_v47  ;;  %v982_v55 = vunpack.c.l.s8.bf16 %v358_v50  ;;  %v984_v56 = vunpack.c.l.s8.bf16 %v360_v52  ;;  %v992_v62 = vunpack.c.h.s8.bf16 %v360_v52 }
  0x82   : > { %1909 = vmatpush1.bf16.msra.mxu0 %v901_v58  ;;  %2253 = vmatpush1.bf16.msra.mxu1 %v903_v59  ;;  %v359_v58 = vld [vmem:[%s3825_s6 + $0x390] sm:$0xff]  ;;  %v981_v59 = vunpack.c.l.s8.bf16 %v357_v57 }
  0x83   : > { %1910 = vmatprep.subr.bf16.mxu0 %v910_v60  ;;  %2254 = vmatprep.subr.bf16.mxu1 %v912_v61  ;;  %v983_v60 = vunpack.c.l.s8.bf16 %v359_v58  ;;  %v990_v61 = vunpack.c.h.s8.bf16 %v358_v50 }
  0x86   : > { %1911 = vmatpush1.bf16.msra.mxu0 %v909_v0  ;;  %2255 = vmatpush1.bf16.msra.mxu1 %v911_v1  ;;  %v368_v0 = vld [vmem:[%s3825_s6 + $0x3d8] sm:$0xff]  ;;  %v989_v1 = vunpack.c.h.s8.bf16 %v357_v57 }
  0x87   : > { %1912 = vmatprep.subr.bf16.mxu0 %v918_v2  ;;  %2256 = vmatprep.subr.bf16.mxu1 %v920_v3  ;;  %v991_v2 = vunpack.c.h.s8.bf16 %v359_v58  ;;  %v998_v3 = vunpack.c.l.s8.bf16 %v366_v63  ;;  %v1000_v4 = vunpack.c.l.s8.bf16 %v368_v0  ;;  %v1008_v10 = vunpack.c.h.s8.bf16 %v368_v0 }
  0x8a   : > { %1913 = vmatpush1.bf16.msra.mxu0 %v917_v6  ;;  %2257 = vmatpush1.bf16.msra.mxu1 %v919_v7  ;;  %v367_v6 = vld [vmem:[%s3825_s6 + $0x3d0] sm:$0xff]  ;;  %v997_v7 = vunpack.c.l.s8.bf16 %v365_v5 }
  0x8b   : > { %1914 = vmatprep.subr.bf16.mxu0 %v926_v8  ;;  %2258 = vmatprep.subr.bf16.mxu1 %v928_v9  ;;  %v999_v8 = vunpack.c.l.s8.bf16 %v367_v6  ;;  %v1006_v9 = vunpack.c.h.s8.bf16 %v366_v63 }
  0x8e   : > { %1915 = vmatpush1.bf16.msra.mxu0 %v925_v12  ;;  %2259 = vmatpush1.bf16.msra.mxu1 %v927_v13  ;;  %v376_v12 = vld [vmem:[%s3825_s6 + $0x418] sm:$0xff]  ;;  %v1005_v13 = vunpack.c.h.s8.bf16 %v365_v5 }
  0x8f   : > { %1916 = vmatprep.subr.bf16.mxu0 %v934_v14  ;;  %2260 = vmatprep.subr.bf16.mxu1 %v936_v15  ;;  %v1007_v14 = vunpack.c.h.s8.bf16 %v367_v6  ;;  %v1014_v15 = vunpack.c.l.s8.bf16 %v374_v11  ;;  %v1016_v16 = vunpack.c.l.s8.bf16 %v376_v12 }
  0x92   : > { %1917 = vmatpush1.bf16.msra.mxu0 %v933_v18  ;;  %2261 = vmatpush1.bf16.msra.mxu1 %v935_v19  ;;  %v375_v18 = vld [vmem:[%s3825_s6 + $0x410] sm:$0xff]  ;;  %v3939_v19 = vcombine.low %v3890_v45, %v3895_v46  ;;  %v1024_v45 = vunpack.c.h.s8.bf16 %v376_v12  ;;  %v382_v46 = vld [vmem:[%s3825_s6 + $0x448] sm:$0xff] }
  0x93   : > { %1918 = vmatprep.subr.bf16.mxu0 %v942_v20  ;;  %2262 = vmatprep.subr.bf16.mxu1 %v944_v21  ;;  %v3944_v20 = vld [vmem:[%s4610_s0 + $0x10] sm:$0xff]  ;;  %v1015_v23 = vunpack.c.l.s8.bf16 %v375_v18  ;;  %v1023_v28 = vunpack.c.h.s8.bf16 %v375_v18  ;;  %v1030_v29 = vunpack.c.l.s8.bf16 %v382_v46  ;;  %v1038_v38 = vunpack.c.h.s8.bf16 %v382_v46 }
  0x94   : > { %v3949_v21 = vld [vmem:[%s4610_s0 + $0x50] sm:$0xff] }
  0x96   : > { %1919 = vmatpush1.bf16.msra.mxu0 %v941_v24  ;;  %2263 = vmatpush1.bf16.msra.mxu1 %v943_v25  ;;  %v1022_v24 = vunpack.c.h.s8.bf16 %v374_v11  ;;  %v384_v25 = vld [vmem:[%s3825_s6 + $0x458] sm:$0xff] }
  0x97   : > { %1920 = vmatprep.subr.bf16.mxu0 %v950_v26  ;;  %2264 = vmatprep.subr.bf16.mxu1 %v952_v27  ;;  %v3955_v26 = vcombine.high %v3944_v20, %v3949_v21  ;;  %v1021_v27 = vunpack.c.h.s8.bf16 %v373_v17 }
  0x9a   : > { %1921 = vmatpush1.bf16.msra.mxu0 %v949_v32  ;;  %2265 = vmatpush1.bf16.msra.mxu1 %v951_v33  ;;  %v1032_v32 = vunpack.c.l.s8.bf16 %v384_v25  ;;  %v381_v33 = vld [vmem:[%s3825_s6 + $0x440] sm:$0xff] }
  0x9b   : > { %1922 = vmatprep.subr.bf16.mxu0 %v958_v34  ;;  %2266 = vmatprep.subr.bf16.mxu1 %v960_v35  ;;  %v383_v34 = vld [vmem:[%s3825_s6 + $0x450] sm:$0xff]  ;;  %v1029_v35 = vunpack.c.l.s8.bf16 %v381_v33 }
  0x9c   : > { %v1031_v37 = vunpack.c.l.s8.bf16 %v383_v34  ;;  %v1039_v43 = vunpack.c.h.s8.bf16 %v383_v34 }
  0x9e   : > { %1923 = vmatpush1.bf16.msra.mxu0 %v957_v39  ;;  %2267 = vmatpush1.bf16.msra.mxu1 %v959_v40  ;;  %v1040_v39 = vunpack.c.h.s8.bf16 %v384_v25  ;;  %v390_v40 = vld [vmem:[%s3825_s6 + $0x488] sm:$0xff] }
  0x9f   : > { %1924 = vmatprep.subr.bf16.mxu0 %v966_v41  ;;  %2268 = vmatprep.subr.bf16.mxu1 %v968_v42  ;;  %v392_v41 = vld [vmem:[%s3825_s6 + $0x498] sm:$0xff]  ;;  %v1037_v42 = vunpack.c.h.s8.bf16 %v381_v33  ;;  %v1046_v47 = vunpack.c.l.s8.bf16 %v390_v40  ;;  %v1054_v52 = vunpack.c.h.s8.bf16 %v390_v40 }
  0xa2   : > { %1925 = vmatpush1.bf16.msra.mxu0 %v965_v48  ;;  %2269 = vmatpush1.bf16.msra.mxu1 %v967_v49  ;;  %v1048_v48 = vunpack.c.l.s8.bf16 %v392_v41  ;;  %v389_v49 = vld [vmem:[%s3825_s6 + $0x480] sm:$0xff] }
  0xa3   : > { %1926 = vmatprep.subr.bf16.mxu0 %v974_v30  ;;  %2270 = vmatprep.subr.bf16.mxu1 %v976_v31  ;;  %v391_v30 = vld [vmem:[%s3825_s6 + $0x490] sm:$0xff]  ;;  %v1045_v31 = vunpack.c.l.s8.bf16 %v389_v49 }
  0xa4   : > { %v1047_v50 = vunpack.c.l.s8.bf16 %v391_v30  ;;  %v1055_v57 = vunpack.c.h.s8.bf16 %v391_v30 }
  0xa6   : > { %1927 = vmatpush1.bf16.msra.mxu0 %v973_v53  ;;  %2271 = vmatpush1.bf16.msra.mxu1 %v975_v54  ;;  %v1056_v53 = vunpack.c.h.s8.bf16 %v392_v41  ;;  %v398_v54 = vld [vmem:[%s3825_s6 + $0x4c8] sm:$0xff] }
  0xa7   : > { %1928 = vmatprep.subr.bf16.mxu0 %v982_v55  ;;  %2272 = vmatprep.subr.bf16.mxu1 %v984_v56  ;;  %v400_v55 = vld [vmem:[%s3825_s6 + $0x4d8] sm:$0xff]  ;;  %v1053_v56 = vunpack.c.h.s8.bf16 %v389_v49  ;;  %v1062_v58 = vunpack.c.l.s8.bf16 %v398_v54  ;;  %v1070_v0 = vunpack.c.h.s8.bf16 %v398_v54 }
  0xaa   : > { %1929 = vmatpush1.bf16.msra.mxu0 %v981_v59  ;;  %2273 = vmatpush1.bf16.msra.mxu1 %v983_v60  ;;  %v1064_v59 = vunpack.c.l.s8.bf16 %v400_v55  ;;  %v397_v60 = vld [vmem:[%s3825_s6 + $0x4c0] sm:$0xff] }
  0xab   : > { %1930 = vmatprep.subr.bf16.mxu0 %v990_v61  ;;  %2274 = vmatprep.subr.bf16.mxu1 %v992_v62  ;;  %v399_v61 = vld [vmem:[%s3825_s6 + $0x4d0] sm:$0xff]  ;;  %v1061_v62 = vunpack.c.l.s8.bf16 %v397_v60 }
  0xac   : > { %v1063_v63 = vunpack.c.l.s8.bf16 %v399_v61  ;;  %v1071_v5 = vunpack.c.h.s8.bf16 %v399_v61 }
  0xae   : > { %1931 = vmatpush1.bf16.msra.mxu0 %v989_v1  ;;  %2275 = vmatpush1.bf16.msra.mxu1 %v991_v2  ;;  %v1072_v1 = vunpack.c.h.s8.bf16 %v400_v55  ;;  %v406_v2 = vld [vmem:[%s3825_s6 + $0x508] sm:$0xff] }
  0xaf   : > { %1932 = vmatprep.subr.bf16.mxu0 %v998_v3  ;;  %2276 = vmatprep.subr.bf16.mxu1 %v1000_v4  ;;  %v408_v3 = vld [vmem:[%s3825_s6 + $0x518] sm:$0xff]  ;;  %v1069_v4 = vunpack.c.h.s8.bf16 %v397_v60  ;;  %v1078_v6 = vunpack.c.l.s8.bf16 %v406_v2  ;;  %v1086_v12 = vunpack.c.h.s8.bf16 %v406_v2 }
  0xb0   : > { %v3998_v2 = vld [vmem:[%s4610_s0 + $0x18] sm:$0xff] }
  0xb2   : > { %1933 = vmatpush1.bf16.msra.mxu0 %v997_v7  ;;  %2277 = vmatpush1.bf16.msra.mxu1 %v999_v8  ;;  %v1080_v7 = vunpack.c.l.s8.bf16 %v408_v3  ;;  %v405_v8 = vld [vmem:[%s3825_s6 + $0x500] sm:$0xff] }
  0xb3   : > { %1934 = vmatprep.subr.bf16.mxu0 %v1006_v9  ;;  %2278 = vmatprep.subr.bf16.mxu1 %v1008_v10  ;;  %v407_v9 = vld [vmem:[%s3825_s6 + $0x510] sm:$0xff]  ;;  %v1077_v10 = vunpack.c.l.s8.bf16 %v405_v8 }
  0xb4   : > { %v1079_v11 = vunpack.c.l.s8.bf16 %v407_v9  ;;  %v1087_v17 = vunpack.c.h.s8.bf16 %v407_v9 }
  0xb6   : > { %1935 = vmatpush1.bf16.msra.mxu0 %v1005_v13  ;;  %2279 = vmatpush1.bf16.msra.mxu1 %v1007_v14  ;;  %v1088_v13 = vunpack.c.h.s8.bf16 %v408_v3  ;;  %v414_v14 = vld [vmem:[%s3825_s6 + $0x548] sm:$0xff]  ;;  %v4003_v3 = vld [vmem:[%s4610_s0 + $0x58] sm:$0xff] }
  0xb7   : > { %1947 = vmatprep.subr.bf16.mxu0 %v1014_v15  ;;  %2291 = vmatprep.subr.bf16.mxu1 %v1016_v16  ;;  %v416_v15 = vld [vmem:[%s3825_s6 + $0x558] sm:$0xff]  ;;  %v1085_v16 = vunpack.c.h.s8.bf16 %v405_v8  ;;  %v1094_v18 = vunpack.c.l.s8.bf16 %v414_v14  ;;  %v1102_v25 = vunpack.c.h.s8.bf16 %v414_v14  ;;  %v4009_v8 = vcombine.high %v3998_v2, %v4003_v3  ;;  %v447_v14 = vld [vmem:[%s3825_s6 + $0x650] sm:$0xff] }
  0xb9   : > { %1937 = vmatmul.mubr.bf16.vlgmr.msra.gmra.mrb[0].mxu0 %v3939_v19  ;;  %2281 = vmatmul.mubr.bf16.vlgmr.msra.gmra.mrb[0].mxu1 %v3939_v19 }
  0xba   : > { %1948 = vmatpush1.bf16.msra.mxu0 %v1013_v22  ;;  %2292 = vmatpush1.bf16.msra.mxu1 %v1015_v23  ;;  %v1096_v22 = vunpack.c.l.s8.bf16 %v416_v15  ;;  %v413_v23 = vld [vmem:[%s3825_s6 + $0x540] sm:$0xff] }
  0xbb   : > { %1949 = vmatprep.subr.bf16.mxu0 %v1022_v24  ;;  %2293 = vmatprep.subr.bf16.mxu1 %v1024_v45  ;;  %v415_v24 = vld [vmem:[%s3825_s6 + $0x550] sm:$0xff]  ;;  %v1093_v45 = vunpack.c.l.s8.bf16 %v413_v23 }
  0xbc   : > { %1979 = vmatprep.mubr.bf16.mxu0 %v3955_v26  ;;  %2323 = vmatprep.mubr.bf16.mxu1 %v3955_v26  ;;  %v1095_v46 = vunpack.c.l.s8.bf16 %v415_v24  ;;  %v1103_v33 = vunpack.c.h.s8.bf16 %v415_v24 }
  0xbe   : > { %1950 = vmatpush1.bf16.msra.mxu0 %v1021_v27  ;;  %2294 = vmatpush1.bf16.msra.mxu1 %v1023_v28  ;;  %v1104_v27 = vunpack.c.h.s8.bf16 %v416_v15  ;;  %v422_v28 = vld [vmem:[%s3825_s6 + $0x588] sm:$0xff] }
  0xbf   : > { %1951 = vmatprep.subr.bf16.mxu0 %v1030_v29  ;;  %2295 = vmatprep.subr.bf16.mxu1 %v1032_v32  ;;  %v424_v29 = vld [vmem:[%s3825_s6 + $0x598] sm:$0xff]  ;;  %v1101_v32 = vunpack.c.h.s8.bf16 %v413_v23  ;;  %v1110_v34 = vunpack.c.l.s8.bf16 %v422_v28  ;;  %v1118_v41 = vunpack.c.h.s8.bf16 %v422_v28  ;;  %v455_v28 = vld [vmem:[%s3825_s6 + $0x690] sm:$0xff] }
  0xc0   : > { %v456_v23 = vld [vmem:[%s3825_s6 + $0x698] sm:$0xff] }
  0xc2   : > { %1952 = vmatpush1.bf16.msra.mxu0 %v1029_v35  ;;  %2296 = vmatpush1.bf16.msra.mxu1 %v1031_v37  ;;  %v1112_v35 = vunpack.c.l.s8.bf16 %v424_v29  ;;  %v421_v37 = vld [vmem:[%s3825_s6 + $0x580] sm:$0xff] }
  0xc3   : > { %1953 = vmatprep.subr.bf16.mxu0 %v1038_v38  ;;  %2297 = vmatprep.subr.bf16.mxu1 %v1040_v39  ;;  %v423_v38 = vld [vmem:[%s3825_s6 + $0x590] sm:$0xff]  ;;  %v1109_v39 = vunpack.c.l.s8.bf16 %v421_v37 }
  0xc4   : > { %v1111_v40 = vunpack.c.l.s8.bf16 %v423_v38  ;;  %v1119_v49 = vunpack.c.h.s8.bf16 %v423_v38 }
  0xc6   : > { %1954 = vmatpush1.bf16.msra.mxu0 %v1037_v42  ;;  %2298 = vmatpush1.bf16.msra.mxu1 %v1039_v43  ;;  %v1120_v42 = vunpack.c.h.s8.bf16 %v424_v29  ;;  %v430_v43 = vld [vmem:[%s3825_s6 + $0x5c8] sm:$0xff] }
  0xc7   : > { %1955 = vmatprep.subr.bf16.mxu0 %v1046_v47  ;;  %2299 = vmatprep.subr.bf16.mxu1 %v1048_v48  ;;  %v432_v47 = vld [vmem:[%s3825_s6 + $0x5d8] sm:$0xff]  ;;  %v1117_v48 = vunpack.c.h.s8.bf16 %v421_v37  ;;  %v1126_v30 = vunpack.c.l.s8.bf16 %v430_v43  ;;  %v1134_v55 = vunpack.c.h.s8.bf16 %v430_v43  ;;  %v463_v43 = vld [vmem:[%s3825_s6 + $0x6d0] sm:$0xff] }
  0xc8   : > { %v464_v37 = vld [vmem:[%s3825_s6 + $0x6d8] sm:$0xff] }
  0xca   : > { %1956 = vmatpush1.bf16.msra.mxu0 %v1045_v31  ;;  %2300 = vmatpush1.bf16.msra.mxu1 %v1047_v50  ;;  %v1128_v31 = vunpack.c.l.s8.bf16 %v432_v47  ;;  %v429_v50 = vld [vmem:[%s3825_s6 + $0x5c0] sm:$0xff] }
  0xcb   : > { %1957 = vmatprep.subr.bf16.mxu0 %v1054_v52  ;;  %2301 = vmatprep.subr.bf16.mxu1 %v1056_v53  ;;  %v431_v52 = vld [vmem:[%s3825_s6 + $0x5d0] sm:$0xff]  ;;  %v1125_v53 = vunpack.c.l.s8.bf16 %v429_v50 }
  0xcc   : > { %v1127_v54 = vunpack.c.l.s8.bf16 %v431_v52  ;;  %v1135_v60 = vunpack.c.h.s8.bf16 %v431_v52 }
  0xce   : > { %1958 = vmatpush1.bf16.msra.mxu0 %v1053_v56  ;;  %2302 = vmatpush1.bf16.msra.mxu1 %v1055_v57  ;;  %v1136_v56 = vunpack.c.h.s8.bf16 %v432_v47  ;;  %v438_v57 = vld [vmem:[%s3825_s6 + $0x608] sm:$0xff] }
  0xcf   : > { %1959 = vmatprep.subr.bf16.mxu0 %v1062_v58  ;;  %2303 = vmatprep.subr.bf16.mxu1 %v1064_v59  ;;  %v440_v58 = vld [vmem:[%s3825_s6 + $0x618] sm:$0xff]  ;;  %v1133_v59 = vunpack.c.h.s8.bf16 %v429_v50  ;;  %v1142_v61 = vunpack.c.l.s8.bf16 %v438_v57 }
  0xd0   : > { %v472_v50 = vld [vmem:[%s3825_s6 + $0x718] sm:$0xff] }
  0xd2   : > { %1960 = vmatpush1.bf16.msra.mxu0 %v1061_v62  ;;  %2304 = vmatpush1.bf16.msra.mxu1 %v1063_v63  ;;  %v1144_v62 = vunpack.c.l.s8.bf16 %v440_v58  ;;  %v437_v63 = vld [vmem:[%s3825_s6 + $0x600] sm:$0xff] }
  0xd3   : > { %1961 = vmatprep.subr.bf16.mxu0 %v1070_v0  ;;  %2305 = vmatprep.subr.bf16.mxu1 %v1072_v1  ;;  %v439_v0 = vld [vmem:[%s3825_s6 + $0x610] sm:$0xff]  ;;  %v3993_v1 = vcombine.low %v3944_v20, %v3949_v21  ;;  %v1152_v20 = vunpack.c.h.s8.bf16 %v440_v58  ;;  %v446_v21 = vld [vmem:[%s3825_s6 + $0x648] sm:$0xff]  ;;  %v1149_v9 = vunpack.c.h.s8.bf16 %v437_v63 }
  0xd6   : > { %1962 = vmatpush1.bf16.msra.mxu0 %v1069_v4  ;;  %2306 = vmatpush1.bf16.msra.mxu1 %v1071_v5  ;;  %v1141_v4 = vunpack.c.l.s8.bf16 %v437_v63  ;;  %v1143_v5 = vunpack.c.l.s8.bf16 %v439_v0  ;;  %v480_v63 = vld [vmem:[%s3825_s6 + $0x758] sm:$0xff] }
  0xd7   : > { %1963 = vmatprep.subr.bf16.mxu0 %v1078_v6  ;;  %2307 = vmatprep.subr.bf16.mxu1 %v1080_v7  ;;  %v1150_v6 = vunpack.c.h.s8.bf16 %v438_v57  ;;  %v448_v7 = vld [vmem:[%s3825_s6 + $0x658] sm:$0xff]  ;;  %v471_v57 = vld [vmem:[%s3825_s6 + $0x710] sm:$0xff] }
  0xda   : > { %1964 = vmatpush1.bf16.msra.mxu0 %v1077_v10  ;;  %2308 = vmatpush1.bf16.msra.mxu1 %v1079_v11  ;;  %v1151_v10 = vunpack.c.h.s8.bf16 %v439_v0  ;;  %v1158_v11 = vunpack.c.l.s8.bf16 %v446_v21 }
  0xdb   : > { %1965 = vmatprep.subr.bf16.mxu0 %v1086_v12  ;;  %2309 = vmatprep.subr.bf16.mxu1 %v1088_v13  ;;  %v1160_v12 = vunpack.c.l.s8.bf16 %v448_v7  ;;  %v445_v13 = vld [vmem:[%s3825_s6 + $0x640] sm:$0xff] }
  0xdc   : > { %v1157_v15 = vunpack.c.l.s8.bf16 %v445_v13  ;;  %v1165_v24 = vunpack.c.h.s8.bf16 %v445_v13  ;;  %v488_v13 = vld [vmem:[%s3825_s6 + $0x798] sm:$0xff] }
  0xde   : > { %1966 = vmatpush1.bf16.msra.mxu0 %v1085_v16  ;;  %2310 = vmatpush1.bf16.msra.mxu1 %v1087_v17  ;;  %v1159_v16 = vunpack.c.l.s8.bf16 %v447_v14  ;;  %v1166_v17 = vunpack.c.h.s8.bf16 %v446_v21  ;;  %v479_v21 = vld [vmem:[%s3825_s6 + $0x750] sm:$0xff] }
  0xdf   : > { %1967 = vmatprep.subr.bf16.mxu0 %v1094_v18  ;;  %2311 = vmatprep.subr.bf16.mxu1 %v1096_v22  ;;  %v1168_v18 = vunpack.c.h.s8.bf16 %v448_v7  ;;  %v454_v22 = vld [vmem:[%s3825_s6 + $0x688] sm:$0xff] }
  0xe2   : > { %1968 = vmatpush1.bf16.msra.mxu0 %v1093_v45  ;;  %2312 = vmatpush1.bf16.msra.mxu1 %v1095_v46  ;;  %v1167_v45 = vunpack.c.h.s8.bf16 %v447_v14  ;;  %v1174_v46 = vunpack.c.l.s8.bf16 %v454_v22 }
  0xe3   : > { %1969 = vmatprep.subr.bf16.mxu0 %v1102_v25  ;;  %2313 = vmatprep.subr.bf16.mxu1 %v1104_v27  ;;  %v1176_v25 = vunpack.c.l.s8.bf16 %v456_v23  ;;  %v453_v27 = vld [vmem:[%s3825_s6 + $0x680] sm:$0xff] }
  0xe4   : > { %v1173_v29 = vunpack.c.l.s8.bf16 %v453_v27  ;;  %v1181_v38 = vunpack.c.h.s8.bf16 %v453_v27  ;;  %v496_v27 = vld [vmem:[%s3825_s6 + $0x7d8] sm:$0xff] }
  0xe6   : > { %1970 = vmatpush1.bf16.msra.mxu0 %v1101_v32  ;;  %2314 = vmatpush1.bf16.msra.mxu1 %v1103_v33  ;;  %v1175_v32 = vunpack.c.l.s8.bf16 %v455_v28  ;;  %v1182_v33 = vunpack.c.h.s8.bf16 %v454_v22  ;;  %v487_v22 = vld [vmem:[%s3825_s6 + $0x790] sm:$0xff] }
  0xe7   : > { %1971 = vmatprep.subr.bf16.mxu0 %v1110_v34  ;;  %2315 = vmatprep.subr.bf16.mxu1 %v1112_v35  ;;  %v1184_v34 = vunpack.c.h.s8.bf16 %v456_v23  ;;  %v462_v35 = vld [vmem:[%s3825_s6 + $0x6c8] sm:$0xff] }
  0xea   : > { %1972 = vmatpush1.bf16.msra.mxu0 %v1109_v39  ;;  %2316 = vmatpush1.bf16.msra.mxu1 %v1111_v40  ;;  %v1183_v39 = vunpack.c.h.s8.bf16 %v455_v28  ;;  %v1190_v40 = vunpack.c.l.s8.bf16 %v462_v35 }
  0xeb   : > { %1973 = vmatprep.subr.bf16.mxu0 %v1118_v41  ;;  %2317 = vmatprep.subr.bf16.mxu1 %v1120_v42  ;;  %v1192_v41 = vunpack.c.l.s8.bf16 %v464_v37  ;;  %v461_v42 = vld [vmem:[%s3825_s6 + $0x6c0] sm:$0xff] }
  0xec   : > { %v1189_v47 = vunpack.c.l.s8.bf16 %v461_v42  ;;  %v1197_v52 = vunpack.c.h.s8.bf16 %v461_v42  ;;  %v504_v42 = vld [vmem:[%s3825_s6 + $0x818] sm:$0xff] }
  0xee   : > { %1974 = vmatpush1.bf16.msra.mxu0 %v1117_v48  ;;  %2318 = vmatpush1.bf16.msra.mxu1 %v1119_v49  ;;  %v1191_v48 = vunpack.c.l.s8.bf16 %v463_v43  ;;  %v1198_v49 = vunpack.c.h.s8.bf16 %v462_v35  ;;  %v495_v35 = vld [vmem:[%s3825_s6 + $0x7d0] sm:$0xff] }
  0xef   : > { %1975 = vmatprep.subr.bf16.mxu0 %v1126_v30  ;;  %2319 = vmatprep.subr.bf16.mxu1 %v1128_v31  ;;  %v1200_v30 = vunpack.c.h.s8.bf16 %v464_v37  ;;  %v470_v31 = vld [vmem:[%s3825_s6 + $0x708] sm:$0xff] }
  0xf2   : > { %1976 = vmatpush1.bf16.msra.mxu0 %v1125_v53  ;;  %2320 = vmatpush1.bf16.msra.mxu1 %v1127_v54  ;;  %v1199_v53 = vunpack.c.h.s8.bf16 %v463_v43  ;;  %v1206_v54 = vunpack.c.l.s8.bf16 %v470_v31 }
  0xf3   : > { %1977 = vmatprep.subr.bf16.mxu0 %v1134_v55  ;;  %2321 = vmatprep.subr.bf16.mxu1 %v1136_v56  ;;  %v1208_v55 = vunpack.c.l.s8.bf16 %v472_v50  ;;  %v469_v56 = vld [vmem:[%s3825_s6 + $0x700] sm:$0xff] }
  0xf4   : > { %v1205_v58 = vunpack.c.l.s8.bf16 %v469_v56  ;;  %v1213_v0 = vunpack.c.h.s8.bf16 %v469_v56 }
  0xf6   : > { %1978 = vmatpush1.bf16.msra.mxu0 %v1133_v59  ;;  %2322 = vmatpush1.bf16.msra.mxu1 %v1135_v60  ;;  %v1207_v59 = vunpack.c.l.s8.bf16 %v471_v57  ;;  %v1214_v60 = vunpack.c.h.s8.bf16 %v470_v31  ;;  %v503_v31 = vld [vmem:[%s3825_s6 + $0x810] sm:$0xff] }
  0xf7   : > { %1990 = vmatprep.subr.bf16.mxu0 %v1142_v61  ;;  %2334 = vmatprep.subr.bf16.mxu1 %v1144_v62  ;;  %v1216_v61 = vunpack.c.h.s8.bf16 %v472_v50  ;;  %v478_v62 = vld [vmem:[%s3825_s6 + $0x748] sm:$0xff]  ;;  %v4047_v50 = vcombine.low %v3998_v2, %v4003_v3  ;;  %v1280_v2 = vunpack.c.h.s8.bf16 %v504_v42 }
  0xf8   : > { %v510_v3 = vld [vmem:[%s3825_s6 + $0x848] sm:$0xff] }
  0xf9   : > { %1980 = vmatmul.mubr.bf16.vlgmr.msra.gmra.mrb[0].mxu0 %v3993_v1  ;;  %2324 = vmatmul.mubr.bf16.vlgmr.msra.gmra.mrb[0].mxu1 %v3993_v1 }
  0xfa   : > { %1991 = vmatpush1.bf16.msra.mxu0 %v1141_v4  ;;  %2335 = vmatpush1.bf16.msra.mxu1 %v1143_v5  ;;  %v1215_v4 = vunpack.c.h.s8.bf16 %v471_v57  ;;  %v1222_v5 = vunpack.c.l.s8.bf16 %v478_v62  ;;  %v512_v57 = vld [vmem:[%s3825_s6 + $0x858] sm:$0xff] }
  0xfb   : > { %1992 = vmatprep.subr.bf16.mxu0 %v1150_v6  ;;  %2336 = vmatprep.subr.bf16.mxu1 %v1152_v20  ;;  %v1224_v6 = vunpack.c.l.s8.bf16 %v480_v63  ;;  %v477_v20 = vld [vmem:[%s3825_s6 + $0x740] sm:$0xff] }
  0xfc   : > { %2022 = vmatprep.mubr.bf16.mxu0 %v4009_v8  ;;  %2366 = vmatprep.mubr.bf16.mxu1 %v4009_v8  ;;  %v1221_v7 = vunpack.c.l.s8.bf16 %v477_v20  ;;  %v1229_v14 = vunpack.c.h.s8.bf16 %v477_v20  ;;  %v1296_v20 = vunpack.c.h.s8.bf16 %v512_v57 }
  0xfe   : > { %1993 = vmatpush1.bf16.msra.mxu0 %v1149_v9  ;;  %2337 = vmatpush1.bf16.msra.mxu1 %v1151_v10  ;;  %v1223_v9 = vunpack.c.l.s8.bf16 %v479_v21  ;;  %v1230_v10 = vunpack.c.h.s8.bf16 %v478_v62  ;;  %v1288_v62 = vunpack.c.l.s8.bf16 %v512_v57  ;;  %v541_v57 = vld [vmem:[%s3825_s6 + $0x940] sm:$0xff] }
  0xff   : > { %1994 = vmatprep.subr.bf16.mxu0 %v1158_v11  ;;  %2338 = vmatprep.subr.bf16.mxu1 %v1160_v12  ;;  %v1232_v11 = vunpack.c.h.s8.bf16 %v480_v63  ;;  %v486_v12 = vld [vmem:[%s3825_s6 + $0x788] sm:$0xff]  ;;  %v509_v63 = vld [vmem:[%s3825_s6 + $0x840] sm:$0xff] }
 0x102   : > { %1995 = vmatpush1.bf16.msra.mxu0 %v1157_v15  ;;  %2339 = vmatpush1.bf16.msra.mxu1 %v1159_v16  ;;  %v1231_v15 = vunpack.c.h.s8.bf16 %v479_v21  ;;  %v1238_v16 = vunpack.c.l.s8.bf16 %v486_v12  ;;  %v518_v21 = vld [vmem:[%s3825_s6 + $0x888] sm:$0xff] }
 0x103   : > { %1996 = vmatprep.subr.bf16.mxu0 %v1166_v17  ;;  %2340 = vmatprep.subr.bf16.mxu1 %v1168_v18  ;;  %v1240_v17 = vunpack.c.l.s8.bf16 %v488_v13  ;;  %v485_v18 = vld [vmem:[%s3825_s6 + $0x780] sm:$0xff] }
 0x104   : > { %v1237_v23 = vunpack.c.l.s8.bf16 %v485_v18  ;;  %v1245_v28 = vunpack.c.h.s8.bf16 %v485_v18 }
 0x106   : > { %1997 = vmatpush1.bf16.msra.mxu0 %v1165_v24  ;;  %2341 = vmatpush1.bf16.msra.mxu1 %v1167_v45  ;;  %v1239_v24 = vunpack.c.l.s8.bf16 %v487_v22  ;;  %v1246_v45 = vunpack.c.h.s8.bf16 %v486_v12 }
 0x107   : > { %1998 = vmatprep.subr.bf16.mxu0 %v1174_v46  ;;  %2342 = vmatprep.subr.bf16.mxu1 %v1176_v25  ;;  %v1248_v46 = vunpack.c.h.s8.bf16 %v488_v13  ;;  %v494_v25 = vld [vmem:[%s3825_s6 + $0x7c8] sm:$0xff]  ;;  %v517_v13 = vld [vmem:[%s3825_s6 + $0x880] sm:$0xff] }
 0x10a   : > { %1999 = vmatpush1.bf16.msra.mxu0 %v1173_v29  ;;  %2343 = vmatpush1.bf16.msra.mxu1 %v1175_v32  ;;  %v1247_v29 = vunpack.c.h.s8.bf16 %v487_v22  ;;  %v1254_v32 = vunpack.c.l.s8.bf16 %v494_v25  ;;  %v526_v22 = vld [vmem:[%s3825_s6 + $0x8c8] sm:$0xff] }
 0x10b   : > { %2000 = vmatprep.subr.bf16.mxu0 %v1182_v33  ;;  %2344 = vmatprep.subr.bf16.mxu1 %v1184_v34  ;;  %v1256_v33 = vunpack.c.l.s8.bf16 %v496_v27  ;;  %v493_v34 = vld [vmem:[%s3825_s6 + $0x7c0] sm:$0xff] }
 0x10c   : > { %v1253_v37 = vunpack.c.l.s8.bf16 %v493_v34  ;;  %v1261_v43 = vunpack.c.h.s8.bf16 %v493_v34 }
 0x10e   : > { %2001 = vmatpush1.bf16.msra.mxu0 %v1181_v38  ;;  %2345 = vmatpush1.bf16.msra.mxu1 %v1183_v39  ;;  %v1255_v38 = vunpack.c.l.s8.bf16 %v495_v35  ;;  %v1262_v39 = vunpack.c.h.s8.bf16 %v494_v25 }
 0x10f   : > { %2002 = vmatprep.subr.bf16.mxu0 %v1190_v40  ;;  %2346 = vmatprep.subr.bf16.mxu1 %v1192_v41  ;;  %v1264_v40 = vunpack.c.h.s8.bf16 %v496_v27  ;;  %v502_v41 = vld [vmem:[%s3825_s6 + $0x808] sm:$0xff]  ;;  %v525_v27 = vld [vmem:[%s3825_s6 + $0x8c0] sm:$0xff] }
 0x110   : > { %v1278_v56 = vunpack.c.h.s8.bf16 %v502_v41 }
 0x112   : > { %2003 = vmatpush1.bf16.msra.mxu0 %v1189_v47  ;;  %2347 = vmatpush1.bf16.msra.mxu1 %v1191_v48  ;;  %v1263_v47 = vunpack.c.h.s8.bf16 %v495_v35  ;;  %v1270_v48 = vunpack.c.l.s8.bf16 %v502_v41  ;;  %v534_v35 = vld [vmem:[%s3825_s6 + $0x908] sm:$0xff] }
 0x113   : > { %2004 = vmatprep.subr.bf16.mxu0 %v1198_v49  ;;  %2348 = vmatprep.subr.bf16.mxu1 %v1200_v30  ;;  %v1272_v49 = vunpack.c.l.s8.bf16 %v504_v42  ;;  %v501_v30 = vld [vmem:[%s3825_s6 + $0x800] sm:$0xff] }
 0x114   : > { %v533_v42 = vld [vmem:[%s3825_s6 + $0x900] sm:$0xff] }
 0x116   : > { %2005 = vmatpush1.bf16.msra.mxu0 %v1197_v52  ;;  %2349 = vmatpush1.bf16.msra.mxu1 %v1199_v53  ;;  %v4052_v52 = vld [vmem:[%s4610_s0 + $0x20] sm:$0xff] }
 0x117   : > { %2006 = vmatprep.subr.bf16.mxu0 %v1206_v54  ;;  %2350 = vmatprep.subr.bf16.mxu1 %v1208_v55  ;;  %v4057_v53 = vld [vmem:[%s4610_s0 + $0x60] sm:$0xff]  ;;  %v1269_v54 = vunpack.c.l.s8.bf16 %v501_v30  ;;  %v1271_v55 = vunpack.c.l.s8.bf16 %v503_v31 }
 0x11a   : > { %2007 = vmatpush1.bf16.msra.mxu0 %v1205_v58  ;;  %2351 = vmatpush1.bf16.msra.mxu1 %v1207_v59  ;;  %v4063_v58 = vcombine.high %v4052_v52, %v4057_v53  ;;  %v1277_v59 = vunpack.c.h.s8.bf16 %v501_v30 }
 0x11b   : > { %2008 = vmatprep.subr.bf16.mxu0 %v1214_v60  ;;  %2352 = vmatprep.subr.bf16.mxu1 %v1216_v61  ;;  %v1279_v60 = vunpack.c.h.s8.bf16 %v503_v31  ;;  %v1286_v61 = vunpack.c.l.s8.bf16 %v510_v3  ;;  %v542_v31 = vld [vmem:[%s3825_s6 + $0x948] sm:$0xff] }
 0x11e   : > { %2009 = vmatpush1.bf16.msra.mxu0 %v1213_v0  ;;  %2353 = vmatpush1.bf16.msra.mxu1 %v1215_v4  ;;  %v511_v0 = vld [vmem:[%s3825_s6 + $0x850] sm:$0xff]  ;;  %v1285_v4 = vunpack.c.l.s8.bf16 %v509_v63 }
 0x11f   : > { %2010 = vmatprep.subr.bf16.mxu0 %v1222_v5  ;;  %2354 = vmatprep.subr.bf16.mxu1 %v1224_v6  ;;  %v1287_v5 = vunpack.c.l.s8.bf16 %v511_v0  ;;  %v1294_v6 = vunpack.c.h.s8.bf16 %v510_v3 }
 0x122   : > { %2011 = vmatpush1.bf16.msra.mxu0 %v1221_v7  ;;  %2355 = vmatpush1.bf16.msra.mxu1 %v1223_v9  ;;  %v520_v7 = vld [vmem:[%s3825_s6 + $0x898] sm:$0xff]  ;;  %v1293_v9 = vunpack.c.h.s8.bf16 %v509_v63 }
 0x123   : > { %2012 = vmatprep.subr.bf16.mxu0 %v1230_v10  ;;  %2356 = vmatprep.subr.bf16.mxu1 %v1232_v11  ;;  %v1295_v10 = vunpack.c.h.s8.bf16 %v511_v0  ;;  %v1302_v11 = vunpack.c.l.s8.bf16 %v518_v21  ;;  %v1304_v12 = vunpack.c.l.s8.bf16 %v520_v7  ;;  %v1312_v18 = vunpack.c.h.s8.bf16 %v520_v7  ;;  %v550_v0 = vld [vmem:[%s3825_s6 + $0x988] sm:$0xff]  ;;  %v549_v7 = vld [vmem:[%s3825_s6 + $0x980] sm:$0xff] }
 0x126   : > { %2013 = vmatpush1.bf16.msra.mxu0 %v1229_v14  ;;  %2357 = vmatpush1.bf16.msra.mxu1 %v1231_v15  ;;  %v519_v14 = vld [vmem:[%s3825_s6 + $0x890] sm:$0xff]  ;;  %v1301_v15 = vunpack.c.l.s8.bf16 %v517_v13 }
 0x127   : > { %2014 = vmatprep.subr.bf16.mxu0 %v1238_v16  ;;  %2358 = vmatprep.subr.bf16.mxu1 %v1240_v17  ;;  %v1303_v16 = vunpack.c.l.s8.bf16 %v519_v14  ;;  %v1310_v17 = vunpack.c.h.s8.bf16 %v518_v21 }
 0x12a   : > { %2015 = vmatpush1.bf16.msra.mxu0 %v1237_v23  ;;  %2359 = vmatpush1.bf16.msra.mxu1 %v1239_v24  ;;  %v528_v23 = vld [vmem:[%s3825_s6 + $0x8d8] sm:$0xff]  ;;  %v1309_v24 = vunpack.c.h.s8.bf16 %v517_v13 }
 0x12b   : > { %2016 = vmatprep.subr.bf16.mxu0 %v1246_v45  ;;  %2360 = vmatprep.subr.bf16.mxu1 %v1248_v46  ;;  %v1311_v45 = vunpack.c.h.s8.bf16 %v519_v14  ;;  %v1318_v46 = vunpack.c.l.s8.bf16 %v526_v22  ;;  %v1320_v25 = vunpack.c.l.s8.bf16 %v528_v23  ;;  %v1328_v34 = vunpack.c.h.s8.bf16 %v528_v23  ;;  %v558_v14 = vld [vmem:[%s3825_s6 + $0x9c8] sm:$0xff]  ;;  %v557_v23 = vld [vmem:[%s3825_s6 + $0x9c0] sm:$0xff] }
 0x12e   : > { %2017 = vmatpush1.bf16.msra.mxu0 %v1245_v28  ;;  %2361 = vmatpush1.bf16.msra.mxu1 %v1247_v29  ;;  %v527_v28 = vld [vmem:[%s3825_s6 + $0x8d0] sm:$0xff]  ;;  %v1317_v29 = vunpack.c.l.s8.bf16 %v525_v27 }
 0x12f   : > { %2018 = vmatprep.subr.bf16.mxu0 %v1254_v32  ;;  %2362 = vmatprep.subr.bf16.mxu1 %v1256_v33  ;;  %v1319_v32 = vunpack.c.l.s8.bf16 %v527_v28  ;;  %v1326_v33 = vunpack.c.h.s8.bf16 %v526_v22 }
 0x132   : > { %2019 = vmatpush1.bf16.msra.mxu0 %v1253_v37  ;;  %2363 = vmatpush1.bf16.msra.mxu1 %v1255_v38  ;;  %v536_v37 = vld [vmem:[%s3825_s6 + $0x918] sm:$0xff]  ;;  %v1325_v38 = vunpack.c.h.s8.bf16 %v525_v27 }
 0x133   : > { %2020 = vmatprep.subr.bf16.mxu0 %v1262_v39  ;;  %2364 = vmatprep.subr.bf16.mxu1 %v1264_v40  ;;  %v1327_v39 = vunpack.c.h.s8.bf16 %v527_v28  ;;  %v1334_v40 = vunpack.c.l.s8.bf16 %v534_v35  ;;  %v1336_v41 = vunpack.c.l.s8.bf16 %v536_v37  ;;  %v1344_v30 = vunpack.c.h.s8.bf16 %v536_v37  ;;  %v566_v28 = vld [vmem:[%s3825_s6 + $0xa08] sm:$0xff]  ;;  %v565_v37 = vld [vmem:[%s3825_s6 + $0xa00] sm:$0xff] }
 0x136   : > { %2021 = vmatpush1.bf16.msra.mxu0 %v1261_v43  ;;  %2365 = vmatpush1.bf16.msra.mxu1 %v1263_v47  ;;  %v535_v43 = vld [vmem:[%s3825_s6 + $0x910] sm:$0xff]  ;;  %v1333_v47 = vunpack.c.l.s8.bf16 %v533_v42 }
 0x137   : > { %2033 = vmatprep.subr.bf16.mxu0 %v1270_v48  ;;  %2377 = vmatprep.subr.bf16.mxu1 %v1272_v49  ;;  %v1335_v48 = vunpack.c.l.s8.bf16 %v535_v43  ;;  %v1342_v49 = vunpack.c.h.s8.bf16 %v534_v35 }
 0x139   : > { %2023 = vmatmul.mubr.bf16.vlgmr.msra.gmra.mrb[0].mxu0 %v4047_v50  ;;  %2367 = vmatmul.mubr.bf16.vlgmr.msra.gmra.mrb[0].mxu1 %v4047_v50 }
 0x13a   : > { %2034 = vmatpush1.bf16.msra.mxu0 %v1269_v54  ;;  %2378 = vmatpush1.bf16.msra.mxu1 %v1271_v55  ;;  %v544_v54 = vld [vmem:[%s3825_s6 + $0x958] sm:$0xff]  ;;  %v1341_v55 = vunpack.c.h.s8.bf16 %v533_v42  ;;  %v1397_v42 = vunpack.c.l.s8.bf16 %v565_v37 }
 0x13b   : > { %2035 = vmatprep.subr.bf16.mxu0 %v1278_v56  ;;  %2379 = vmatprep.subr.bf16.mxu1 %v1280_v2  ;;  %v1343_v56 = vunpack.c.h.s8.bf16 %v535_v43  ;;  %v1350_v2 = vunpack.c.l.s8.bf16 %v542_v31  ;;  %v1352_v3 = vunpack.c.l.s8.bf16 %v544_v54  ;;  %v1360_v63 = vunpack.c.h.s8.bf16 %v544_v54 }
 0x13c   : > { %2065 = vmatprep.mubr.bf16.mxu0 %v4063_v58  ;;  %2409 = vmatprep.mubr.bf16.mxu1 %v4063_v58 }
 0x13e   : > { %2036 = vmatpush1.bf16.msra.mxu0 %v1277_v59  ;;  %2380 = vmatpush1.bf16.msra.mxu1 %v1279_v60  ;;  %v543_v59 = vld [vmem:[%s3825_s6 + $0x950] sm:$0xff]  ;;  %v1349_v60 = vunpack.c.l.s8.bf16 %v541_v57 }
 0x13f   : > { %2037 = vmatprep.subr.bf16.mxu0 %v1286_v61  ;;  %2381 = vmatprep.subr.bf16.mxu1 %v1288_v62  ;;  %v1351_v61 = vunpack.c.l.s8.bf16 %v543_v59  ;;  %v1358_v62 = vunpack.c.h.s8.bf16 %v542_v31 }
 0x142   : > { %2038 = vmatpush1.bf16.msra.mxu0 %v1285_v4  ;;  %2382 = vmatpush1.bf16.msra.mxu1 %v1287_v5  ;;  %v552_v4 = vld [vmem:[%s3825_s6 + $0x998] sm:$0xff]  ;;  %v1357_v5 = vunpack.c.h.s8.bf16 %v541_v57 }
 0x143   : > { %2039 = vmatprep.subr.bf16.mxu0 %v1294_v6  ;;  %2383 = vmatprep.subr.bf16.mxu1 %v1296_v20  ;;  %v1359_v6 = vunpack.c.h.s8.bf16 %v543_v59  ;;  %v1366_v20 = vunpack.c.l.s8.bf16 %v550_v0  ;;  %v1368_v21 = vunpack.c.l.s8.bf16 %v552_v4  ;;  %v1376_v13 = vunpack.c.h.s8.bf16 %v552_v4 }
 0x146   : > { %2040 = vmatpush1.bf16.msra.mxu0 %v1293_v9  ;;  %2384 = vmatpush1.bf16.msra.mxu1 %v1295_v10  ;;  %v551_v9 = vld [vmem:[%s3825_s6 + $0x990] sm:$0xff]  ;;  %v1365_v10 = vunpack.c.l.s8.bf16 %v549_v7 }
 0x147   : > { %2041 = vmatprep.subr.bf16.mxu0 %v1302_v11  ;;  %2385 = vmatprep.subr.bf16.mxu1 %v1304_v12  ;;  %v1367_v11 = vunpack.c.l.s8.bf16 %v551_v9  ;;  %v1374_v12 = vunpack.c.h.s8.bf16 %v550_v0 }
 0x14a   : > { %2042 = vmatpush1.bf16.msra.mxu0 %v1301_v15  ;;  %2386 = vmatpush1.bf16.msra.mxu1 %v1303_v16  ;;  %v560_v15 = vld [vmem:[%s3825_s6 + $0x9d8] sm:$0xff]  ;;  %v1373_v16 = vunpack.c.h.s8.bf16 %v549_v7 }
 0x14b   : > { %2043 = vmatprep.subr.bf16.mxu0 %v1310_v17  ;;  %2387 = vmatprep.subr.bf16.mxu1 %v1312_v18  ;;  %v1375_v17 = vunpack.c.h.s8.bf16 %v551_v9  ;;  %v1382_v18 = vunpack.c.l.s8.bf16 %v558_v14  ;;  %v1384_v22 = vunpack.c.l.s8.bf16 %v560_v15  ;;  %v1392_v27 = vunpack.c.h.s8.bf16 %v560_v15 }
 0x14e   : > { %2044 = vmatpush1.bf16.msra.mxu0 %v1309_v24  ;;  %2388 = vmatpush1.bf16.msra.mxu1 %v1311_v45  ;;  %v559_v24 = vld [vmem:[%s3825_s6 + $0x9d0] sm:$0xff]  ;;  %v1381_v45 = vunpack.c.l.s8.bf16 %v557_v23 }
 0x14f   : > { %2045 = vmatprep.subr.bf16.mxu0 %v1318_v46  ;;  %2389 = vmatprep.subr.bf16.mxu1 %v1320_v25  ;;  %v1383_v46 = vunpack.c.l.s8.bf16 %v559_v24  ;;  %v1390_v25 = vunpack.c.h.s8.bf16 %v558_v14 }
 0x152   : > { %2046 = vmatpush1.bf16.msra.mxu0 %v1317_v29  ;;  %2390 = vmatpush1.bf16.msra.mxu1 %v1319_v32  ;;  %v568_v29 = vld [vmem:[%s3825_s6 + $0xa18] sm:$0xff]  ;;  %v1389_v32 = vunpack.c.h.s8.bf16 %v557_v23 }
 0x153   : > { %2047 = vmatprep.subr.bf16.mxu0 %v1326_v33  ;;  %2391 = vmatprep.subr.bf16.mxu1 %v1328_v34  ;;  %v1391_v33 = vunpack.c.h.s8.bf16 %v559_v24  ;;  %v1398_v34 = vunpack.c.l.s8.bf16 %v566_v28  ;;  %v1400_v35 = vunpack.c.l.s8.bf16 %v568_v29 }
 0x156   : > { %2048 = vmatpush1.bf16.msra.mxu0 %v1325_v38  ;;  %2392 = vmatpush1.bf16.msra.mxu1 %v1327_v39  ;;  %v567_v38 = vld [vmem:[%s3825_s6 + $0xa10] sm:$0xff]  ;;  %v4101_v39 = vcombine.low %v4052_v52, %v4057_v53  ;;  %v1408_v52 = vunpack.c.h.s8.bf16 %v568_v29  ;;  %v574_v53 = vld [vmem:[%s3825_s6 + $0xa48] sm:$0xff] }
 0x157   : > { %2049 = vmatprep.subr.bf16.mxu0 %v1334_v40  ;;  %2393 = vmatprep.subr.bf16.mxu1 %v1336_v41  ;;  %v4106_v40 = vld [vmem:[%s4610_s0 + $0x28] sm:$0xff]  ;;  %v1399_v43 = vunpack.c.l.s8.bf16 %v567_v38  ;;  %v1407_v31 = vunpack.c.h.s8.bf16 %v567_v38  ;;  %v1414_v54 = vunpack.c.l.s8.bf16 %v574_v53  ;;  %v1422_v59 = vunpack.c.h.s8.bf16 %v574_v53 }
 0x158   : > { %v4111_v41 = vld [vmem:[%s4610_s0 + $0x68] sm:$0xff] }
 0x15a   : > { %2050 = vmatpush1.bf16.msra.mxu0 %v1333_v47  ;;  %2394 = vmatpush1.bf16.msra.mxu1 %v1335_v48  ;;  %v1406_v47 = vunpack.c.h.s8.bf16 %v566_v28  ;;  %v576_v48 = vld [vmem:[%s3825_s6 + $0xa58] sm:$0xff] }
 0x15b   : > { %2051 = vmatprep.subr.bf16.mxu0 %v1342_v49  ;;  %2395 = vmatprep.subr.bf16.mxu1 %v1344_v30  ;;  %v4117_v49 = vcombine.high %v4106_v40, %v4111_v41  ;;  %v1405_v30 = vunpack.c.h.s8.bf16 %v565_v37 }
 0x15e   : > { %2052 = vmatpush1.bf16.msra.mxu0 %v1341_v55  ;;  %2396 = vmatpush1.bf16.msra.mxu1 %v1343_v56  ;;  %v1416_v55 = vunpack.c.l.s8.bf16 %v576_v48  ;;  %v573_v56 = vld [vmem:[%s3825_s6 + $0xa40] sm:$0xff] }
 0x15f   : > { %2053 = vmatprep.subr.bf16.mxu0 %v1350_v2  ;;  %2397 = vmatprep.subr.bf16.mxu1 %v1352_v3  ;;  %v575_v2 = vld [vmem:[%s3825_s6 + $0xa50] sm:$0xff]  ;;  %v1413_v3 = vunpack.c.l.s8.bf16 %v573_v56 }
 0x160   : > { %v1415_v57 = vunpack.c.l.s8.bf16 %v575_v2  ;;  %v1423_v0 = vunpack.c.h.s8.bf16 %v575_v2 }
 0x162   : > { %2054 = vmatpush1.bf16.msra.mxu0 %v1349_v60  ;;  %2398 = vmatpush1.bf16.msra.mxu1 %v1351_v61  ;;  %v1424_v60 = vunpack.c.h.s8.bf16 %v576_v48  ;;  %v582_v61 = vld [vmem:[%s3825_s6 + $0xa88] sm:$0xff] }
 0x163   : > { %2055 = vmatprep.subr.bf16.mxu0 %v1358_v62  ;;  %2399 = vmatprep.subr.bf16.mxu1 %v1360_v63  ;;  %v584_v62 = vld [vmem:[%s3825_s6 + $0xa98] sm:$0xff]  ;;  %v1421_v63 = vunpack.c.h.s8.bf16 %v573_v56  ;;  %v1430_v4 = vunpack.c.l.s8.bf16 %v582_v61  ;;  %v1438_v9 = vunpack.c.h.s8.bf16 %v582_v61 }
 0x166   : > { %2056 = vmatpush1.bf16.msra.mxu0 %v1357_v5  ;;  %2400 = vmatpush1.bf16.msra.mxu1 %v1359_v6  ;;  %v1432_v5 = vunpack.c.l.s8.bf16 %v584_v62  ;;  %v581_v6 = vld [vmem:[%s3825_s6 + $0xa80] sm:$0xff] }
 0x167   : > { %2057 = vmatprep.subr.bf16.mxu0 %v1366_v20  ;;  %2401 = vmatprep.subr.bf16.mxu1 %v1368_v21  ;;  %v583_v20 = vld [vmem:[%s3825_s6 + $0xa90] sm:$0xff]  ;;  %v1429_v21 = vunpack.c.l.s8.bf16 %v581_v6 }
 0x168   : > { %v1431_v7 = vunpack.c.l.s8.bf16 %v583_v20  ;;  %v1439_v14 = vunpack.c.h.s8.bf16 %v583_v20 }
 0x16a   : > { %2058 = vmatpush1.bf16.msra.mxu0 %v1365_v10  ;;  %2402 = vmatpush1.bf16.msra.mxu1 %v1367_v11  ;;  %v1440_v10 = vunpack.c.h.s8.bf16 %v584_v62  ;;  %v590_v11 = vld [vmem:[%s3825_s6 + $0xac8] sm:$0xff] }
 0x16b   : > { %2059 = vmatprep.subr.bf16.mxu0 %v1374_v12  ;;  %2403 = vmatprep.subr.bf16.mxu1 %v1376_v13  ;;  %v592_v12 = vld [vmem:[%s3825_s6 + $0xad8] sm:$0xff]  ;;  %v1437_v13 = vunpack.c.h.s8.bf16 %v581_v6  ;;  %v1446_v15 = vunpack.c.l.s8.bf16 %v590_v11  ;;  %v1454_v24 = vunpack.c.h.s8.bf16 %v590_v11 }
 0x16e   : > { %2060 = vmatpush1.bf16.msra.mxu0 %v1373_v16  ;;  %2404 = vmatpush1.bf16.msra.mxu1 %v1375_v17  ;;  %v1448_v16 = vunpack.c.l.s8.bf16 %v592_v12  ;;  %v589_v17 = vld [vmem:[%s3825_s6 + $0xac0] sm:$0xff] }
 0x16f   : > { %2061 = vmatprep.subr.bf16.mxu0 %v1382_v18  ;;  %2405 = vmatprep.subr.bf16.mxu1 %v1384_v22  ;;  %v591_v18 = vld [vmem:[%s3825_s6 + $0xad0] sm:$0xff]  ;;  %v1445_v22 = vunpack.c.l.s8.bf16 %v589_v17 }
 0x170   : > { %v1447_v23 = vunpack.c.l.s8.bf16 %v591_v18  ;;  %v1455_v28 = vunpack.c.h.s8.bf16 %v591_v18 }
 0x172   : > { %2062 = vmatpush1.bf16.msra.mxu0 %v1381_v45  ;;  %2406 = vmatpush1.bf16.msra.mxu1 %v1383_v46  ;;  %v1456_v45 = vunpack.c.h.s8.bf16 %v592_v12  ;;  %v598_v46 = vld [vmem:[%s3825_s6 + $0xb08] sm:$0xff] }
 0x173   : > { %2063 = vmatprep.subr.bf16.mxu0 %v1390_v25  ;;  %2407 = vmatprep.subr.bf16.mxu1 %v1392_v27  ;;  %v600_v25 = vld [vmem:[%s3825_s6 + $0xb18] sm:$0xff]  ;;  %v1453_v27 = vunpack.c.h.s8.bf16 %v589_v17  ;;  %v1462_v29 = vunpack.c.l.s8.bf16 %v598_v46  ;;  %v1470_v38 = vunpack.c.h.s8.bf16 %v598_v46 }
 0x176   : > { %2064 = vmatpush1.bf16.msra.mxu0 %v1389_v32  ;;  %2408 = vmatpush1.bf16.msra.mxu1 %v1391_v33  ;;  %v1464_v32 = vunpack.c.l.s8.bf16 %v600_v25  ;;  %v597_v33 = vld [vmem:[%s3825_s6 + $0xb00] sm:$0xff] }
 0x177   : > { %2076 = vmatprep.subr.bf16.mxu0 %v1398_v34  ;;  %2420 = vmatprep.subr.bf16.mxu1 %v1400_v35  ;;  %v599_v34 = vld [vmem:[%s3825_s6 + $0xb10] sm:$0xff]  ;;  %v1461_v35 = vunpack.c.l.s8.bf16 %v597_v33 }
 0x178   : > { %v1463_v37 = vunpack.c.l.s8.bf16 %v599_v34  ;;  %v1471_v53 = vunpack.c.h.s8.bf16 %v599_v34  ;;  %v4165_v34 = vld [vmem:[%s4610_s0 + $0x70] sm:$0xff] }
 0x179   : > { %2066 = vmatmul.mubr.bf16.vlgmr.msra.gmra.mrb[0].mxu0 %v4101_v39  ;;  %2410 = vmatmul.mubr.bf16.vlgmr.msra.gmra.mrb[0].mxu1 %v4101_v39 }
 0x17a   : > { %2077 = vmatpush1.bf16.msra.mxu0 %v1397_v42  ;;  %2421 = vmatpush1.bf16.msra.mxu1 %v1399_v43  ;;  %v1472_v42 = vunpack.c.h.s8.bf16 %v600_v25  ;;  %v606_v43 = vld [vmem:[%s3825_s6 + $0xb48] sm:$0xff] }
 0x17b   : > { %2078 = vmatprep.subr.bf16.mxu0 %v1406_v47  ;;  %2422 = vmatprep.subr.bf16.mxu1 %v1408_v52  ;;  %v608_v47 = vld [vmem:[%s3825_s6 + $0xb58] sm:$0xff]  ;;  %v1469_v52 = vunpack.c.h.s8.bf16 %v597_v33  ;;  %v1478_v48 = vunpack.c.l.s8.bf16 %v606_v43  ;;  %v1486_v2 = vunpack.c.h.s8.bf16 %v606_v43  ;;  %v4160_v33 = vld [vmem:[%s4610_s0 + $0x30] sm:$0xff] }
 0x17c   : > { %2108 = vmatprep.mubr.bf16.mxu0 %v4117_v49  ;;  %2452 = vmatprep.mubr.bf16.mxu1 %v4117_v49  ;;  %v4171_v43 = vcombine.high %v4160_v33, %v4165_v34 }
 0x17e   : > { %2079 = vmatpush1.bf16.msra.mxu0 %v1405_v30  ;;  %2423 = vmatpush1.bf16.msra.mxu1 %v1407_v31  ;;  %v1480_v30 = vunpack.c.l.s8.bf16 %v608_v47  ;;  %v605_v31 = vld [vmem:[%s3825_s6 + $0xb40] sm:$0xff] }
 0x17f   : > { %2080 = vmatprep.subr.bf16.mxu0 %v1414_v54  ;;  %2424 = vmatprep.subr.bf16.mxu1 %v1416_v55  ;;  %v607_v54 = vld [vmem:[%s3825_s6 + $0xb50] sm:$0xff]  ;;  %v1477_v55 = vunpack.c.l.s8.bf16 %v605_v31 }
 0x180   : > { %v1479_v56 = vunpack.c.l.s8.bf16 %v607_v54  ;;  %v1487_v61 = vunpack.c.h.s8.bf16 %v607_v54 }
 0x182   : > { %2081 = vmatpush1.bf16.msra.mxu0 %v1413_v3  ;;  %2425 = vmatpush1.bf16.msra.mxu1 %v1415_v57  ;;  %v1488_v3 = vunpack.c.h.s8.bf16 %v608_v47  ;;  %v614_v57 = vld [vmem:[%s3825_s6 + $0xb88] sm:$0xff] }
 0x183   : > { %2082 = vmatprep.subr.bf16.mxu0 %v1422_v59  ;;  %2426 = vmatprep.subr.bf16.mxu1 %v1424_v60  ;;  %v616_v59 = vld [vmem:[%s3825_s6 + $0xb98] sm:$0xff]  ;;  %v1485_v60 = vunpack.c.h.s8.bf16 %v605_v31  ;;  %v1494_v62 = vunpack.c.l.s8.bf16 %v614_v57  ;;  %v1502_v20 = vunpack.c.h.s8.bf16 %v614_v57  ;;  %v639_v31 = vld [vmem:[%s3825_s6 + $0xc50] sm:$0xff] }
 0x184   : > { %v648_v57 = vld [vmem:[%s3825_s6 + $0xc98] sm:$0xff] }
 0x186   : > { %2083 = vmatpush1.bf16.msra.mxu0 %v1421_v63  ;;  %2427 = vmatpush1.bf16.msra.mxu1 %v1423_v0  ;;  %v1496_v63 = vunpack.c.l.s8.bf16 %v616_v59  ;;  %v613_v0 = vld [vmem:[%s3825_s6 + $0xb80] sm:$0xff] }
 0x187   : > { %2084 = vmatprep.subr.bf16.mxu0 %v1430_v4  ;;  %2428 = vmatprep.subr.bf16.mxu1 %v1432_v5  ;;  %v615_v4 = vld [vmem:[%s3825_s6 + $0xb90] sm:$0xff]  ;;  %v1493_v5 = vunpack.c.l.s8.bf16 %v613_v0 }
 0x188   : > { %v1495_v6 = vunpack.c.l.s8.bf16 %v615_v4  ;;  %v1503_v11 = vunpack.c.h.s8.bf16 %v615_v4 }
 0x18a   : > { %2085 = vmatpush1.bf16.msra.mxu0 %v1429_v21  ;;  %2429 = vmatpush1.bf16.msra.mxu1 %v1431_v7  ;;  %v1504_v21 = vunpack.c.h.s8.bf16 %v616_v59  ;;  %v622_v7 = vld [vmem:[%s3825_s6 + $0xbc8] sm:$0xff] }
 0x18b   : > { %2086 = vmatprep.subr.bf16.mxu0 %v1438_v9  ;;  %2430 = vmatprep.subr.bf16.mxu1 %v1440_v10  ;;  %v624_v9 = vld [vmem:[%s3825_s6 + $0xbd8] sm:$0xff]  ;;  %v1501_v10 = vunpack.c.h.s8.bf16 %v613_v0  ;;  %v1510_v12 = vunpack.c.l.s8.bf16 %v622_v7  ;;  %v1518_v18 = vunpack.c.h.s8.bf16 %v622_v7  ;;  %v647_v0 = vld [vmem:[%s3825_s6 + $0xc90] sm:$0xff] }
 0x18c   : > { %v656_v7 = vld [vmem:[%s3825_s6 + $0xcd8] sm:$0xff] }
 0x18e   : > { %2087 = vmatpush1.bf16.msra.mxu0 %v1437_v13  ;;  %2431 = vmatpush1.bf16.msra.mxu1 %v1439_v14  ;;  %v1512_v13 = vunpack.c.l.s8.bf16 %v624_v9  ;;  %v621_v14 = vld [vmem:[%s3825_s6 + $0xbc0] sm:$0xff] }
 0x18f   : > { %2088 = vmatprep.subr.bf16.mxu0 %v1446_v15  ;;  %2432 = vmatprep.subr.bf16.mxu1 %v1448_v16  ;;  %v623_v15 = vld [vmem:[%s3825_s6 + $0xbd0] sm:$0xff]  ;;  %v1509_v16 = vunpack.c.l.s8.bf16 %v621_v14 }
 0x190   : > { %v1511_v17 = vunpack.c.l.s8.bf16 %v623_v15  ;;  %v1519_v46 = vunpack.c.h.s8.bf16 %v623_v15 }
 0x192   : > { %2089 = vmatpush1.bf16.msra.mxu0 %v1445_v22  ;;  %2433 = vmatpush1.bf16.msra.mxu1 %v1447_v23  ;;  %v1520_v22 = vunpack.c.h.s8.bf16 %v624_v9  ;;  %v630_v23 = vld [vmem:[%s3825_s6 + $0xc08] sm:$0xff] }
 0x193   : > { %2090 = vmatprep.subr.bf16.mxu0 %v1454_v24  ;;  %2434 = vmatprep.subr.bf16.mxu1 %v1456_v45  ;;  %v632_v24 = vld [vmem:[%s3825_s6 + $0xc18] sm:$0xff]  ;;  %v1517_v45 = vunpack.c.h.s8.bf16 %v621_v14  ;;  %v1526_v25 = vunpack.c.l.s8.bf16 %v630_v23  ;;  %v655_v14 = vld [vmem:[%s3825_s6 + $0xcd0] sm:$0xff] }
 0x196   : > { %2091 = vmatpush1.bf16.msra.mxu0 %v1453_v27  ;;  %2435 = vmatpush1.bf16.msra.mxu1 %v1455_v28  ;;  %v1528_v27 = vunpack.c.l.s8.bf16 %v632_v24  ;;  %v629_v28 = vld [vmem:[%s3825_s6 + $0xc00] sm:$0xff] }
 0x197   : > { %2092 = vmatprep.subr.bf16.mxu0 %v1462_v29  ;;  %2436 = vmatprep.subr.bf16.mxu1 %v1464_v32  ;;  %v631_v29 = vld [vmem:[%s3825_s6 + $0xc10] sm:$0xff]  ;;  %v4155_v32 = vcombine.low %v4106_v40, %v4111_v41  ;;  %v1536_v40 = vunpack.c.h.s8.bf16 %v632_v24  ;;  %v638_v41 = vld [vmem:[%s3825_s6 + $0xc48] sm:$0xff]  ;;  %v1533_v47 = vunpack.c.h.s8.bf16 %v629_v28 }
 0x19a   : > { %2093 = vmatpush1.bf16.msra.mxu0 %v1461_v35  ;;  %2437 = vmatpush1.bf16.msra.mxu1 %v1463_v37  ;;  %v1525_v35 = vunpack.c.l.s8.bf16 %v629_v28  ;;  %v1527_v37 = vunpack.c.l.s8.bf16 %v631_v29  ;;  %v663_v28 = vld [vmem:[%s3825_s6 + $0xd10] sm:$0xff] }
 0x19b   : > { %2094 = vmatprep.subr.bf16.mxu0 %v1470_v38  ;;  %2438 = vmatprep.subr.bf16.mxu1 %v1472_v42  ;;  %v1534_v38 = vunpack.c.h.s8.bf16 %v630_v23  ;;  %v640_v42 = vld [vmem:[%s3825_s6 + $0xc58] sm:$0xff] }
 0x19c   : > { %v664_v23 = vld [vmem:[%s3825_s6 + $0xd18] sm:$0xff] }
 0x19e   : > { %2095 = vmatpush1.bf16.msra.mxu0 %v1469_v52  ;;  %2439 = vmatpush1.bf16.msra.mxu1 %v1471_v53  ;;  %v1535_v52 = vunpack.c.h.s8.bf16 %v631_v29  ;;  %v1542_v53 = vunpack.c.l.s8.bf16 %v638_v41 }
 0x19f   : > { %2096 = vmatprep.subr.bf16.mxu0 %v1478_v48  ;;  %2440 = vmatprep.subr.bf16.mxu1 %v1480_v30  ;;  %v1544_v48 = vunpack.c.l.s8.bf16 %v640_v42  ;;  %v637_v30 = vld [vmem:[%s3825_s6 + $0xc40] sm:$0xff] }
 0x1a0   : > { %v1541_v54 = vunpack.c.l.s8.bf16 %v637_v30  ;;  %v1549_v59 = vunpack.c.h.s8.bf16 %v637_v30  ;;  %v671_v30 = vld [vmem:[%s3825_s6 + $0xd50] sm:$0xff] }
 0x1a2   : > { %2097 = vmatpush1.bf16.msra.mxu0 %v1477_v55  ;;  %2441 = vmatpush1.bf16.msra.mxu1 %v1479_v56  ;;  %v1543_v55 = vunpack.c.l.s8.bf16 %v639_v31  ;;  %v1550_v56 = vunpack.c.h.s8.bf16 %v638_v41  ;;  %v672_v41 = vld [vmem:[%s3825_s6 + $0xd58] sm:$0xff] }
 0x1a3   : > { %2098 = vmatprep.subr.bf16.mxu0 %v1486_v2  ;;  %2442 = vmatprep.subr.bf16.mxu1 %v1488_v3  ;;  %v1552_v2 = vunpack.c.h.s8.bf16 %v640_v42  ;;  %v646_v3 = vld [vmem:[%s3825_s6 + $0xc88] sm:$0xff] }
 0x1a6   : > { %2099 = vmatpush1.bf16.msra.mxu0 %v1485_v60  ;;  %2443 = vmatpush1.bf16.msra.mxu1 %v1487_v61  ;;  %v1551_v60 = vunpack.c.h.s8.bf16 %v639_v31  ;;  %v1558_v61 = vunpack.c.l.s8.bf16 %v646_v3 }
 0x1a7   : > { %2100 = vmatprep.subr.bf16.mxu0 %v1494_v62  ;;  %2444 = vmatprep.subr.bf16.mxu1 %v1496_v63  ;;  %v1560_v62 = vunpack.c.l.s8.bf16 %v648_v57  ;;  %v645_v63 = vld [vmem:[%s3825_s6 + $0xc80] sm:$0xff] }
 0x1a8   : > { %v1557_v4 = vunpack.c.l.s8.bf16 %v645_v63  ;;  %v1565_v9 = vunpack.c.h.s8.bf16 %v645_v63  ;;  %v679_v63 = vld [vmem:[%s3825_s6 + $0xd90] sm:$0xff] }
 0x1aa   : > { %2101 = vmatpush1.bf16.msra.mxu0 %v1493_v5  ;;  %2445 = vmatpush1.bf16.msra.mxu1 %v1495_v6  ;;  %v1559_v5 = vunpack.c.l.s8.bf16 %v647_v0  ;;  %v1566_v6 = vunpack.c.h.s8.bf16 %v646_v3  ;;  %v680_v3 = vld [vmem:[%s3825_s6 + $0xd98] sm:$0xff] }
 0x1ab   : > { %2102 = vmatprep.subr.bf16.mxu0 %v1502_v20  ;;  %2446 = vmatprep.subr.bf16.mxu1 %v1504_v21  ;;  %v1568_v20 = vunpack.c.h.s8.bf16 %v648_v57  ;;  %v654_v21 = vld [vmem:[%s3825_s6 + $0xcc8] sm:$0xff] }
 0x1ae   : > { %2103 = vmatpush1.bf16.msra.mxu0 %v1501_v10  ;;  %2447 = vmatpush1.bf16.msra.mxu1 %v1503_v11  ;;  %v1567_v10 = vunpack.c.h.s8.bf16 %v647_v0  ;;  %v1574_v11 = vunpack.c.l.s8.bf16 %v654_v21 }
 0x1af   : > { %2104 = vmatprep.subr.bf16.mxu0 %v1510_v12  ;;  %2448 = vmatprep.subr.bf16.mxu1 %v1512_v13  ;;  %v1576_v12 = vunpack.c.l.s8.bf16 %v656_v7  ;;  %v653_v13 = vld [vmem:[%s3825_s6 + $0xcc0] sm:$0xff] }
 0x1b0   : > { %v1573_v15 = vunpack.c.l.s8.bf16 %v653_v13  ;;  %v1581_v24 = vunpack.c.h.s8.bf16 %v653_v13  ;;  %v687_v13 = vld [vmem:[%s3825_s6 + $0xdd0] sm:$0xff] }
 0x1b2   : > { %2105 = vmatpush1.bf16.msra.mxu0 %v1509_v16  ;;  %2449 = vmatpush1.bf16.msra.mxu1 %v1511_v17  ;;  %v1575_v16 = vunpack.c.l.s8.bf16 %v655_v14  ;;  %v1582_v17 = vunpack.c.h.s8.bf16 %v654_v21  ;;  %v688_v21 = vld [vmem:[%s3825_s6 + $0xdd8] sm:$0xff] }
 0x1b3   : > { %2106 = vmatprep.subr.bf16.mxu0 %v1518_v18  ;;  %2450 = vmatprep.subr.bf16.mxu1 %v1520_v22  ;;  %v1584_v18 = vunpack.c.h.s8.bf16 %v656_v7  ;;  %v662_v22 = vld [vmem:[%s3825_s6 + $0xd08] sm:$0xff] }
 0x1b6   : > { %2107 = vmatpush1.bf16.msra.mxu0 %v1517_v45  ;;  %2451 = vmatpush1.bf16.msra.mxu1 %v1519_v46  ;;  %v1583_v45 = vunpack.c.h.s8.bf16 %v655_v14  ;;  %v1590_v46 = vunpack.c.l.s8.bf16 %v662_v22 }
 0x1b7   : > { %2119 = vmatprep.subr.bf16.mxu0 %v1526_v25  ;;  %2463 = vmatprep.subr.bf16.mxu1 %v1528_v27  ;;  %v1592_v25 = vunpack.c.l.s8.bf16 %v664_v23  ;;  %v661_v27 = vld [vmem:[%s3825_s6 + $0xd00] sm:$0xff] }
 0x1b8   : > { %v1589_v29 = vunpack.c.l.s8.bf16 %v661_v27  ;;  %v1597_v42 = vunpack.c.h.s8.bf16 %v661_v27  ;;  %v695_v27 = vld [vmem:[%s3825_s6 + $0xe10] sm:$0xff] }
 0x1b9   : > { %2109 = vmatmul.mubr.bf16.vlgmr.msra.gmra.mrb[0].mxu0 %v4155_v32  ;;  %2453 = vmatmul.mubr.bf16.vlgmr.msra.gmra.mrb[0].mxu1 %v4155_v32 }
 0x1ba   : > { %2120 = vmatpush1.bf16.msra.mxu0 %v1525_v35  ;;  %2464 = vmatpush1.bf16.msra.mxu1 %v1527_v37  ;;  %v1591_v35 = vunpack.c.l.s8.bf16 %v663_v28  ;;  %v1598_v37 = vunpack.c.h.s8.bf16 %v662_v22  ;;  %v696_v22 = vld [vmem:[%s3825_s6 + $0xe18] sm:$0xff] }
 0x1bb   : > { %2121 = vmatprep.subr.bf16.mxu0 %v1534_v38  ;;  %2465 = vmatprep.subr.bf16.mxu1 %v1536_v40  ;;  %v1600_v38 = vunpack.c.h.s8.bf16 %v664_v23  ;;  %v670_v40 = vld [vmem:[%s3825_s6 + $0xd48] sm:$0xff] }
 0x1bc   : > { %2151 = vmatprep.mubr.bf16.mxu0 %v4171_v43  ;;  %2495 = vmatprep.mubr.bf16.mxu1 %v4171_v43 }
 0x1be   : > { %2122 = vmatpush1.bf16.msra.mxu0 %v1533_v47  ;;  %2466 = vmatpush1.bf16.msra.mxu1 %v1535_v52  ;;  %v1599_v47 = vunpack.c.h.s8.bf16 %v663_v28  ;;  %v1606_v52 = vunpack.c.l.s8.bf16 %v670_v40  ;;  %v4209_v28 = vcombine.low %v4160_v33, %v4165_v34  ;;  %v1664_v33 = vunpack.c.h.s8.bf16 %v696_v22  ;;  %v702_v34 = vld [vmem:[%s3825_s6 + $0xe48] sm:$0xff] }
 0x1bf   : > { %2123 = vmatprep.subr.bf16.mxu0 %v1542_v53  ;;  %2467 = vmatprep.subr.bf16.mxu1 %v1544_v48  ;;  %v1608_v53 = vunpack.c.l.s8.bf16 %v672_v41  ;;  %v669_v48 = vld [vmem:[%s3825_s6 + $0xd40] sm:$0xff] }
 0x1c0   : > { %v1605_v31 = vunpack.c.l.s8.bf16 %v669_v48  ;;  %v1613_v57 = vunpack.c.h.s8.bf16 %v669_v48 }
 0x1c2   : > { %2124 = vmatpush1.bf16.msra.mxu0 %v1541_v54  ;;  %2468 = vmatpush1.bf16.msra.mxu1 %v1543_v55  ;;  %v1607_v54 = vunpack.c.l.s8.bf16 %v671_v30  ;;  %v1614_v55 = vunpack.c.h.s8.bf16 %v670_v40 }
 0x1c3   : > { %2125 = vmatprep.subr.bf16.mxu0 %v1550_v56  ;;  %2469 = vmatprep.subr.bf16.mxu1 %v1552_v2  ;;  %v1616_v56 = vunpack.c.h.s8.bf16 %v672_v41  ;;  %v678_v2 = vld [vmem:[%s3825_s6 + $0xd88] sm:$0xff]  ;;  %v704_v41 = vld [vmem:[%s3825_s6 + $0xe58] sm:$0xff] }
 0x1c4   : > { %v1672_v48 = vunpack.c.l.s8.bf16 %v704_v41 }
 0x1c6   : > { %2126 = vmatpush1.bf16.msra.mxu0 %v1549_v59  ;;  %2470 = vmatpush1.bf16.msra.mxu1 %v1551_v60  ;;  %v1615_v59 = vunpack.c.h.s8.bf16 %v671_v30  ;;  %v1622_v60 = vunpack.c.l.s8.bf16 %v678_v2  ;;  %v701_v30 = vld [vmem:[%s3825_s6 + $0xe40] sm:$0xff] }
 0x1c7   : > { %2127 = vmatprep.subr.bf16.mxu0 %v1558_v61  ;;  %2471 = vmatprep.subr.bf16.mxu1 %v1560_v62  ;;  %v1624_v61 = vunpack.c.l.s8.bf16 %v680_v3  ;;  %v677_v62 = vld [vmem:[%s3825_s6 + $0xd80] sm:$0xff] }
 0x1c8   : > { %v1621_v0 = vunpack.c.l.s8.bf16 %v677_v62  ;;  %v1629_v7 = vunpack.c.h.s8.bf16 %v677_v62 }
 0x1ca   : > { %2128 = vmatpush1.bf16.msra.mxu0 %v1557_v4  ;;  %2472 = vmatpush1.bf16.msra.mxu1 %v1559_v5  ;;  %v1623_v4 = vunpack.c.l.s8.bf16 %v679_v63  ;;  %v1630_v5 = vunpack.c.h.s8.bf16 %v678_v2  ;;  %v1680_v2 = vunpack.c.h.s8.bf16 %v704_v41  ;;  %v734_v41 = vld [vmem:[%s3825_s6 + $0xf48] sm:$0xff] }
 0x1cb   : > { %2129 = vmatprep.subr.bf16.mxu0 %v1566_v6  ;;  %2473 = vmatprep.subr.bf16.mxu1 %v1568_v20  ;;  %v1632_v6 = vunpack.c.h.s8.bf16 %v680_v3  ;;  %v686_v20 = vld [vmem:[%s3825_s6 + $0xdc8] sm:$0xff] }
 0x1cc   : > { %v710_v3 = vld [vmem:[%s3825_s6 + $0xe88] sm:$0xff] }
 0x1ce   : > { %2130 = vmatpush1.bf16.msra.mxu0 %v1565_v9  ;;  %2474 = vmatpush1.bf16.msra.mxu1 %v1567_v10  ;;  %v1631_v9 = vunpack.c.h.s8.bf16 %v679_v63  ;;  %v1638_v10 = vunpack.c.l.s8.bf16 %v686_v20  ;;  %v709_v63 = vld [vmem:[%s3825_s6 + $0xe80] sm:$0xff] }
 0x1cf   : > { %2131 = vmatprep.subr.bf16.mxu0 %v1574_v11  ;;  %2475 = vmatprep.subr.bf16.mxu1 %v1576_v12  ;;  %v1640_v11 = vunpack.c.l.s8.bf16 %v688_v21  ;;  %v685_v12 = vld [vmem:[%s3825_s6 + $0xdc0] sm:$0xff] }
 0x1d0   : > { %v1637_v14 = vunpack.c.l.s8.bf16 %v685_v12  ;;  %v1645_v23 = vunpack.c.h.s8.bf16 %v685_v12 }
 0x1d2   : > { %2132 = vmatpush1.bf16.msra.mxu0 %v1573_v15  ;;  %2476 = vmatpush1.bf16.msra.mxu1 %v1575_v16  ;;  %v1639_v15 = vunpack.c.l.s8.bf16 %v687_v13  ;;  %v1646_v16 = vunpack.c.h.s8.bf16 %v686_v20 }
 0x1d3   : > { %2133 = vmatprep.subr.bf16.mxu0 %v1582_v17  ;;  %2477 = vmatprep.subr.bf16.mxu1 %v1584_v18  ;;  %v1648_v17 = vunpack.c.h.s8.bf16 %v688_v21  ;;  %v694_v18 = vld [vmem:[%s3825_s6 + $0xe08] sm:$0xff] }
 0x1d4   : > { %v1662_v40 = vunpack.c.h.s8.bf16 %v694_v18  ;;  %v718_v21 = vld [vmem:[%s3825_s6 + $0xec8] sm:$0xff] }
 0x1d6   : > { %2134 = vmatpush1.bf16.msra.mxu0 %v1581_v24  ;;  %2478 = vmatpush1.bf16.msra.mxu1 %v1583_v45  ;;  %v1647_v24 = vunpack.c.h.s8.bf16 %v687_v13  ;;  %v1654_v45 = vunpack.c.l.s8.bf16 %v694_v18  ;;  %v717_v13 = vld [vmem:[%s3825_s6 + $0xec0] sm:$0xff] }
 0x1d7   : > { %2135 = vmatprep.subr.bf16.mxu0 %v1590_v46  ;;  %2479 = vmatprep.subr.bf16.mxu1 %v1592_v25  ;;  %v1656_v46 = vunpack.c.l.s8.bf16 %v696_v22  ;;  %v693_v25 = vld [vmem:[%s3825_s6 + $0xe00] sm:$0xff]  ;;  %v726_v22 = vld [vmem:[%s3825_s6 + $0xf08] sm:$0xff] }
 0x1da   : > { %2136 = vmatpush1.bf16.msra.mxu0 %v1589_v29  ;;  %2480 = vmatpush1.bf16.msra.mxu1 %v1591_v35  ;;  %v4214_v29 = vld [vmem:[%s4610_s0 + $0x38] sm:$0xff] }
 0x1db   : > { %2137 = vmatprep.subr.bf16.mxu0 %v1598_v37  ;;  %2481 = vmatprep.subr.bf16.mxu1 %v1600_v38  ;;  %v4219_v35 = vld [vmem:[%s4610_s0 + $0x78] sm:$0xff]  ;;  %v1653_v37 = vunpack.c.l.s8.bf16 %v693_v25  ;;  %v1655_v38 = vunpack.c.l.s8.bf16 %v695_v27 }
 0x1de   : > { %2138 = vmatpush1.bf16.msra.mxu0 %v1597_v42  ;;  %2482 = vmatpush1.bf16.msra.mxu1 %v1599_v47  ;;  %v4225_v42 = vcombine.high %v4214_v29, %v4219_v35  ;;  %v1661_v47 = vunpack.c.h.s8.bf16 %v693_v25 }
 0x1df   : > { %2139 = vmatprep.subr.bf16.mxu0 %v1606_v52  ;;  %2483 = vmatprep.subr.bf16.mxu1 %v1608_v53  ;;  %v1663_v52 = vunpack.c.h.s8.bf16 %v695_v27  ;;  %v1670_v53 = vunpack.c.l.s8.bf16 %v702_v34  ;;  %v725_v27 = vld [vmem:[%s3825_s6 + $0xf00] sm:$0xff] }
 0x1e2   : > { %2140 = vmatpush1.bf16.msra.mxu0 %v1605_v31  ;;  %2484 = vmatpush1.bf16.msra.mxu1 %v1607_v54  ;;  %v703_v31 = vld [vmem:[%s3825_s6 + $0xe50] sm:$0xff]  ;;  %v1669_v54 = vunpack.c.l.s8.bf16 %v701_v30 }
 0x1e3   : > { %2141 = vmatprep.subr.bf16.mxu0 %v1614_v55  ;;  %2485 = vmatprep.subr.bf16.mxu1 %v1616_v56  ;;  %v1671_v55 = vunpack.c.l.s8.bf16 %v703_v31  ;;  %v1678_v56 = vunpack.c.h.s8.bf16 %v702_v34 }
 0x1e6   : > { %2142 = vmatpush1.bf16.msra.mxu0 %v1613_v57  ;;  %2486 = vmatpush1.bf16.msra.mxu1 %v1615_v59  ;;  %v712_v57 = vld [vmem:[%s3825_s6 + $0xe98] sm:$0xff]  ;;  %v1677_v59 = vunpack.c.h.s8.bf16 %v701_v30 }
 0x1e7   : > { %2143 = vmatprep.subr.bf16.mxu0 %v1622_v60  ;;  %2487 = vmatprep.subr.bf16.mxu1 %v1624_v61  ;;  %v1679_v60 = vunpack.c.h.s8.bf16 %v703_v31  ;;  %v1686_v61 = vunpack.c.l.s8.bf16 %v710_v3  ;;  %v1688_v62 = vunpack.c.l.s8.bf16 %v712_v57  ;;  %v1696_v20 = vunpack.c.h.s8.bf16 %v712_v57  ;;  %v733_v31 = vld [vmem:[%s3825_s6 + $0xf40] sm:$0xff]  ;;  %v742_v57 = vld [vmem:[%s3825_s6 + $0xf88] sm:$0xff] }
 0x1ea   : > { %2144 = vmatpush1.bf16.msra.mxu0 %v1621_v0  ;;  %2488 = vmatpush1.bf16.msra.mxu1 %v1623_v4  ;;  %v711_v0 = vld [vmem:[%s3825_s6 + $0xe90] sm:$0xff]  ;;  %v1685_v4 = vunpack.c.l.s8.bf16 %v709_v63 }
 0x1eb   : > { %2145 = vmatprep.subr.bf16.mxu0 %v1630_v5  ;;  %2489 = vmatprep.subr.bf16.mxu1 %v1632_v6  ;;  %v1687_v5 = vunpack.c.l.s8.bf16 %v711_v0  ;;  %v1694_v6 = vunpack.c.h.s8.bf16 %v710_v3 }
 0x1ee   : > { %2146 = vmatpush1.bf16.msra.mxu0 %v1629_v7  ;;  %2490 = vmatpush1.bf16.msra.mxu1 %v1631_v9  ;;  %v720_v7 = vld [vmem:[%s3825_s6 + $0xed8] sm:$0xff]  ;;  %v1693_v9 = vunpack.c.h.s8.bf16 %v709_v63 }
 0x1ef   : > { %2147 = vmatprep.subr.bf16.mxu0 %v1638_v10  ;;  %2491 = vmatprep.subr.bf16.mxu1 %v1640_v11  ;;  %v1695_v10 = vunpack.c.h.s8.bf16 %v711_v0  ;;  %v1702_v11 = vunpack.c.l.s8.bf16 %v718_v21  ;;  %v1704_v12 = vunpack.c.l.s8.bf16 %v720_v7  ;;  %v1712_v18 = vunpack.c.h.s8.bf16 %v720_v7  ;;  %v741_v0 = vld [vmem:[%s3825_s6 + $0xf80] sm:$0xff]  ;;  %v750_v7 = vld [vmem:[%s3825_s6 + $0xfc8] sm:$0xff] }
 0x1f2   : > { %2148 = vmatpush1.bf16.msra.mxu0 %v1637_v14  ;;  %2492 = vmatpush1.bf16.msra.mxu1 %v1639_v15  ;;  %v719_v14 = vld [vmem:[%s3825_s6 + $0xed0] sm:$0xff]  ;;  %v1701_v15 = vunpack.c.l.s8.bf16 %v717_v13 }
 0x1f3   : > { %2149 = vmatprep.subr.bf16.mxu0 %v1646_v16  ;;  %2493 = vmatprep.subr.bf16.mxu1 %v1648_v17  ;;  %v1703_v16 = vunpack.c.l.s8.bf16 %v719_v14  ;;  %v1710_v17 = vunpack.c.h.s8.bf16 %v718_v21 }
 0x1f6   : > { %2150 = vmatpush1.bf16.msra.mxu0 %v1645_v23  ;;  %2494 = vmatpush1.bf16.msra.mxu1 %v1647_v24  ;;  %v728_v23 = vld [vmem:[%s3825_s6 + $0xf18] sm:$0xff]  ;;  %v1709_v24 = vunpack.c.h.s8.bf16 %v717_v13 }
 0x1f7   : > { %2162 = vmatprep.subr.bf16.mxu0 %v1654_v45  ;;  %2506 = vmatprep.subr.bf16.mxu1 %v1656_v46  ;;  %v1711_v45 = vunpack.c.h.s8.bf16 %v719_v14  ;;  %v1718_v46 = vunpack.c.l.s8.bf16 %v726_v22  ;;  %v1720_v25 = vunpack.c.l.s8.bf16 %v728_v23  ;;  %v1728_v34 = vunpack.c.h.s8.bf16 %v728_v23  ;;  %v749_v14 = vld [vmem:[%s3825_s6 + $0xfc0] sm:$0xff]  ;;  %v250_v23 = vld [vmem:[%s3825_s6 + $0x28] sm:$0xff] }
 0x1f9   : > { %2152 = vmatmul.mubr.bf16.vlgmr.msra.gmra.mrb[0].mxu0 %v4209_v28  ;;  %2496 = vmatmul.mubr.bf16.vlgmr.msra.gmra.mrb[0].mxu1 %v4209_v28 }
 0x1fa   : > { %2163 = vmatpush1.bf16.msra.mxu0 %v1653_v37  ;;  %2507 = vmatpush1.bf16.msra.mxu1 %v1655_v38  ;;  %v727_v37 = vld [vmem:[%s3825_s6 + $0xf10] sm:$0xff]  ;;  %v1717_v38 = vunpack.c.l.s8.bf16 %v725_v27 }
 0x1fb   : > { %2164 = vmatprep.subr.bf16.mxu0 %v1662_v40  ;;  %2508 = vmatprep.subr.bf16.mxu1 %v1664_v33  ;;  %v1719_v40 = vunpack.c.l.s8.bf16 %v727_v37  ;;  %v1726_v33 = vunpack.c.h.s8.bf16 %v726_v22 }
 0x1fc   : > { %2194 = vmatprep.mubr.bf16.mxu0 %v4225_v42  ;;  %2538 = vmatprep.mubr.bf16.mxu1 %v4225_v42 }
 0x1fe   : > { %2165 = vmatpush1.bf16.msra.mxu0 %v1661_v47  ;;  %2509 = vmatpush1.bf16.msra.mxu1 %v1663_v52  ;;  %v736_v47 = vld [vmem:[%s3825_s6 + $0xf58] sm:$0xff]  ;;  %v1725_v52 = vunpack.c.h.s8.bf16 %v725_v27 }
 0x1ff   : > { %2166 = vmatprep.subr.bf16.mxu0 %v1670_v53  ;;  %2510 = vmatprep.subr.bf16.mxu1 %v1672_v48  ;;  %v1727_v53 = vunpack.c.h.s8.bf16 %v727_v37  ;;  %v1734_v48 = vunpack.c.l.s8.bf16 %v734_v41  ;;  %v1736_v30 = vunpack.c.l.s8.bf16 %v736_v47  ;;  %v1744_v3 = vunpack.c.h.s8.bf16 %v736_v47  ;;  %v249_v37 = vld [vmem:[%s3825_s6 + $0x20] sm:$0xff] }
 0x202   : > { %2167 = vmatpush1.bf16.msra.mxu0 %v1669_v54  ;;  %2511 = vmatpush1.bf16.msra.mxu1 %v1671_v55  ;;  %v735_v54 = vld [vmem:[%s3825_s6 + $0xf50] sm:$0xff]  ;;  %v1733_v55 = vunpack.c.l.s8.bf16 %v733_v31 }
 0x203   : > { %2168 = vmatprep.subr.bf16.mxu0 %v1678_v56  ;;  %2512 = vmatprep.subr.bf16.mxu1 %v1680_v2  ;;  %v1735_v56 = vunpack.c.l.s8.bf16 %v735_v54  ;;  %v1742_v2 = vunpack.c.h.s8.bf16 %v734_v41  ;;  %v770_v41 = vunpack.c.h.s8.bf16 %v250_v23 }
 0x206   : > { %2169 = vmatpush1.bf16.msra.mxu0 %v1677_v59  ;;  %2513 = vmatpush1.bf16.msra.mxu1 %v1679_v60  ;;  %v744_v59 = vld [vmem:[%s3825_s6 + $0xf98] sm:$0xff]  ;;  %v1741_v60 = vunpack.c.h.s8.bf16 %v733_v31  ;;  %v257_v31 = vld [vmem:[%s3825_s6 + $0x60] sm:$0xff] }
 0x207   : > { %2170 = vmatprep.subr.bf16.mxu0 %v1686_v61  ;;  %2514 = vmatprep.subr.bf16.mxu1 %v1688_v62  ;;  %v1743_v61 = vunpack.c.h.s8.bf16 %v735_v54  ;;  %v1750_v62 = vunpack.c.l.s8.bf16 %v742_v57  ;;  %v1752_v63 = vunpack.c.l.s8.bf16 %v744_v59  ;;  %v1760_v21 = vunpack.c.h.s8.bf16 %v744_v59  ;;  %v259_v54 = vld [vmem:[%s3825_s6 + $0x70] sm:$0xff]  ;;  %v268_v59 = vld [vmem:[%s3825_s6 + $0xb8] sm:$0xff] }
 0x20a   : > { %2171 = vmatpush1.bf16.msra.mxu0 %v1685_v4  ;;  %2515 = vmatpush1.bf16.msra.mxu1 %v1687_v5  ;;  %v743_v4 = vld [vmem:[%s3825_s6 + $0xf90] sm:$0xff]  ;;  %v1749_v5 = vunpack.c.l.s8.bf16 %v741_v0 }
 0x20b   : > { %2172 = vmatprep.subr.bf16.mxu0 %v1694_v6  ;;  %2516 = vmatprep.subr.bf16.mxu1 %v1696_v20  ;;  %v1751_v6 = vunpack.c.l.s8.bf16 %v743_v4  ;;  %v1758_v20 = vunpack.c.h.s8.bf16 %v742_v57  ;;  %v266_v57 = vld [vmem:[%s3825_s6 + $0xa8] sm:$0xff] }
 0x20e   : > { %2173 = vmatpush1.bf16.msra.mxu0 %v1693_v9  ;;  %2517 = vmatpush1.bf16.msra.mxu1 %v1695_v10  ;;  %v752_v9 = vld [vmem:[%s3825_s6 + $0xfd8] sm:$0xff]  ;;  %v1757_v10 = vunpack.c.h.s8.bf16 %v741_v0  ;;  %v267_v0 = vld [vmem:[%s3825_s6 + $0xb0] sm:$0xff] }
 0x20f   : > { %2174 = vmatprep.subr.bf16.mxu0 %v1702_v11  ;;  %2518 = vmatprep.subr.bf16.mxu1 %v1704_v12  ;;  %v1759_v11 = vunpack.c.h.s8.bf16 %v743_v4  ;;  %v1766_v12 = vunpack.c.l.s8.bf16 %v750_v7  ;;  %v1768_v13 = vunpack.c.l.s8.bf16 %v752_v9  ;;  %v1776_v22 = vunpack.c.h.s8.bf16 %v752_v9 }
 0x212   : > { %2175 = vmatpush1.bf16.msra.mxu0 %v1701_v15  ;;  %2519 = vmatpush1.bf16.msra.mxu1 %v1703_v16  ;;  %v751_v15 = vld [vmem:[%s3825_s6 + $0xfd0] sm:$0xff]  ;;  %v1765_v16 = vunpack.c.l.s8.bf16 %v749_v14 }
 0x213   : > { %2176 = vmatprep.subr.bf16.mxu0 %v1710_v17  ;;  %2520 = vmatprep.subr.bf16.mxu1 %v1712_v18  ;;  %v1767_v17 = vunpack.c.l.s8.bf16 %v751_v15  ;;  %v1774_v18 = vunpack.c.h.s8.bf16 %v750_v7  ;;  %v276_v7 = vld [vmem:[%s3825_s6 + $0xf8] sm:$0xff] }
 0x216   : > { %2177 = vmatpush1.bf16.msra.mxu0 %v1709_v24  ;;  %2521 = vmatpush1.bf16.msra.mxu1 %v1711_v45  ;;  %v252_v24 = vld [vmem:[%s3825_s6 + $0x38] sm:$0xff]  ;;  %v1773_v45 = vunpack.c.h.s8.bf16 %v749_v14  ;;  %v275_v14 = vld [vmem:[%s3825_s6 + $0xf0] sm:$0xff] }
 0x217   : > { %2178 = vmatprep.subr.bf16.mxu0 %v1718_v46  ;;  %2522 = vmatprep.subr.bf16.mxu1 %v1720_v25  ;;  %v1775_v46 = vunpack.c.h.s8.bf16 %v751_v15  ;;  %v762_v25 = vunpack.c.l.s8.bf16 %v250_v23  ;;  %v764_v27 = vunpack.c.l.s8.bf16 %v252_v24  ;;  %v772_v47 = vunpack.c.h.s8.bf16 %v252_v24  ;;  %v284_v23 = vld [vmem:[%s3825_s6 + $0x138] sm:$0xff] }
 0x21a   : > { %2179 = vmatpush1.bf16.msra.mxu0 %v1717_v38  ;;  %2523 = vmatpush1.bf16.msra.mxu1 %v1719_v40  ;;  %v251_v38 = vld [vmem:[%s3825_s6 + $0x30] sm:$0xff]  ;;  %v4263_v40 = vcombine.low %v4214_v29, %v4219_v35  ;;  %v769_v29 = vunpack.c.h.s8.bf16 %v249_v37 }
 0x21b   : > { %2180 = vmatprep.subr.bf16.mxu0 %v1726_v33  ;;  %2524 = vmatprep.subr.bf16.mxu1 %v1728_v34  ;;  %v761_v33 = vunpack.c.l.s8.bf16 %v249_v37  ;;  %v763_v34 = vunpack.c.l.s8.bf16 %v251_v38  ;;  %v771_v35 = vunpack.c.h.s8.bf16 %v251_v38  ;;  %v283_v37 = vld [vmem:[%s3825_s6 + $0x130] sm:$0xff] }
 0x21e   : > { %2181 = vmatpush1.bf16.msra.mxu0 %v1725_v52  ;;  %2525 = vmatpush1.bf16.msra.mxu1 %v1727_v53  ;;  %v258_v52 = vld [vmem:[%s3825_s6 + $0x68] sm:$0xff]  ;;  %v260_v53 = vld [vmem:[%s3825_s6 + $0x78] sm:$0xff] }
 0x21f   : > { %2182 = vmatprep.subr.bf16.mxu0 %v1734_v48  ;;  %2526 = vmatprep.subr.bf16.mxu1 %v1736_v30  ;;  %v778_v48 = vunpack.c.l.s8.bf16 %v258_v52  ;;  %v780_v30 = vunpack.c.l.s8.bf16 %v260_v53 }
 0x222   : > { %2183 = vmatpush1.bf16.msra.mxu0 %v1733_v55  ;;  %2527 = vmatpush1.bf16.msra.mxu1 %v1735_v56  ;;  %v777_v55 = vunpack.c.l.s8.bf16 %v257_v31  ;;  %v779_v56 = vunpack.c.l.s8.bf16 %v259_v54 }
 0x223   : > { %2184 = vmatprep.subr.bf16.mxu0 %v1742_v2  ;;  %2528 = vmatprep.subr.bf16.mxu1 %v1744_v3  ;;  %v786_v2 = vunpack.c.h.s8.bf16 %v258_v52  ;;  %v788_v3 = vunpack.c.h.s8.bf16 %v260_v53  ;;  %v292_v52 = vld [vmem:[%s3825_s6 + $0x178] sm:$0xff] }
 0x226   : > { %2185 = vmatpush1.bf16.msra.mxu0 %v1741_v60  ;;  %2529 = vmatpush1.bf16.msra.mxu1 %v1743_v61  ;;  %v785_v60 = vunpack.c.h.s8.bf16 %v257_v31  ;;  %v787_v61 = vunpack.c.h.s8.bf16 %v259_v54  ;;  %v291_v31 = vld [vmem:[%s3825_s6 + $0x170] sm:$0xff] }
 0x227   : > { %2186 = vmatprep.subr.bf16.mxu0 %v1750_v62  ;;  %2530 = vmatprep.subr.bf16.mxu1 %v1752_v63  ;;  %v796_v62 = vunpack.c.l.s8.bf16 %v268_v59  ;;  %v265_v63 = vld [vmem:[%s3825_s6 + $0xa0] sm:$0xff] }
 0x228   : > { %v793_v4 = vunpack.c.l.s8.bf16 %v265_v63  ;;  %v801_v9 = vunpack.c.h.s8.bf16 %v265_v63  ;;  %v299_v63 = vld [vmem:[%s3825_s6 + $0x1b0] sm:$0xff] }
 0x22a   : > { %2187 = vmatpush1.bf16.msra.mxu0 %v1749_v5  ;;  %2531 = vmatpush1.bf16.msra.mxu1 %v1751_v6  ;;  %v795_v5 = vunpack.c.l.s8.bf16 %v267_v0  ;;  %v802_v6 = vunpack.c.h.s8.bf16 %v266_v57 }
 0x22b   : > { %2188 = vmatprep.subr.bf16.mxu0 %v1758_v20  ;;  %2532 = vmatprep.subr.bf16.mxu1 %v1760_v21  ;;  %v804_v20 = vunpack.c.h.s8.bf16 %v268_v59  ;;  %v274_v21 = vld [vmem:[%s3825_s6 + $0xe8] sm:$0xff] }
 0x22e   : > { %2189 = vmatpush1.bf16.msra.mxu0 %v1757_v10  ;;  %2533 = vmatpush1.bf16.msra.mxu1 %v1759_v11  ;;  %v803_v10 = vunpack.c.h.s8.bf16 %v267_v0  ;;  %v810_v11 = vunpack.c.l.s8.bf16 %v274_v21 }
 0x22f   : > { %2190 = vmatprep.subr.bf16.mxu0 %v1766_v12  ;;  %2534 = vmatprep.subr.bf16.mxu1 %v1768_v13  ;;  %v812_v12 = vunpack.c.l.s8.bf16 %v276_v7  ;;  %v273_v13 = vld [vmem:[%s3825_s6 + $0xe0] sm:$0xff] }
 0x230   : > { %v809_v15 = vunpack.c.l.s8.bf16 %v273_v13  ;;  %v817_v24 = vunpack.c.h.s8.bf16 %v273_v13  ;;  %v307_v13 = vld [vmem:[%s3825_s6 + $0x1f0] sm:$0xff] }
 0x232   : > { %2191 = vmatpush1.bf16.msra.mxu0 %v1765_v16  ;;  %2535 = vmatpush1.bf16.msra.mxu1 %v1767_v17  ;;  %v811_v16 = vunpack.c.l.s8.bf16 %v275_v14  ;;  %v818_v17 = vunpack.c.h.s8.bf16 %v274_v21  ;;  %v308_v21 = vld [vmem:[%s3825_s6 + $0x1f8] sm:$0xff] }
 0x233   : > { %2192 = vmatprep.subr.bf16.mxu0 %v1774_v18  ;;  %2536 = vmatprep.subr.bf16.mxu1 %v1776_v22  ;;  %v820_v18 = vunpack.c.h.s8.bf16 %v276_v7  ;;  %v282_v22 = vld [vmem:[%s3825_s6 + $0x128] sm:$0xff] }
 0x236   : > { %2193 = vmatpush1.bf16.msra.mxu0 %v1773_v45  ;;  %2537 = vmatpush1.bf16.msra.mxu1 %v1775_v46  ;;  %v819_v45 = vunpack.c.h.s8.bf16 %v275_v14  ;;  %v826_v46 = vunpack.c.l.s8.bf16 %v282_v22 }
 0x237   : > { %2549 = vmatprep.subr.bf16.mxu0 %v762_v25  ;;  %2893 = vmatprep.subr.bf16.mxu1 %v764_v27  ;;  %v828_v25 = vunpack.c.l.s8.bf16 %v284_v23  ;;  %v281_v27 = vld [vmem:[%s3825_s6 + $0x120] sm:$0xff] }
 0x238   : > { %v825_v38 = vunpack.c.l.s8.bf16 %v281_v27  ;;  %v833_v53 = vunpack.c.h.s8.bf16 %v281_v27  ;;  %v315_v27 = vld [vmem:[%s3825_s6 + $0x230] sm:$0xff] }
 0x239   : > { %2195 = vmatmul.mubr.bf16.vlgmr.msra.gmra.mrb[0].mxu0 %v4263_v40  ;;  %2539 = vmatmul.mubr.bf16.vlgmr.msra.gmra.mrb[0].mxu1 %v4263_v40 }
 0x23a   : > { %2550 = vmatpush1.bf16.msra.mxu0 %v761_v33  ;;  %2894 = vmatpush1.bf16.msra.mxu1 %v763_v34  ;;  %v827_v33 = vunpack.c.l.s8.bf16 %v283_v37  ;;  %v834_v34 = vunpack.c.h.s8.bf16 %v282_v22  ;;  %v316_v22 = vld [vmem:[%s3825_s6 + $0x238] sm:$0xff] }
 0x23b   : > { %2551 = vmatprep.subr.bf16.mxu0 %v770_v41  ;;  %2895 = vmatprep.subr.bf16.mxu1 %v772_v47  ;;  %v836_v41 = vunpack.c.h.s8.bf16 %v284_v23  ;;  %v290_v47 = vld [vmem:[%s3825_s6 + $0x168] sm:$0xff] }
 0x23c   : > { %2581 = vmatprep.mubr.bf16.mxu0 %v3855_v36  ;;  %2925 = vmatprep.mubr.bf16.mxu1 %v3855_v36  ;;  %v794_v36 = vunpack.c.l.s8.bf16 %v266_v57  ;;  %v300_v57 = vld [vmem:[%s3825_s6 + $0x1b8] sm:$0xff] }
 0x23e   : > { %2552 = vmatpush1.bf16.msra.mxu0 %v769_v29  ;;  %2896 = vmatpush1.bf16.msra.mxu1 %v771_v35  ;;  %v835_v29 = vunpack.c.h.s8.bf16 %v283_v37  ;;  %v842_v35 = vunpack.c.l.s8.bf16 %v290_v47 }
 0x23f   : > { %2553 = vmatprep.subr.bf16.mxu0 %v778_v48  ;;  %2897 = vmatprep.subr.bf16.mxu1 %v780_v30  ;;  %v844_v48 = vunpack.c.l.s8.bf16 %v292_v52  ;;  %v289_v30 = vld [vmem:[%s3825_s6 + $0x160] sm:$0xff] }
 0x240   : > { %v841_v54 = vunpack.c.l.s8.bf16 %v289_v30  ;;  %v849_v59 = vunpack.c.h.s8.bf16 %v289_v30  ;;  %v323_v30 = vld [vmem:[%s3825_s6 + $0x270] sm:$0xff] }
 0x242   : > { %2554 = vmatpush1.bf16.msra.mxu0 %v777_v55  ;;  %2898 = vmatpush1.bf16.msra.mxu1 %v779_v56  ;;  %v843_v55 = vunpack.c.l.s8.bf16 %v291_v31  ;;  %v850_v56 = vunpack.c.h.s8.bf16 %v290_v47  ;;  %v324_v47 = vld [vmem:[%s3825_s6 + $0x278] sm:$0xff] }
 0x243   : > { %2555 = vmatprep.subr.bf16.mxu0 %v786_v2  ;;  %2899 = vmatprep.subr.bf16.mxu1 %v788_v3  ;;  %v852_v2 = vunpack.c.h.s8.bf16 %v292_v52  ;;  %v298_v3 = vld [vmem:[%s3825_s6 + $0x1a8] sm:$0xff] }
 0x246   : > { %2556 = vmatpush1.bf16.msra.mxu0 %v785_v60  ;;  %2900 = vmatpush1.bf16.msra.mxu1 %v787_v61  ;;  %v851_v60 = vunpack.c.h.s8.bf16 %v291_v31  ;;  %v858_v61 = vunpack.c.l.s8.bf16 %v298_v3 }
 0x247   : > { %2557 = vmatprep.subr.bf16.mxu0 %v794_v36  ;;  %2901 = vmatprep.subr.bf16.mxu1 %v796_v62  ;;  %v860_v36 = vunpack.c.l.s8.bf16 %v300_v57  ;;  %v297_v62 = vld [vmem:[%s3825_s6 + $0x1a0] sm:$0xff] }
 0x248   : > { %v857_v0 = vunpack.c.l.s8.bf16 %v297_v62  ;;  %v865_v7 = vunpack.c.h.s8.bf16 %v297_v62 }
 0x24a   : > { %2558 = vmatpush1.bf16.msra.mxu0 %v793_v4  ;;  %2902 = vmatpush1.bf16.msra.mxu1 %v795_v5  ;;  %v859_v4 = vunpack.c.l.s8.bf16 %v299_v63  ;;  %v866_v5 = vunpack.c.h.s8.bf16 %v298_v3 }
 0x24b   : > { %2559 = vmatprep.subr.bf16.mxu0 %v802_v6  ;;  %2903 = vmatprep.subr.bf16.mxu1 %v804_v20  ;;  %v868_v6 = vunpack.c.h.s8.bf16 %v300_v57  ;;  %v306_v20 = vld [vmem:[%s3825_s6 + $0x1e8] sm:$0xff]  ;;  %v915_v57 = vunpack.c.h.s8.bf16 %v323_v30 }
 0x24e   : > { %2560 = vmatpush1.bf16.msra.mxu0 %v801_v9  ;;  %2904 = vmatpush1.bf16.msra.mxu1 %v803_v10  ;;  %v867_v9 = vunpack.c.h.s8.bf16 %v299_v63  ;;  %v874_v10 = vunpack.c.l.s8.bf16 %v306_v20 }
 0x24f   : > { %2561 = vmatprep.subr.bf16.mxu0 %v810_v11  ;;  %2905 = vmatprep.subr.bf16.mxu1 %v812_v12  ;;  %v876_v11 = vunpack.c.l.s8.bf16 %v308_v21  ;;  %v305_v12 = vld [vmem:[%s3825_s6 + $0x1e0] sm:$0xff] }
 0x250   : > { %v873_v14 = vunpack.c.l.s8.bf16 %v305_v12  ;;  %v881_v23 = vunpack.c.h.s8.bf16 %v305_v12 }
 0x252   : > { %2562 = vmatpush1.bf16.msra.mxu0 %v809_v15  ;;  %2906 = vmatpush1.bf16.msra.mxu1 %v811_v16  ;;  %v875_v15 = vunpack.c.l.s8.bf16 %v307_v13  ;;  %v882_v16 = vunpack.c.h.s8.bf16 %v306_v20 }
 0x253   : > { %2563 = vmatprep.subr.bf16.mxu0 %v818_v17  ;;  %2907 = vmatprep.subr.bf16.mxu1 %v820_v18  ;;  %v884_v17 = vunpack.c.h.s8.bf16 %v308_v21  ;;  %v314_v18 = vld [vmem:[%s3825_s6 + $0x228] sm:$0xff] }
 0x256   : > { %2564 = vmatpush1.bf16.msra.mxu0 %v817_v24  ;;  %2908 = vmatpush1.bf16.msra.mxu1 %v819_v45  ;;  %v883_v24 = vunpack.c.h.s8.bf16 %v307_v13  ;;  %v890_v45 = vunpack.c.l.s8.bf16 %v314_v18 }
 0x257   : > { %2565 = vmatprep.subr.bf16.mxu0 %v826_v46  ;;  %2909 = vmatprep.subr.bf16.mxu1 %v828_v25  ;;  %v892_v46 = vunpack.c.l.s8.bf16 %v316_v22  ;;  %v313_v25 = vld [vmem:[%s3825_s6 + $0x220] sm:$0xff] }
 0x258   : > { %v889_v37 = vunpack.c.l.s8.bf16 %v313_v25  ;;  %v897_v52 = vunpack.c.h.s8.bf16 %v313_v25 }
 0x25a   : > { %2566 = vmatpush1.bf16.msra.mxu0 %v825_v38  ;;  %2910 = vmatpush1.bf16.msra.mxu1 %v827_v33  ;;  %v891_v38 = vunpack.c.l.s8.bf16 %v315_v27  ;;  %v898_v33 = vunpack.c.h.s8.bf16 %v314_v18 }
 0x25b   : > { %2567 = vmatprep.subr.bf16.mxu0 %v834_v34  ;;  %2911 = vmatprep.subr.bf16.mxu1 %v836_v41  ;;  %v900_v34 = vunpack.c.h.s8.bf16 %v316_v22  ;;  %v322_v41 = vld [vmem:[%s3825_s6 + $0x268] sm:$0xff] }
 0x25e   : > { %2568 = vmatpush1.bf16.msra.mxu0 %v833_v53  ;;  %2912 = vmatpush1.bf16.msra.mxu1 %v835_v29  ;;  %v899_v53 = vunpack.c.h.s8.bf16 %v315_v27  ;;  %v906_v29 = vunpack.c.l.s8.bf16 %v322_v41 }
 0x25f   : > { %2569 = vmatprep.subr.bf16.mxu0 %v842_v35  ;;  %2913 = vmatprep.subr.bf16.mxu1 %v844_v48  ;;  %v908_v35 = vunpack.c.l.s8.bf16 %v324_v47  ;;  %v321_v48 = vld [vmem:[%s3825_s6 + $0x260] sm:$0xff] }
 0x260   : > { %v905_v31 = vunpack.c.l.s8.bf16 %v321_v48  ;;  %v913_v3 = vunpack.c.h.s8.bf16 %v321_v48 }
 0x262   : > { %2570 = vmatpush1.bf16.msra.mxu0 %v841_v54  ;;  %2914 = vmatpush1.bf16.msra.mxu1 %v843_v55  ;;  %v914_v54 = vunpack.c.h.s8.bf16 %v322_v41  ;;  %v916_v55 = vunpack.c.h.s8.bf16 %v324_v47 }
 0x263   : > { %2571 = vmatprep.subr.bf16.mxu0 %v850_v56  ;;  %2915 = vmatprep.subr.bf16.mxu1 %v852_v2  ;;  %v330_v56 = vld [vmem:[%s3825_s6 + $0x2a8] sm:$0xff]  ;;  %v332_v2 = vld [vmem:[%s3825_s6 + $0x2b8] sm:$0xff] }
 0x264   : > { %v930_v63 = vunpack.c.h.s8.bf16 %v330_v56 }
 0x266   : > { %2572 = vmatpush1.bf16.msra.mxu0 %v849_v59  ;;  %2916 = vmatpush1.bf16.msra.mxu1 %v851_v60  ;;  %v924_v59 = vunpack.c.l.s8.bf16 %v332_v2  ;;  %v329_v60 = vld [vmem:[%s3825_s6 + $0x2a0] sm:$0xff] }
 0x267   : > { %2573 = vmatprep.subr.bf16.mxu0 %v858_v61  ;;  %2917 = vmatprep.subr.bf16.mxu1 %v860_v36  ;;  %v331_v61 = vld [vmem:[%s3825_s6 + $0x2b0] sm:$0xff]  ;;  %v921_v36 = vunpack.c.l.s8.bf16 %v329_v60 }
 0x268   : > { %v923_v62 = vunpack.c.l.s8.bf16 %v331_v61  ;;  %v931_v20 = vunpack.c.h.s8.bf16 %v331_v61 }
 0x26a   : > { %2574 = vmatpush1.bf16.msra.mxu0 %v857_v0  ;;  %2918 = vmatpush1.bf16.msra.mxu1 %v859_v4  ;;  %v932_v0 = vunpack.c.h.s8.bf16 %v332_v2  ;;  %v338_v4 = vld [vmem:[%s3825_s6 + $0x2e8] sm:$0xff] }
 0x26b   : > { %2575 = vmatprep.subr.bf16.mxu0 %v866_v5  ;;  %2919 = vmatprep.subr.bf16.mxu1 %v868_v6  ;;  %v340_v5 = vld [vmem:[%s3825_s6 + $0x2f8] sm:$0xff]  ;;  %v929_v6 = vunpack.c.h.s8.bf16 %v329_v60  ;;  %v938_v21 = vunpack.c.l.s8.bf16 %v338_v4  ;;  %v946_v13 = vunpack.c.h.s8.bf16 %v338_v4 }
 0x26e   : > { %2576 = vmatpush1.bf16.msra.mxu0 %v865_v7  ;;  %2920 = vmatpush1.bf16.msra.mxu1 %v867_v9  ;;  %v940_v7 = vunpack.c.l.s8.bf16 %v340_v5  ;;  %v337_v9 = vld [vmem:[%s3825_s6 + $0x2e0] sm:$0xff] }
 0x26f   : > { %2577 = vmatprep.subr.bf16.mxu0 %v874_v10  ;;  %2921 = vmatprep.subr.bf16.mxu1 %v876_v11  ;;  %v339_v10 = vld [vmem:[%s3825_s6 + $0x2f0] sm:$0xff]  ;;  %v937_v11 = vunpack.c.l.s8.bf16 %v337_v9 }
 0x270   : > { %v939_v12 = vunpack.c.l.s8.bf16 %v339_v10  ;;  %v947_v18 = vunpack.c.h.s8.bf16 %v339_v10 }
 0x272   : > { %2578 = vmatpush1.bf16.msra.mxu0 %v873_v14  ;;  %2922 = vmatpush1.bf16.msra.mxu1 %v875_v15  ;;  %v948_v14 = vunpack.c.h.s8.bf16 %v340_v5  ;;  %v346_v15 = vld [vmem:[%s3825_s6 + $0x328] sm:$0xff] }
 0x273   : > { %2579 = vmatprep.subr.bf16.mxu0 %v882_v16  ;;  %2923 = vmatprep.subr.bf16.mxu1 %v884_v17  ;;  %v348_v16 = vld [vmem:[%s3825_s6 + $0x338] sm:$0xff]  ;;  %v945_v17 = vunpack.c.h.s8.bf16 %v337_v9  ;;  %v954_v22 = vunpack.c.l.s8.bf16 %v346_v15  ;;  %v962_v27 = vunpack.c.h.s8.bf16 %v346_v15 }
 0x276   : > { %2580 = vmatpush1.bf16.msra.mxu0 %v881_v23  ;;  %2924 = vmatpush1.bf16.msra.mxu1 %v883_v24  ;;  %v956_v23 = vunpack.c.l.s8.bf16 %v348_v16  ;;  %v345_v24 = vld [vmem:[%s3825_s6 + $0x320] sm:$0xff] }
 0x277   : > { %2592 = vmatprep.subr.bf16.mxu0 %v890_v45  ;;  %2936 = vmatprep.subr.bf16.mxu1 %v892_v46  ;;  %v347_v45 = vld [vmem:[%s3825_s6 + $0x330] sm:$0xff]  ;;  %v953_v46 = vunpack.c.l.s8.bf16 %v345_v24 }
 0x278   : > { %v955_v25 = vunpack.c.l.s8.bf16 %v347_v45  ;;  %v963_v41 = vunpack.c.h.s8.bf16 %v347_v45 }
 0x279   : > { %2582 = vmatmul.mubr.bf16.vlgmr.msra.gmra.mrb[4].mxu0 %v3885_v44  ;;  %2926 = vmatmul.mubr.bf16.vlgmr.msra.gmra.mrb[4].mxu1 %v3885_v44  ;;  %v907_v44 = vunpack.c.l.s8.bf16 %v323_v30 }
 0x27a   : > { %2593 = vmatpush1.bf16.msra.mxu0 %v889_v37  ;;  %2937 = vmatpush1.bf16.msra.mxu1 %v891_v38  ;;  %v964_v37 = vunpack.c.h.s8.bf16 %v348_v16  ;;  %v354_v38 = vld [vmem:[%s3825_s6 + $0x368] sm:$0xff] }
 0x27b   : > { %2594 = vmatprep.subr.bf16.mxu0 %v898_v33  ;;  %2938 = vmatprep.subr.bf16.mxu1 %v900_v34  ;;  %v356_v33 = vld [vmem:[%s3825_s6 + $0x378] sm:$0xff]  ;;  %v961_v34 = vunpack.c.h.s8.bf16 %v345_v24  ;;  %v970_v47 = vunpack.c.l.s8.bf16 %v354_v38  ;;  %v978_v30 = vunpack.c.h.s8.bf16 %v354_v38 }
 0x27c   : > { %2624 = vmatprep.mubr.bf16.mxu0 %v3901_v51  ;;  %2968 = vmatprep.mubr.bf16.mxu1 %v3901_v51  ;;  %v922_v51 = vunpack.c.l.s8.bf16 %v330_v56 }
 0x27e   : > { %2595 = vmatpush1.bf16.msra.mxu0 %v897_v52  ;;  %2939 = vmatpush1.bf16.msra.mxu1 %v899_v53  ;;  %v972_v52 = vunpack.c.l.s8.bf16 %v356_v33  ;;  %v353_v53 = vld [vmem:[%s3825_s6 + $0x360] sm:$0xff] }
 0x27f   : > { %2596 = vmatprep.subr.bf16.mxu0 %v906_v29  ;;  %2940 = vmatprep.subr.bf16.mxu1 %v908_v35  ;;  %v355_v29 = vld [vmem:[%s3825_s6 + $0x370] sm:$0xff]  ;;  %v969_v35 = vunpack.c.l.s8.bf16 %v353_v53 }
 0x280   : > { %v971_v48 = vunpack.c.l.s8.bf16 %v355_v29  ;;  %v979_v56 = vunpack.c.h.s8.bf16 %v355_v29 }
 0x282   : > { %2597 = vmatpush1.bf16.msra.mxu0 %v905_v31  ;;  %2941 = vmatpush1.bf16.msra.mxu1 %v907_v44  ;;  %v980_v31 = vunpack.c.h.s8.bf16 %v356_v33  ;;  %v362_v44 = vld [vmem:[%s3825_s6 + $0x3a8] sm:$0xff] }
 0x283   : > { %2598 = vmatprep.subr.bf16.mxu0 %v914_v54  ;;  %2942 = vmatprep.subr.bf16.mxu1 %v916_v55  ;;  %v364_v54 = vld [vmem:[%s3825_s6 + $0x3b8] sm:$0xff]  ;;  %v977_v55 = vunpack.c.h.s8.bf16 %v353_v53  ;;  %v986_v2 = vunpack.c.l.s8.bf16 %v362_v44  ;;  %v994_v61 = vunpack.c.h.s8.bf16 %v362_v44 }
 0x286   : > { %2599 = vmatpush1.bf16.msra.mxu0 %v913_v3  ;;  %2943 = vmatpush1.bf16.msra.mxu1 %v915_v57  ;;  %v988_v3 = vunpack.c.l.s8.bf16 %v364_v54  ;;  %v361_v57 = vld [vmem:[%s3825_s6 + $0x3a0] sm:$0xff] }
 0x287   : > { %2600 = vmatprep.subr.bf16.mxu0 %v922_v51  ;;  %2944 = vmatprep.subr.bf16.mxu1 %v924_v59  ;;  %v363_v51 = vld [vmem:[%s3825_s6 + $0x3b0] sm:$0xff]  ;;  %v985_v59 = vunpack.c.l.s8.bf16 %v361_v57 }
 0x288   : > { %v987_v60 = vunpack.c.l.s8.bf16 %v363_v51  ;;  %v995_v4 = vunpack.c.h.s8.bf16 %v363_v51  ;;  %v402_v51 = vld [vmem:[%s3825_s6 + $0x4e8] sm:$0xff] }
 0x28a   : > { %2601 = vmatpush1.bf16.msra.mxu0 %v921_v36  ;;  %2945 = vmatpush1.bf16.msra.mxu1 %v923_v62  ;;  %v996_v36 = vunpack.c.h.s8.bf16 %v364_v54  ;;  %v370_v62 = vld [vmem:[%s3825_s6 + $0x3e8] sm:$0xff]  ;;  %v393_v54 = vld [vmem:[%s3825_s6 + $0x4a0] sm:$0xff] }
 0x28b   : > { %2602 = vmatprep.subr.bf16.mxu0 %v930_v63  ;;  %2946 = vmatprep.subr.bf16.mxu1 %v932_v0  ;;  %v372_v63 = vld [vmem:[%s3825_s6 + $0x3f8] sm:$0xff]  ;;  %v993_v0 = vunpack.c.h.s8.bf16 %v361_v57  ;;  %v1002_v5 = vunpack.c.l.s8.bf16 %v370_v62  ;;  %v1010_v10 = vunpack.c.h.s8.bf16 %v370_v62 }
 0x28e   : > { %2603 = vmatpush1.bf16.msra.mxu0 %v929_v6  ;;  %2947 = vmatpush1.bf16.msra.mxu1 %v931_v20  ;;  %v1004_v6 = vunpack.c.l.s8.bf16 %v372_v63  ;;  %v369_v20 = vld [vmem:[%s3825_s6 + $0x3e0] sm:$0xff] }
 0x28f   : > { %2604 = vmatprep.subr.bf16.mxu0 %v938_v21  ;;  %2948 = vmatprep.subr.bf16.mxu1 %v940_v7  ;;  %v371_v21 = vld [vmem:[%s3825_s6 + $0x3f0] sm:$0xff]  ;;  %v1001_v7 = vunpack.c.l.s8.bf16 %v369_v20 }
 0x290   : > { %v1003_v9 = vunpack.c.l.s8.bf16 %v371_v21  ;;  %v1011_v15 = vunpack.c.h.s8.bf16 %v371_v21  ;;  %v410_v21 = vld [vmem:[%s3825_s6 + $0x528] sm:$0xff] }
 0x292   : > { %2605 = vmatpush1.bf16.msra.mxu0 %v937_v11  ;;  %2949 = vmatpush1.bf16.msra.mxu1 %v939_v12  ;;  %v1012_v11 = vunpack.c.h.s8.bf16 %v372_v63  ;;  %v378_v12 = vld [vmem:[%s3825_s6 + $0x428] sm:$0xff]  ;;  %v401_v63 = vld [vmem:[%s3825_s6 + $0x4e0] sm:$0xff] }
 0x293   : > { %2606 = vmatprep.subr.bf16.mxu0 %v946_v13  ;;  %2950 = vmatprep.subr.bf16.mxu1 %v948_v14  ;;  %v380_v13 = vld [vmem:[%s3825_s6 + $0x438] sm:$0xff]  ;;  %v1009_v14 = vunpack.c.h.s8.bf16 %v369_v20  ;;  %v1018_v16 = vunpack.c.l.s8.bf16 %v378_v12  ;;  %v1026_v45 = vunpack.c.h.s8.bf16 %v378_v12 }
 0x296   : > { %2607 = vmatpush1.bf16.msra.mxu0 %v945_v17  ;;  %2951 = vmatpush1.bf16.msra.mxu1 %v947_v18  ;;  %v1020_v17 = vunpack.c.l.s8.bf16 %v380_v13  ;;  %v377_v18 = vld [vmem:[%s3825_s6 + $0x420] sm:$0xff] }
 0x297   : > { %2608 = vmatprep.subr.bf16.mxu0 %v954_v22  ;;  %2952 = vmatprep.subr.bf16.mxu1 %v956_v23  ;;  %v379_v22 = vld [vmem:[%s3825_s6 + $0x430] sm:$0xff]  ;;  %v1017_v23 = vunpack.c.l.s8.bf16 %v377_v18 }
 0x298   : > { %v1019_v24 = vunpack.c.l.s8.bf16 %v379_v22  ;;  %v1027_v38 = vunpack.c.h.s8.bf16 %v379_v22  ;;  %v418_v22 = vld [vmem:[%s3825_s6 + $0x568] sm:$0xff] }
 0x29a   : > { %2609 = vmatpush1.bf16.msra.mxu0 %v953_v46  ;;  %2953 = vmatpush1.bf16.msra.mxu1 %v955_v25  ;;  %v1028_v46 = vunpack.c.h.s8.bf16 %v380_v13  ;;  %v386_v25 = vld [vmem:[%s3825_s6 + $0x468] sm:$0xff]  ;;  %v409_v13 = vld [vmem:[%s3825_s6 + $0x520] sm:$0xff] }
 0x29b   : > { %2610 = vmatprep.subr.bf16.mxu0 %v962_v27  ;;  %2954 = vmatprep.subr.bf16.mxu1 %v964_v37  ;;  %v388_v27 = vld [vmem:[%s3825_s6 + $0x478] sm:$0xff]  ;;  %v1025_v37 = vunpack.c.h.s8.bf16 %v377_v18  ;;  %v1034_v33 = vunpack.c.l.s8.bf16 %v386_v25  ;;  %v1042_v53 = vunpack.c.h.s8.bf16 %v386_v25 }
 0x29c   : > { %v1044_v29 = vunpack.c.h.s8.bf16 %v388_v27 }
 0x29e   : > { %2611 = vmatpush1.bf16.msra.mxu0 %v961_v34  ;;  %2955 = vmatpush1.bf16.msra.mxu1 %v963_v41  ;;  %v1036_v34 = vunpack.c.l.s8.bf16 %v388_v27  ;;  %v385_v41 = vld [vmem:[%s3825_s6 + $0x460] sm:$0xff] }
 0x29f   : > { %2612 = vmatprep.subr.bf16.mxu0 %v970_v47  ;;  %2956 = vmatprep.subr.bf16.mxu1 %v972_v52  ;;  %v387_v47 = vld [vmem:[%s3825_s6 + $0x470] sm:$0xff]  ;;  %v1033_v52 = vunpack.c.l.s8.bf16 %v385_v41  ;;  %v417_v27 = vld [vmem:[%s3825_s6 + $0x560] sm:$0xff] }
 0x2a2   : > { %2613 = vmatpush1.bf16.msra.mxu0 %v969_v35  ;;  %2957 = vmatpush1.bf16.msra.mxu1 %v971_v48  ;;  %v394_v35 = vld [vmem:[%s3825_s6 + $0x4a8] sm:$0xff]  ;;  %v396_v48 = vld [vmem:[%s3825_s6 + $0x4b8] sm:$0xff] }
 0x2a3   : > { %2614 = vmatprep.subr.bf16.mxu0 %v978_v30  ;;  %2958 = vmatprep.subr.bf16.mxu1 %v980_v31  ;;  %v1041_v30 = vunpack.c.h.s8.bf16 %v385_v41  ;;  %v1043_v31 = vunpack.c.h.s8.bf16 %v387_v47  ;;  %v1052_v44 = vunpack.c.l.s8.bf16 %v396_v48  ;;  %v1060_v57 = vunpack.c.h.s8.bf16 %v396_v48  ;;  %v425_v48 = vld [vmem:[%s3825_s6 + $0x5a0] sm:$0xff] }
 0x2a6   : > { %2615 = vmatpush1.bf16.msra.mxu0 %v977_v55  ;;  %2959 = vmatpush1.bf16.msra.mxu1 %v979_v56  ;;  %v395_v55 = vld [vmem:[%s3825_s6 + $0x4b0] sm:$0xff]  ;;  %v1049_v56 = vunpack.c.l.s8.bf16 %v393_v54 }
 0x2a7   : > { %2616 = vmatprep.subr.bf16.mxu0 %v986_v2  ;;  %2960 = vmatprep.subr.bf16.mxu1 %v988_v3  ;;  %v1051_v2 = vunpack.c.l.s8.bf16 %v395_v55  ;;  %v1058_v3 = vunpack.c.h.s8.bf16 %v394_v35 }
 0x2aa   : > { %2617 = vmatpush1.bf16.msra.mxu0 %v985_v59  ;;  %2961 = vmatpush1.bf16.msra.mxu1 %v987_v60  ;;  %v404_v59 = vld [vmem:[%s3825_s6 + $0x4f8] sm:$0xff]  ;;  %v1057_v60 = vunpack.c.h.s8.bf16 %v393_v54 }
 0x2ab   : > { %2618 = vmatprep.subr.bf16.mxu0 %v994_v61  ;;  %2962 = vmatprep.subr.bf16.mxu1 %v996_v36  ;;  %v1059_v61 = vunpack.c.h.s8.bf16 %v395_v55  ;;  %v1066_v36 = vunpack.c.l.s8.bf16 %v402_v51  ;;  %v1068_v62 = vunpack.c.l.s8.bf16 %v404_v59  ;;  %v1076_v20 = vunpack.c.h.s8.bf16 %v404_v59  ;;  %v434_v55 = vld [vmem:[%s3825_s6 + $0x5e8] sm:$0xff]  ;;  %v433_v59 = vld [vmem:[%s3825_s6 + $0x5e0] sm:$0xff] }
 0x2ae   : > { %2619 = vmatpush1.bf16.msra.mxu0 %v993_v0  ;;  %2963 = vmatpush1.bf16.msra.mxu1 %v995_v4  ;;  %v403_v0 = vld [vmem:[%s3825_s6 + $0x4f0] sm:$0xff]  ;;  %v1065_v4 = vunpack.c.l.s8.bf16 %v401_v63 }
 0x2af   : > { %2620 = vmatprep.subr.bf16.mxu0 %v1002_v5  ;;  %2964 = vmatprep.subr.bf16.mxu1 %v1004_v6  ;;  %v1067_v5 = vunpack.c.l.s8.bf16 %v403_v0  ;;  %v1074_v6 = vunpack.c.h.s8.bf16 %v402_v51 }
 0x2b2   : > { %2621 = vmatpush1.bf16.msra.mxu0 %v1001_v7  ;;  %2965 = vmatpush1.bf16.msra.mxu1 %v1003_v9  ;;  %v412_v7 = vld [vmem:[%s3825_s6 + $0x538] sm:$0xff]  ;;  %v1073_v9 = vunpack.c.h.s8.bf16 %v401_v63 }
 0x2b3   : > { %2622 = vmatprep.subr.bf16.mxu0 %v1010_v10  ;;  %2966 = vmatprep.subr.bf16.mxu1 %v1012_v11  ;;  %v1075_v10 = vunpack.c.h.s8.bf16 %v403_v0  ;;  %v1082_v11 = vunpack.c.l.s8.bf16 %v410_v21  ;;  %v1084_v12 = vunpack.c.l.s8.bf16 %v412_v7  ;;  %v1092_v18 = vunpack.c.h.s8.bf16 %v412_v7  ;;  %v442_v0 = vld [vmem:[%s3825_s6 + $0x628] sm:$0xff]  ;;  %v441_v7 = vld [vmem:[%s3825_s6 + $0x620] sm:$0xff] }
 0x2b6   : > { %2623 = vmatpush1.bf16.msra.mxu0 %v1009_v14  ;;  %2967 = vmatpush1.bf16.msra.mxu1 %v1011_v15  ;;  %v411_v14 = vld [vmem:[%s3825_s6 + $0x530] sm:$0xff]  ;;  %v1081_v15 = vunpack.c.l.s8.bf16 %v409_v13 }
 0x2b7   : > { %2635 = vmatprep.subr.bf16.mxu0 %v1018_v16  ;;  %2979 = vmatprep.subr.bf16.mxu1 %v1020_v17  ;;  %v1083_v16 = vunpack.c.l.s8.bf16 %v411_v14  ;;  %v1090_v17 = vunpack.c.h.s8.bf16 %v410_v21 }
 0x2b9   : > { %2625 = vmatmul.mubr.bf16.vlgmr.msra.gmra.mrb[4].mxu0 %v3939_v19  ;;  %2969 = vmatmul.mubr.bf16.vlgmr.msra.gmra.mrb[4].mxu1 %v3939_v19  ;;  %v1035_v19 = vunpack.c.l.s8.bf16 %v387_v47  ;;  %v426_v47 = vld [vmem:[%s3825_s6 + $0x5a8] sm:$0xff] }
 0x2ba   : > { %2636 = vmatpush1.bf16.msra.mxu0 %v1017_v23  ;;  %2980 = vmatpush1.bf16.msra.mxu1 %v1019_v24  ;;  %v420_v23 = vld [vmem:[%s3825_s6 + $0x578] sm:$0xff]  ;;  %v1089_v24 = vunpack.c.h.s8.bf16 %v409_v13 }
 0x2bb   : > { %2637 = vmatprep.subr.bf16.mxu0 %v1026_v45  ;;  %2981 = vmatprep.subr.bf16.mxu1 %v1028_v46  ;;  %v1091_v45 = vunpack.c.h.s8.bf16 %v411_v14  ;;  %v1098_v46 = vunpack.c.l.s8.bf16 %v418_v22  ;;  %v1100_v25 = vunpack.c.l.s8.bf16 %v420_v23  ;;  %v1108_v41 = vunpack.c.h.s8.bf16 %v420_v23  ;;  %v450_v14 = vld [vmem:[%s3825_s6 + $0x668] sm:$0xff]  ;;  %v449_v23 = vld [vmem:[%s3825_s6 + $0x660] sm:$0xff] }
 0x2bc   : > { %2667 = vmatprep.mubr.bf16.mxu0 %v3955_v26  ;;  %3011 = vmatprep.mubr.bf16.mxu1 %v3955_v26  ;;  %v1050_v26 = vunpack.c.l.s8.bf16 %v394_v35 }
 0x2be   : > { %2638 = vmatpush1.bf16.msra.mxu0 %v1025_v37  ;;  %2982 = vmatpush1.bf16.msra.mxu1 %v1027_v38  ;;  %v419_v37 = vld [vmem:[%s3825_s6 + $0x570] sm:$0xff]  ;;  %v1097_v38 = vunpack.c.l.s8.bf16 %v417_v27 }
 0x2bf   : > { %2639 = vmatprep.subr.bf16.mxu0 %v1034_v33  ;;  %2983 = vmatprep.subr.bf16.mxu1 %v1036_v34  ;;  %v1099_v33 = vunpack.c.l.s8.bf16 %v419_v37  ;;  %v1106_v34 = vunpack.c.h.s8.bf16 %v418_v22 }
 0x2c2   : > { %2640 = vmatpush1.bf16.msra.mxu0 %v1033_v52  ;;  %2984 = vmatpush1.bf16.msra.mxu1 %v1035_v19  ;;  %v428_v52 = vld [vmem:[%s3825_s6 + $0x5b8] sm:$0xff]  ;;  %v1105_v19 = vunpack.c.h.s8.bf16 %v417_v27  ;;  %v458_v27 = vld [vmem:[%s3825_s6 + $0x6a8] sm:$0xff] }
 0x2c3   : > { %2641 = vmatprep.subr.bf16.mxu0 %v1042_v53  ;;  %2985 = vmatprep.subr.bf16.mxu1 %v1044_v29  ;;  %v1107_v53 = vunpack.c.h.s8.bf16 %v419_v37  ;;  %v1114_v29 = vunpack.c.l.s8.bf16 %v426_v47  ;;  %v1116_v35 = vunpack.c.l.s8.bf16 %v428_v52  ;;  %v1124_v54 = vunpack.c.h.s8.bf16 %v428_v52  ;;  %v460_v37 = vld [vmem:[%s3825_s6 + $0x6b8] sm:$0xff] }
 0x2c6   : > { %2642 = vmatpush1.bf16.msra.mxu0 %v1041_v30  ;;  %2986 = vmatpush1.bf16.msra.mxu1 %v1043_v31  ;;  %v427_v30 = vld [vmem:[%s3825_s6 + $0x5b0] sm:$0xff]  ;;  %v1113_v31 = vunpack.c.l.s8.bf16 %v425_v48 }
 0x2c7   : > { %2643 = vmatprep.subr.bf16.mxu0 %v1050_v26  ;;  %2987 = vmatprep.subr.bf16.mxu1 %v1052_v44  ;;  %v1115_v26 = vunpack.c.l.s8.bf16 %v427_v30  ;;  %v1122_v44 = vunpack.c.h.s8.bf16 %v426_v47  ;;  %v459_v47 = vld [vmem:[%s3825_s6 + $0x6b0] sm:$0xff] }
 0x2ca   : > { %2644 = vmatpush1.bf16.msra.mxu0 %v1049_v56  ;;  %2988 = vmatpush1.bf16.msra.mxu1 %v1051_v2  ;;  %v436_v56 = vld [vmem:[%s3825_s6 + $0x5f8] sm:$0xff]  ;;  %v1121_v2 = vunpack.c.h.s8.bf16 %v425_v48 }
 0x2cb   : > { %2645 = vmatprep.subr.bf16.mxu0 %v1058_v3  ;;  %2989 = vmatprep.subr.bf16.mxu1 %v1060_v57  ;;  %v1123_v3 = vunpack.c.h.s8.bf16 %v427_v30  ;;  %v1130_v57 = vunpack.c.l.s8.bf16 %v434_v55  ;;  %v1132_v51 = vunpack.c.l.s8.bf16 %v436_v56  ;;  %v1140_v63 = vunpack.c.h.s8.bf16 %v436_v56  ;;  %v468_v48 = vld [vmem:[%s3825_s6 + $0x6f8] sm:$0xff] }
 0x2ce   : > { %2646 = vmatpush1.bf16.msra.mxu0 %v1057_v60  ;;  %2990 = vmatpush1.bf16.msra.mxu1 %v1059_v61  ;;  %v435_v60 = vld [vmem:[%s3825_s6 + $0x5f0] sm:$0xff]  ;;  %v1129_v61 = vunpack.c.l.s8.bf16 %v433_v59 }
 0x2cf   : > { %2647 = vmatprep.subr.bf16.mxu0 %v1066_v36  ;;  %2991 = vmatprep.subr.bf16.mxu1 %v1068_v62  ;;  %v1131_v36 = vunpack.c.l.s8.bf16 %v435_v60  ;;  %v1138_v62 = vunpack.c.h.s8.bf16 %v434_v55  ;;  %v467_v55 = vld [vmem:[%s3825_s6 + $0x6f0] sm:$0xff] }
 0x2d2   : > { %2648 = vmatpush1.bf16.msra.mxu0 %v1065_v4  ;;  %2992 = vmatpush1.bf16.msra.mxu1 %v1067_v5  ;;  %v444_v4 = vld [vmem:[%s3825_s6 + $0x638] sm:$0xff]  ;;  %v1137_v5 = vunpack.c.h.s8.bf16 %v433_v59 }
 0x2d3   : > { %2649 = vmatprep.subr.bf16.mxu0 %v1074_v6  ;;  %2993 = vmatprep.subr.bf16.mxu1 %v1076_v20  ;;  %v1139_v6 = vunpack.c.h.s8.bf16 %v435_v60  ;;  %v1146_v20 = vunpack.c.l.s8.bf16 %v442_v0  ;;  %v1148_v21 = vunpack.c.l.s8.bf16 %v444_v4  ;;  %v1156_v13 = vunpack.c.h.s8.bf16 %v444_v4  ;;  %v474_v4 = vld [vmem:[%s3825_s6 + $0x728] sm:$0xff] }
 0x2d6   : > { %2650 = vmatpush1.bf16.msra.mxu0 %v1073_v9  ;;  %2994 = vmatpush1.bf16.msra.mxu1 %v1075_v10  ;;  %v443_v9 = vld [vmem:[%s3825_s6 + $0x630] sm:$0xff]  ;;  %v1145_v10 = vunpack.c.l.s8.bf16 %v441_v7 }
 0x2d7   : > { %2651 = vmatprep.subr.bf16.mxu0 %v1082_v11  ;;  %2995 = vmatprep.subr.bf16.mxu1 %v1084_v12  ;;  %v1147_v11 = vunpack.c.l.s8.bf16 %v443_v9  ;;  %v1154_v12 = vunpack.c.h.s8.bf16 %v442_v0  ;;  %v1204_v0 = vunpack.c.h.s8.bf16 %v468_v48 }
 0x2da   : > { %2652 = vmatpush1.bf16.msra.mxu0 %v1081_v15  ;;  %2996 = vmatpush1.bf16.msra.mxu1 %v1083_v16  ;;  %v452_v15 = vld [vmem:[%s3825_s6 + $0x678] sm:$0xff]  ;;  %v1153_v16 = vunpack.c.h.s8.bf16 %v441_v7 }
 0x2db   : > { %2653 = vmatprep.subr.bf16.mxu0 %v1090_v17  ;;  %2997 = vmatprep.subr.bf16.mxu1 %v1092_v18  ;;  %v1155_v17 = vunpack.c.h.s8.bf16 %v443_v9  ;;  %v1162_v18 = vunpack.c.l.s8.bf16 %v450_v14  ;;  %v1164_v22 = vunpack.c.l.s8.bf16 %v452_v15  ;;  %v473_v9 = vld [vmem:[%s3825_s6 + $0x720] sm:$0xff] }
 0x2de   : > { %2654 = vmatpush1.bf16.msra.mxu0 %v1089_v24  ;;  %2998 = vmatpush1.bf16.msra.mxu1 %v1091_v45  ;;  %v451_v24 = vld [vmem:[%s3825_s6 + $0x670] sm:$0xff]  ;;  %v1161_v45 = vunpack.c.l.s8.bf16 %v449_v23 }
 0x2df   : > { %2655 = vmatprep.subr.bf16.mxu0 %v1098_v46  ;;  %2999 = vmatprep.subr.bf16.mxu1 %v1100_v25  ;;  %v1170_v46 = vunpack.c.h.s8.bf16 %v450_v14  ;;  %v1172_v25 = vunpack.c.h.s8.bf16 %v452_v15  ;;  %v482_v15 = vld [vmem:[%s3825_s6 + $0x768] sm:$0xff] }
 0x2e2   : > { %2656 = vmatpush1.bf16.msra.mxu0 %v1097_v38  ;;  %3000 = vmatpush1.bf16.msra.mxu1 %v1099_v33  ;;  %v1169_v38 = vunpack.c.h.s8.bf16 %v449_v23  ;;  %v1171_v33 = vunpack.c.h.s8.bf16 %v451_v24 }
 0x2e3   : > { %2657 = vmatprep.subr.bf16.mxu0 %v1106_v34  ;;  %3001 = vmatprep.subr.bf16.mxu1 %v1108_v41  ;;  %v1180_v34 = vunpack.c.l.s8.bf16 %v460_v37  ;;  %v457_v41 = vld [vmem:[%s3825_s6 + $0x6a0] sm:$0xff] }
 0x2e4   : > { %v1177_v52 = vunpack.c.l.s8.bf16 %v457_v41  ;;  %v1185_v30 = vunpack.c.h.s8.bf16 %v457_v41 }
 0x2e6   : > { %2658 = vmatpush1.bf16.msra.mxu0 %v1105_v19  ;;  %3002 = vmatpush1.bf16.msra.mxu1 %v1107_v53  ;;  %v1179_v19 = vunpack.c.l.s8.bf16 %v459_v47  ;;  %v1186_v53 = vunpack.c.h.s8.bf16 %v458_v27 }
 0x2e7   : > { %2659 = vmatprep.subr.bf16.mxu0 %v1114_v29  ;;  %3003 = vmatprep.subr.bf16.mxu1 %v1116_v35  ;;  %v1188_v29 = vunpack.c.h.s8.bf16 %v460_v37  ;;  %v466_v35 = vld [vmem:[%s3825_s6 + $0x6e8] sm:$0xff] }
 0x2e8   : > { %v490_v37 = vld [vmem:[%s3825_s6 + $0x7a8] sm:$0xff] }
 0x2ea   : > { %2660 = vmatpush1.bf16.msra.mxu0 %v1113_v31  ;;  %3004 = vmatpush1.bf16.msra.mxu1 %v1115_v26  ;;  %v1187_v31 = vunpack.c.h.s8.bf16 %v459_v47  ;;  %v1194_v26 = vunpack.c.l.s8.bf16 %v466_v35  ;;  %v489_v47 = vld [vmem:[%s3825_s6 + $0x7a0] sm:$0xff] }
 0x2eb   : > { %2661 = vmatprep.subr.bf16.mxu0 %v1122_v44  ;;  %3005 = vmatprep.subr.bf16.mxu1 %v1124_v54  ;;  %v1196_v44 = vunpack.c.l.s8.bf16 %v468_v48  ;;  %v465_v54 = vld [vmem:[%s3825_s6 + $0x6e0] sm:$0xff]  ;;  %v498_v48 = vld [vmem:[%s3825_s6 + $0x7e8] sm:$0xff] }
 0x2ec   : > { %v1193_v60 = vunpack.c.l.s8.bf16 %v465_v54 }
 0x2ee   : > { %2662 = vmatpush1.bf16.msra.mxu0 %v1121_v2  ;;  %3006 = vmatpush1.bf16.msra.mxu1 %v1123_v3 }
 0x2ef   : > { %2663 = vmatprep.subr.bf16.mxu0 %v1130_v57  ;;  %3007 = vmatprep.subr.bf16.mxu1 %v1132_v51 }
 0x2f2   : > { %2664 = vmatpush1.bf16.msra.mxu0 %v1129_v61  ;;  %3008 = vmatpush1.bf16.msra.mxu1 %v1131_v36  ;;  %v1195_v61 = vunpack.c.l.s8.bf16 %v467_v55 }
 0x2f3   : > { %2665 = vmatprep.subr.bf16.mxu0 %v1138_v62  ;;  %3009 = vmatprep.subr.bf16.mxu1 %v1140_v63  ;;  %v1202_v63 = vunpack.c.h.s8.bf16 %v466_v35 }
 0x2f6   : > { %2666 = vmatpush1.bf16.msra.mxu0 %v1137_v5  ;;  %3010 = vmatpush1.bf16.msra.mxu1 %v1139_v6  ;;  %v476_v5 = vld [vmem:[%s3825_s6 + $0x738] sm:$0xff]  ;;  %v1201_v6 = vunpack.c.h.s8.bf16 %v465_v54 }
 0x2f7   : > { %2678 = vmatprep.subr.bf16.mxu0 %v1146_v20  ;;  %3022 = vmatprep.subr.bf16.mxu1 %v1148_v21  ;;  %v1203_v20 = vunpack.c.h.s8.bf16 %v467_v55  ;;  %v1210_v21 = vunpack.c.l.s8.bf16 %v474_v4  ;;  %v1212_v7 = vunpack.c.l.s8.bf16 %v476_v5  ;;  %v1220_v14 = vunpack.c.h.s8.bf16 %v476_v5  ;;  %v497_v55 = vld [vmem:[%s3825_s6 + $0x7e0] sm:$0xff] }
 0x2f9   : > { %2668 = vmatmul.mubr.bf16.vlgmr.msra.gmra.mrb[4].mxu0 %v3993_v1  ;;  %3012 = vmatmul.mubr.bf16.vlgmr.msra.gmra.mrb[4].mxu1 %v3993_v1  ;;  %v1163_v1 = vunpack.c.l.s8.bf16 %v451_v24  ;;  %v481_v24 = vld [vmem:[%s3825_s6 + $0x760] sm:$0xff] }
 0x2fa   : > { %2679 = vmatpush1.bf16.msra.mxu0 %v1145_v10  ;;  %3023 = vmatpush1.bf16.msra.mxu1 %v1147_v11  ;;  %v475_v10 = vld [vmem:[%s3825_s6 + $0x730] sm:$0xff]  ;;  %v1209_v11 = vunpack.c.l.s8.bf16 %v473_v9 }
 0x2fb   : > { %2680 = vmatprep.subr.bf16.mxu0 %v1154_v12  ;;  %3024 = vmatprep.subr.bf16.mxu1 %v1156_v13  ;;  %v1211_v12 = vunpack.c.l.s8.bf16 %v475_v10  ;;  %v1218_v13 = vunpack.c.h.s8.bf16 %v474_v4  ;;  %v507_v4 = vld [vmem:[%s3825_s6 + $0x830] sm:$0xff] }
 0x2fc   : > { %2710 = vmatprep.mubr.bf16.mxu0 %v4009_v8  ;;  %3054 = vmatprep.mubr.bf16.mxu1 %v4009_v8  ;;  %v1178_v8 = vunpack.c.l.s8.bf16 %v458_v27 }
 0x2fe   : > { %2681 = vmatpush1.bf16.msra.mxu0 %v1153_v16  ;;  %3025 = vmatpush1.bf16.msra.mxu1 %v1155_v17  ;;  %v484_v16 = vld [vmem:[%s3825_s6 + $0x778] sm:$0xff]  ;;  %v1217_v17 = vunpack.c.h.s8.bf16 %v473_v9 }
 0x2ff   : > { %2682 = vmatprep.subr.bf16.mxu0 %v1162_v18  ;;  %3026 = vmatprep.subr.bf16.mxu1 %v1164_v22  ;;  %v1219_v18 = vunpack.c.h.s8.bf16 %v475_v10  ;;  %v1226_v22 = vunpack.c.l.s8.bf16 %v482_v15  ;;  %v1228_v23 = vunpack.c.l.s8.bf16 %v484_v16  ;;  %v1236_v27 = vunpack.c.h.s8.bf16 %v484_v16  ;;  %v516_v9 = vld [vmem:[%s3825_s6 + $0x878] sm:$0xff] }
 0x302   : > { %2683 = vmatpush1.bf16.msra.mxu0 %v1161_v45  ;;  %3027 = vmatpush1.bf16.msra.mxu1 %v1163_v1  ;;  %v483_v45 = vld [vmem:[%s3825_s6 + $0x770] sm:$0xff]  ;;  %v1225_v1 = vunpack.c.l.s8.bf16 %v481_v24 }
 0x303   : > { %2684 = vmatprep.subr.bf16.mxu0 %v1170_v46  ;;  %3028 = vmatprep.subr.bf16.mxu1 %v1172_v25  ;;  %v1227_v46 = vunpack.c.l.s8.bf16 %v483_v45  ;;  %v1234_v25 = vunpack.c.h.s8.bf16 %v482_v15  ;;  %v515_v15 = vld [vmem:[%s3825_s6 + $0x870] sm:$0xff] }
 0x306   : > { %2685 = vmatpush1.bf16.msra.mxu0 %v1169_v38  ;;  %3029 = vmatpush1.bf16.msra.mxu1 %v1171_v33  ;;  %v492_v38 = vld [vmem:[%s3825_s6 + $0x7b8] sm:$0xff]  ;;  %v1233_v33 = vunpack.c.h.s8.bf16 %v481_v24 }
 0x307   : > { %2686 = vmatprep.subr.bf16.mxu0 %v1178_v8  ;;  %3030 = vmatprep.subr.bf16.mxu1 %v1180_v34  ;;  %v1235_v8 = vunpack.c.h.s8.bf16 %v483_v45  ;;  %v1242_v34 = vunpack.c.l.s8.bf16 %v490_v37  ;;  %v1244_v41 = vunpack.c.l.s8.bf16 %v492_v38  ;;  %v1252_v35 = vunpack.c.h.s8.bf16 %v492_v38 }
 0x308   : > { %v1299_v45 = vunpack.c.h.s8.bf16 %v515_v15 }
 0x30a   : > { %2687 = vmatpush1.bf16.msra.mxu0 %v1177_v52  ;;  %3031 = vmatpush1.bf16.msra.mxu1 %v1179_v19  ;;  %v491_v52 = vld [vmem:[%s3825_s6 + $0x7b0] sm:$0xff]  ;;  %v1241_v19 = vunpack.c.l.s8.bf16 %v489_v47 }
 0x30b   : > { %2688 = vmatprep.subr.bf16.mxu0 %v1186_v53  ;;  %3032 = vmatprep.subr.bf16.mxu1 %v1188_v29  ;;  %v1243_v53 = vunpack.c.l.s8.bf16 %v491_v52  ;;  %v1250_v29 = vunpack.c.h.s8.bf16 %v490_v37 }
 0x30c   : > { %v2196_v56 = vpop.f32.mrb[0].mxu0  ;;  %v2540_v2 = vpop.f32.mrb[0].mxu1 }
 0x30d   : > { %3237 = vst [vmem:[%s4390_s26] sm:$0xff] %v2196_v56  ;;  %3239 = vst [vmem:[%s4390_s26 + $0x10] sm:$0xff] %v2540_v2  ;;  %v2198_v3 = vpop.f32.mrb[1].mxu0  ;;  %v2542_v57 = vpop.f32.mrb[1].mxu1  ;;  %v499_v56 = vld [vmem:[%s3825_s6 + $0x7f0] sm:$0xff]  ;;  %v1257_v2 = vunpack.c.l.s8.bf16 %v497_v55 }
 0x30e   : > { %3238 = vst [vmem:[%s4390_s26 + $0x8] sm:$0xff] %v2198_v3  ;;  %3240 = vst [vmem:[%s4390_s26 + $0x18] sm:$0xff] %v2542_v57  ;;  %v2200_v51 = vpop.f32.mrb[2].mxu0  ;;  %v2544_v59 = vpop.f32.mrb[2].mxu1  ;;  %2689 = vmatpush1.bf16.msra.mxu0 %v1185_v30  ;;  %3033 = vmatpush1.bf16.msra.mxu1 %v1187_v31  ;;  %v500_v30 = vld [vmem:[%s3825_s6 + $0x7f8] sm:$0xff]  ;;  %v1249_v31 = vunpack.c.h.s8.bf16 %v489_v47  ;;  %v1259_v3 = vunpack.c.l.s8.bf16 %v499_v56  ;;  %v1266_v57 = vunpack.c.h.s8.bf16 %v498_v48 }
 0x30f   : > { %3245 = vst [vmem:[%s4390_s26 + $0x40] sm:$0xff] %v2200_v51  ;;  %3247 = vst [vmem:[%s4390_s26 + $0x50] sm:$0xff] %v2544_v59  ;;  %v2202_v36 = vpop.f32.mrb[3].mxu0  ;;  %v2546_v62 = vpop.f32.mrb[3].mxu1  ;;  %2690 = vmatprep.subr.bf16.mxu0 %v1194_v26  ;;  %3034 = vmatprep.subr.bf16.mxu1 %v1196_v44  ;;  %v1251_v26 = vunpack.c.h.s8.bf16 %v491_v52  ;;  %v1258_v44 = vunpack.c.l.s8.bf16 %v498_v48  ;;  %v1260_v54 = vunpack.c.l.s8.bf16 %v500_v30  ;;  %v1268_v51 = vunpack.c.h.s8.bf16 %v500_v30  ;;  %v506_v59 = vld [vmem:[%s3825_s6 + $0x828] sm:$0xff] }
 0x310   : > { %3246 = vst [vmem:[%s4390_s26 + $0x48] sm:$0xff] %v2202_v36  ;;  %3248 = vst [vmem:[%s4390_s26 + $0x58] sm:$0xff] %v2546_v62  ;;  %v1267_v36 = vunpack.c.h.s8.bf16 %v499_v56  ;;  %v1274_v62 = vunpack.c.l.s8.bf16 %v506_v59 }
 0x312   : > { %2691 = vmatpush1.bf16.msra.mxu0 %v1193_v60  ;;  %3035 = vmatpush1.bf16.msra.mxu1 %v1195_v61  ;;  %v508_v60 = vld [vmem:[%s3825_s6 + $0x838] sm:$0xff]  ;;  %v1265_v61 = vunpack.c.h.s8.bf16 %v497_v55 }
 0x313   : > { %2692 = vmatprep.subr.bf16.mxu0 %v1202_v63  ;;  %3036 = vmatprep.subr.bf16.mxu1 %v1204_v0  ;;  %v1276_v63 = vunpack.c.l.s8.bf16 %v508_v60  ;;  %v505_v0 = vld [vmem:[%s3825_s6 + $0x820] sm:$0xff] }
 0x314   : > { %v1273_v5 = vunpack.c.l.s8.bf16 %v505_v0  ;;  %v1281_v10 = vunpack.c.h.s8.bf16 %v505_v0 }
 0x316   : > { %2693 = vmatpush1.bf16.msra.mxu0 %v1201_v6  ;;  %3037 = vmatpush1.bf16.msra.mxu1 %v1203_v20  ;;  %v1275_v6 = vunpack.c.l.s8.bf16 %v507_v4  ;;  %v1282_v20 = vunpack.c.h.s8.bf16 %v506_v59 }
 0x317   : > { %2694 = vmatprep.subr.bf16.mxu0 %v1210_v21  ;;  %3038 = vmatprep.subr.bf16.mxu1 %v1212_v7  ;;  %v1284_v21 = vunpack.c.h.s8.bf16 %v508_v60  ;;  %v514_v7 = vld [vmem:[%s3825_s6 + $0x868] sm:$0xff] }
 0x31a   : > { %2695 = vmatpush1.bf16.msra.mxu0 %v1209_v11  ;;  %3039 = vmatpush1.bf16.msra.mxu1 %v1211_v12  ;;  %v1283_v11 = vunpack.c.h.s8.bf16 %v507_v4  ;;  %v1290_v12 = vunpack.c.l.s8.bf16 %v514_v7 }
 0x31b   : > { %2696 = vmatprep.subr.bf16.mxu0 %v1218_v13  ;;  %3040 = vmatprep.subr.bf16.mxu1 %v1220_v14  ;;  %v1292_v13 = vunpack.c.l.s8.bf16 %v516_v9  ;;  %v513_v14 = vld [vmem:[%s3825_s6 + $0x860] sm:$0xff] }
 0x31c   : > { %v1289_v16 = vunpack.c.l.s8.bf16 %v513_v14  ;;  %v1297_v24 = vunpack.c.h.s8.bf16 %v513_v14 }
 0x31e   : > { %2697 = vmatpush1.bf16.msra.mxu0 %v1217_v17  ;;  %3041 = vmatpush1.bf16.msra.mxu1 %v1219_v18  ;;  %v1298_v17 = vunpack.c.h.s8.bf16 %v514_v7  ;;  %v1300_v18 = vunpack.c.h.s8.bf16 %v516_v9 }
 0x31f   : > { %2698 = vmatprep.subr.bf16.mxu0 %v1226_v22  ;;  %3042 = vmatprep.subr.bf16.mxu1 %v1228_v23  ;;  %v522_v22 = vld [vmem:[%s3825_s6 + $0x8a8] sm:$0xff]  ;;  %v524_v23 = vld [vmem:[%s3825_s6 + $0x8b8] sm:$0xff] }
 0x320   : > { %v1314_v38 = vunpack.c.h.s8.bf16 %v522_v22 }
 0x322   : > { %2699 = vmatpush1.bf16.msra.mxu0 %v1225_v1  ;;  %3043 = vmatpush1.bf16.msra.mxu1 %v1227_v46  ;;  %v1308_v1 = vunpack.c.l.s8.bf16 %v524_v23  ;;  %v521_v46 = vld [vmem:[%s3825_s6 + $0x8a0] sm:$0xff] }
 0x323   : > { %2700 = vmatprep.subr.bf16.mxu0 %v1234_v25  ;;  %3044 = vmatprep.subr.bf16.mxu1 %v1236_v27  ;;  %v523_v25 = vld [vmem:[%s3825_s6 + $0x8b0] sm:$0xff]  ;;  %v1305_v27 = vunpack.c.l.s8.bf16 %v521_v46 }
 0x324   : > { %v1307_v37 = vunpack.c.l.s8.bf16 %v523_v25  ;;  %v1315_v47 = vunpack.c.h.s8.bf16 %v523_v25 }
 0x326   : > { %2701 = vmatpush1.bf16.msra.mxu0 %v1233_v33  ;;  %3045 = vmatpush1.bf16.msra.mxu1 %v1235_v8  ;;  %v1316_v33 = vunpack.c.h.s8.bf16 %v524_v23  ;;  %v530_v8 = vld [vmem:[%s3825_s6 + $0x8e8] sm:$0xff] }
 0x327   : > { %2702 = vmatprep.subr.bf16.mxu0 %v1242_v34  ;;  %3046 = vmatprep.subr.bf16.mxu1 %v1244_v41  ;;  %v532_v34 = vld [vmem:[%s3825_s6 + $0x8f8] sm:$0xff]  ;;  %v1313_v41 = vunpack.c.h.s8.bf16 %v521_v46  ;;  %v1322_v52 = vunpack.c.l.s8.bf16 %v530_v8  ;;  %v1330_v30 = vunpack.c.h.s8.bf16 %v530_v8 }
 0x32a   : > { %2703 = vmatpush1.bf16.msra.mxu0 %v1241_v19  ;;  %3047 = vmatpush1.bf16.msra.mxu1 %v1243_v53  ;;  %v1324_v19 = vunpack.c.l.s8.bf16 %v532_v34  ;;  %v529_v53 = vld [vmem:[%s3825_s6 + $0x8e0] sm:$0xff] }
 0x32b   : > { %2704 = vmatprep.subr.bf16.mxu0 %v1250_v29  ;;  %3048 = vmatprep.subr.bf16.mxu1 %v1252_v35  ;;  %v531_v29 = vld [vmem:[%s3825_s6 + $0x8f0] sm:$0xff]  ;;  %v1321_v35 = vunpack.c.l.s8.bf16 %v529_v53 }
 0x32c   : > { %v1323_v48 = vunpack.c.l.s8.bf16 %v531_v29  ;;  %v1331_v55 = vunpack.c.h.s8.bf16 %v531_v29 }
 0x32e   : > { %2705 = vmatpush1.bf16.msra.mxu0 %v1249_v31  ;;  %3049 = vmatpush1.bf16.msra.mxu1 %v1251_v26  ;;  %v1332_v31 = vunpack.c.h.s8.bf16 %v532_v34  ;;  %v538_v26 = vld [vmem:[%s3825_s6 + $0x928] sm:$0xff] }
 0x32f   : > { %2706 = vmatprep.subr.bf16.mxu0 %v1258_v44  ;;  %3050 = vmatprep.subr.bf16.mxu1 %v1260_v54  ;;  %v540_v44 = vld [vmem:[%s3825_s6 + $0x938] sm:$0xff]  ;;  %v1329_v54 = vunpack.c.h.s8.bf16 %v529_v53  ;;  %v1338_v56 = vunpack.c.l.s8.bf16 %v538_v26  ;;  %v1346_v60 = vunpack.c.h.s8.bf16 %v538_v26 }
 0x332   : > { %2707 = vmatpush1.bf16.msra.mxu0 %v1257_v2  ;;  %3051 = vmatpush1.bf16.msra.mxu1 %v1259_v3  ;;  %v1340_v2 = vunpack.c.l.s8.bf16 %v540_v44  ;;  %v537_v3 = vld [vmem:[%s3825_s6 + $0x920] sm:$0xff] }
 0x333   : > { %2708 = vmatprep.subr.bf16.mxu0 %v1266_v57  ;;  %3052 = vmatprep.subr.bf16.mxu1 %v1268_v51  ;;  %v539_v57 = vld [vmem:[%s3825_s6 + $0x930] sm:$0xff]  ;;  %v1337_v51 = vunpack.c.l.s8.bf16 %v537_v3 }
 0x334   : > { %v1339_v59 = vunpack.c.l.s8.bf16 %v539_v57  ;;  %v1347_v0 = vunpack.c.h.s8.bf16 %v539_v57 }
 0x336   : > { %2709 = vmatpush1.bf16.msra.mxu0 %v1265_v61  ;;  %3053 = vmatpush1.bf16.msra.mxu1 %v1267_v36  ;;  %v1348_v61 = vunpack.c.h.s8.bf16 %v540_v44  ;;  %v546_v36 = vld [vmem:[%s3825_s6 + $0x968] sm:$0xff] }
 0x337   : > { %2721 = vmatprep.subr.bf16.mxu0 %v1274_v62  ;;  %3065 = vmatprep.subr.bf16.mxu1 %v1276_v63  ;;  %v548_v62 = vld [vmem:[%s3825_s6 + $0x978] sm:$0xff]  ;;  %v1345_v63 = vunpack.c.h.s8.bf16 %v537_v3  ;;  %v1354_v4 = vunpack.c.l.s8.bf16 %v546_v36  ;;  %v1362_v9 = vunpack.c.h.s8.bf16 %v546_v36 }
 0x339   : > { %2711 = vmatmul.mubr.bf16.vlgmr.msra.gmra.mrb[4].mxu0 %v4047_v50  ;;  %3055 = vmatmul.mubr.bf16.vlgmr.msra.gmra.mrb[4].mxu1 %v4047_v50  ;;  %v1291_v50 = vunpack.c.l.s8.bf16 %v515_v15 }
 0x33a   : > { %2722 = vmatpush1.bf16.msra.mxu0 %v1273_v5  ;;  %3066 = vmatpush1.bf16.msra.mxu1 %v1275_v6  ;;  %v1356_v5 = vunpack.c.l.s8.bf16 %v548_v62  ;;  %v545_v6 = vld [vmem:[%s3825_s6 + $0x960] sm:$0xff] }
 0x33b   : > { %2723 = vmatprep.subr.bf16.mxu0 %v1282_v20  ;;  %3067 = vmatprep.subr.bf16.mxu1 %v1284_v21  ;;  %v547_v20 = vld [vmem:[%s3825_s6 + $0x970] sm:$0xff]  ;;  %v1353_v21 = vunpack.c.l.s8.bf16 %v545_v6 }
 0x33c   : > { %2753 = vmatprep.mubr.bf16.mxu0 %v4063_v58  ;;  %3097 = vmatprep.mubr.bf16.mxu1 %v4063_v58  ;;  %v1306_v58 = vunpack.c.l.s8.bf16 %v522_v22  ;;  %v1355_v7 = vunpack.c.l.s8.bf16 %v547_v20  ;;  %v1363_v14 = vunpack.c.h.s8.bf16 %v547_v20  ;;  %v585_v20 = vld [vmem:[%s3825_s6 + $0xaa0] sm:$0xff] }
 0x33e   : > { %2724 = vmatpush1.bf16.msra.mxu0 %v1281_v10  ;;  %3068 = vmatpush1.bf16.msra.mxu1 %v1283_v11  ;;  %v1364_v10 = vunpack.c.h.s8.bf16 %v548_v62  ;;  %v554_v11 = vld [vmem:[%s3825_s6 + $0x9a8] sm:$0xff] }
 0x33f   : > { %2725 = vmatprep.subr.bf16.mxu0 %v1290_v12  ;;  %3069 = vmatprep.subr.bf16.mxu1 %v1292_v13  ;;  %v556_v12 = vld [vmem:[%s3825_s6 + $0x9b8] sm:$0xff]  ;;  %v1361_v13 = vunpack.c.h.s8.bf16 %v545_v6  ;;  %v1370_v15 = vunpack.c.l.s8.bf16 %v554_v11  ;;  %v1378_v23 = vunpack.c.h.s8.bf16 %v554_v11 }
 0x342   : > { %2726 = vmatpush1.bf16.msra.mxu0 %v1289_v16  ;;  %3070 = vmatpush1.bf16.msra.mxu1 %v1291_v50  ;;  %v1372_v16 = vunpack.c.l.s8.bf16 %v556_v12  ;;  %v553_v50 = vld [vmem:[%s3825_s6 + $0x9a0] sm:$0xff] }
 0x343   : > { %2727 = vmatprep.subr.bf16.mxu0 %v1298_v17  ;;  %3071 = vmatprep.subr.bf16.mxu1 %v1300_v18  ;;  %v555_v17 = vld [vmem:[%s3825_s6 + $0x9b0] sm:$0xff]  ;;  %v1369_v18 = vunpack.c.l.s8.bf16 %v553_v50 }
 0x344   : > { %v1371_v22 = vunpack.c.l.s8.bf16 %v555_v17  ;;  %v1379_v46 = vunpack.c.h.s8.bf16 %v555_v17  ;;  %v593_v17 = vld [vmem:[%s3825_s6 + $0xae0] sm:$0xff] }
 0x346   : > { %2728 = vmatpush1.bf16.msra.mxu0 %v1297_v24  ;;  %3072 = vmatpush1.bf16.msra.mxu1 %v1299_v45  ;;  %v1380_v24 = vunpack.c.h.s8.bf16 %v556_v12  ;;  %v562_v45 = vld [vmem:[%s3825_s6 + $0x9e8] sm:$0xff] }
 0x347   : > { %2729 = vmatprep.subr.bf16.mxu0 %v1306_v58  ;;  %3073 = vmatprep.subr.bf16.mxu1 %v1308_v1  ;;  %v564_v58 = vld [vmem:[%s3825_s6 + $0x9f8] sm:$0xff]  ;;  %v1377_v1 = vunpack.c.h.s8.bf16 %v553_v50  ;;  %v1386_v25 = vunpack.c.l.s8.bf16 %v562_v45  ;;  %v1394_v34 = vunpack.c.h.s8.bf16 %v562_v45  ;;  %v594_v12 = vld [vmem:[%s3825_s6 + $0xae8] sm:$0xff] }
 0x34a   : > { %2730 = vmatpush1.bf16.msra.mxu0 %v1305_v27  ;;  %3074 = vmatpush1.bf16.msra.mxu1 %v1307_v37  ;;  %v1388_v27 = vunpack.c.l.s8.bf16 %v564_v58  ;;  %v561_v37 = vld [vmem:[%s3825_s6 + $0x9e0] sm:$0xff] }
 0x34b   : > { %2731 = vmatprep.subr.bf16.mxu0 %v1314_v38  ;;  %3075 = vmatprep.subr.bf16.mxu1 %v1316_v33  ;;  %v563_v38 = vld [vmem:[%s3825_s6 + $0x9f0] sm:$0xff]  ;;  %v1385_v33 = vunpack.c.l.s8.bf16 %v561_v37 }
 0x34c   : > { %v1387_v8 = vunpack.c.l.s8.bf16 %v563_v38  ;;  %v1395_v53 = vunpack.c.h.s8.bf16 %v563_v38  ;;  %v601_v38 = vld [vmem:[%s3825_s6 + $0xb20] sm:$0xff] }
 0x34e   : > { %2732 = vmatpush1.bf16.msra.mxu0 %v1313_v41  ;;  %3076 = vmatpush1.bf16.msra.mxu1 %v1315_v47  ;;  %v1396_v41 = vunpack.c.h.s8.bf16 %v564_v58  ;;  %v570_v47 = vld [vmem:[%s3825_s6 + $0xa28] sm:$0xff] }
 0x34f   : > { %2733 = vmatprep.subr.bf16.mxu0 %v1322_v52  ;;  %3077 = vmatprep.subr.bf16.mxu1 %v1324_v19  ;;  %v572_v52 = vld [vmem:[%s3825_s6 + $0xa38] sm:$0xff]  ;;  %v1393_v19 = vunpack.c.h.s8.bf16 %v561_v37  ;;  %v1402_v29 = vunpack.c.l.s8.bf16 %v570_v47  ;;  %v1410_v44 = vunpack.c.h.s8.bf16 %v570_v47  ;;  %v602_v58 = vld [vmem:[%s3825_s6 + $0xb28] sm:$0xff] }
 0x352   : > { %2734 = vmatpush1.bf16.msra.mxu0 %v1321_v35  ;;  %3078 = vmatpush1.bf16.msra.mxu1 %v1323_v48  ;;  %v1404_v35 = vunpack.c.l.s8.bf16 %v572_v52  ;;  %v569_v48 = vld [vmem:[%s3825_s6 + $0xa20] sm:$0xff] }
 0x353   : > { %2735 = vmatprep.subr.bf16.mxu0 %v1330_v30  ;;  %3079 = vmatprep.subr.bf16.mxu1 %v1332_v31  ;;  %v571_v30 = vld [vmem:[%s3825_s6 + $0xa30] sm:$0xff]  ;;  %v1401_v31 = vunpack.c.l.s8.bf16 %v569_v48 }
 0x354   : > { %v1403_v26 = vunpack.c.l.s8.bf16 %v571_v30  ;;  %v1411_v3 = vunpack.c.h.s8.bf16 %v571_v30  ;;  %v609_v30 = vld [vmem:[%s3825_s6 + $0xb60] sm:$0xff] }
 0x356   : > { %2736 = vmatpush1.bf16.msra.mxu0 %v1329_v54  ;;  %3080 = vmatpush1.bf16.msra.mxu1 %v1331_v55  ;;  %v1412_v54 = vunpack.c.h.s8.bf16 %v572_v52  ;;  %v578_v55 = vld [vmem:[%s3825_s6 + $0xa68] sm:$0xff] }
 0x357   : > { %2737 = vmatprep.subr.bf16.mxu0 %v1338_v56  ;;  %3081 = vmatprep.subr.bf16.mxu1 %v1340_v2  ;;  %v580_v56 = vld [vmem:[%s3825_s6 + $0xa78] sm:$0xff]  ;;  %v1409_v2 = vunpack.c.h.s8.bf16 %v569_v48  ;;  %v1418_v57 = vunpack.c.l.s8.bf16 %v578_v55  ;;  %v1426_v36 = vunpack.c.h.s8.bf16 %v578_v55  ;;  %v610_v52 = vld [vmem:[%s3825_s6 + $0xb68] sm:$0xff] }
 0x358   : > { %v1428_v62 = vunpack.c.h.s8.bf16 %v580_v56 }
 0x35a   : > { %2738 = vmatpush1.bf16.msra.mxu0 %v1337_v51  ;;  %3082 = vmatpush1.bf16.msra.mxu1 %v1339_v59  ;;  %v1420_v51 = vunpack.c.l.s8.bf16 %v580_v56  ;;  %v577_v59 = vld [vmem:[%s3825_s6 + $0xa60] sm:$0xff]  ;;  %v618_v56 = vld [vmem:[%s3825_s6 + $0xba8] sm:$0xff] }
 0x35b   : > { %2739 = vmatprep.subr.bf16.mxu0 %v1346_v60  ;;  %3083 = vmatprep.subr.bf16.mxu1 %v1348_v61  ;;  %v579_v60 = vld [vmem:[%s3825_s6 + $0xa70] sm:$0xff]  ;;  %v1417_v61 = vunpack.c.l.s8.bf16 %v577_v59 }
 0x35e   : > { %2740 = vmatpush1.bf16.msra.mxu0 %v1345_v63  ;;  %3084 = vmatpush1.bf16.msra.mxu1 %v1347_v0  ;;  %v586_v63 = vld [vmem:[%s3825_s6 + $0xaa8] sm:$0xff]  ;;  %v588_v0 = vld [vmem:[%s3825_s6 + $0xab8] sm:$0xff] }
 0x35f   : > { %2741 = vmatprep.subr.bf16.mxu0 %v1354_v4  ;;  %3085 = vmatprep.subr.bf16.mxu1 %v1356_v5  ;;  %v1425_v4 = vunpack.c.h.s8.bf16 %v577_v59  ;;  %v1427_v5 = vunpack.c.h.s8.bf16 %v579_v60  ;;  %v1436_v6 = vunpack.c.l.s8.bf16 %v588_v0  ;;  %v1444_v11 = vunpack.c.h.s8.bf16 %v588_v0  ;;  %v626_v0 = vld [vmem:[%s3825_s6 + $0xbe8] sm:$0xff] }
 0x362   : > { %2742 = vmatpush1.bf16.msra.mxu0 %v1353_v21  ;;  %3086 = vmatpush1.bf16.msra.mxu1 %v1355_v7  ;;  %v587_v21 = vld [vmem:[%s3825_s6 + $0xab0] sm:$0xff]  ;;  %v1433_v7 = vunpack.c.l.s8.bf16 %v585_v20 }
 0x363   : > { %2743 = vmatprep.subr.bf16.mxu0 %v1362_v9  ;;  %3087 = vmatprep.subr.bf16.mxu1 %v1364_v10  ;;  %v1435_v9 = vunpack.c.l.s8.bf16 %v587_v21  ;;  %v1442_v10 = vunpack.c.h.s8.bf16 %v586_v63 }
 0x366   : > { %2744 = vmatpush1.bf16.msra.mxu0 %v1361_v13  ;;  %3088 = vmatpush1.bf16.msra.mxu1 %v1363_v14  ;;  %v596_v13 = vld [vmem:[%s3825_s6 + $0xaf8] sm:$0xff]  ;;  %v1441_v14 = vunpack.c.h.s8.bf16 %v585_v20 }
 0x367   : > { %2745 = vmatprep.subr.bf16.mxu0 %v1370_v15  ;;  %3089 = vmatprep.subr.bf16.mxu1 %v1372_v16  ;;  %v1443_v15 = vunpack.c.h.s8.bf16 %v587_v21  ;;  %v1450_v16 = vunpack.c.l.s8.bf16 %v594_v12  ;;  %v1452_v50 = vunpack.c.l.s8.bf16 %v596_v13  ;;  %v1460_v45 = vunpack.c.h.s8.bf16 %v596_v13  ;;  %v625_v21 = vld [vmem:[%s3825_s6 + $0xbe0] sm:$0xff]  ;;  %v634_v13 = vld [vmem:[%s3825_s6 + $0xc28] sm:$0xff] }
 0x36a   : > { %2746 = vmatpush1.bf16.msra.mxu0 %v1369_v18  ;;  %3090 = vmatpush1.bf16.msra.mxu1 %v1371_v22  ;;  %v595_v18 = vld [vmem:[%s3825_s6 + $0xaf0] sm:$0xff]  ;;  %v1449_v22 = vunpack.c.l.s8.bf16 %v593_v17 }
 0x36b   : > { %2747 = vmatprep.subr.bf16.mxu0 %v1378_v23  ;;  %3091 = vmatprep.subr.bf16.mxu1 %v1380_v24  ;;  %v1451_v23 = vunpack.c.l.s8.bf16 %v595_v18  ;;  %v1458_v24 = vunpack.c.h.s8.bf16 %v594_v12 }
 0x36e   : > { %2748 = vmatpush1.bf16.msra.mxu0 %v1377_v1  ;;  %3092 = vmatpush1.bf16.msra.mxu1 %v1379_v46  ;;  %v604_v1 = vld [vmem:[%s3825_s6 + $0xb38] sm:$0xff]  ;;  %v1457_v46 = vunpack.c.h.s8.bf16 %v593_v17 }
 0x36f   : > { %2749 = vmatprep.subr.bf16.mxu0 %v1386_v25  ;;  %3093 = vmatprep.subr.bf16.mxu1 %v1388_v27  ;;  %v1459_v25 = vunpack.c.h.s8.bf16 %v595_v18  ;;  %v1466_v27 = vunpack.c.l.s8.bf16 %v602_v58  ;;  %v1468_v37 = vunpack.c.l.s8.bf16 %v604_v1  ;;  %v1476_v47 = vunpack.c.h.s8.bf16 %v604_v1  ;;  %v633_v18 = vld [vmem:[%s3825_s6 + $0xc20] sm:$0xff]  ;;  %v642_v1 = vld [vmem:[%s3825_s6 + $0xc68] sm:$0xff] }
 0x372   : > { %2750 = vmatpush1.bf16.msra.mxu0 %v1385_v33  ;;  %3094 = vmatpush1.bf16.msra.mxu1 %v1387_v8  ;;  %v603_v33 = vld [vmem:[%s3825_s6 + $0xb30] sm:$0xff]  ;;  %v1465_v8 = vunpack.c.l.s8.bf16 %v601_v38 }
 0x373   : > { %2751 = vmatprep.subr.bf16.mxu0 %v1394_v34  ;;  %3095 = vmatprep.subr.bf16.mxu1 %v1396_v41  ;;  %v1467_v34 = vunpack.c.l.s8.bf16 %v603_v33  ;;  %v1474_v41 = vunpack.c.h.s8.bf16 %v602_v58 }
 0x376   : > { %2752 = vmatpush1.bf16.msra.mxu0 %v1393_v19  ;;  %3096 = vmatpush1.bf16.msra.mxu1 %v1395_v53  ;;  %v612_v19 = vld [vmem:[%s3825_s6 + $0xb78] sm:$0xff]  ;;  %v1473_v53 = vunpack.c.h.s8.bf16 %v601_v38 }
 0x377   : > { %2764 = vmatprep.subr.bf16.mxu0 %v1402_v29  ;;  %3108 = vmatprep.subr.bf16.mxu1 %v1404_v35  ;;  %v1475_v29 = vunpack.c.h.s8.bf16 %v603_v33  ;;  %v1482_v35 = vunpack.c.l.s8.bf16 %v610_v52  ;;  %v1484_v48 = vunpack.c.l.s8.bf16 %v612_v19  ;;  %v1492_v55 = vunpack.c.h.s8.bf16 %v612_v19  ;;  %v641_v33 = vld [vmem:[%s3825_s6 + $0xc60] sm:$0xff]  ;;  %v652_v19 = vld [vmem:[%s3825_s6 + $0xcb8] sm:$0xff] }
 0x379   : > { %2754 = vmatmul.mubr.bf16.vlgmr.msra.gmra.mrb[4].mxu0 %v4101_v39  ;;  %3098 = vmatmul.mubr.bf16.vlgmr.msra.gmra.mrb[4].mxu1 %v4101_v39  ;;  %v1419_v39 = vunpack.c.l.s8.bf16 %v579_v60  ;;  %v617_v60 = vld [vmem:[%s3825_s6 + $0xba0] sm:$0xff] }
 0x37a   : > { %2765 = vmatpush1.bf16.msra.mxu0 %v1401_v31  ;;  %3109 = vmatpush1.bf16.msra.mxu1 %v1403_v26  ;;  %v611_v31 = vld [vmem:[%s3825_s6 + $0xb70] sm:$0xff]  ;;  %v1481_v26 = vunpack.c.l.s8.bf16 %v609_v30 }
 0x37b   : > { %2766 = vmatprep.subr.bf16.mxu0 %v1410_v44  ;;  %3110 = vmatprep.subr.bf16.mxu1 %v1412_v54  ;;  %v1483_v44 = vunpack.c.l.s8.bf16 %v611_v31  ;;  %v1490_v54 = vunpack.c.h.s8.bf16 %v610_v52  ;;  %v650_v52 = vld [vmem:[%s3825_s6 + $0xca8] sm:$0xff] }
 0x37c   : > { %2796 = vmatprep.mubr.bf16.mxu0 %v4117_v49  ;;  %3140 = vmatprep.mubr.bf16.mxu1 %v4117_v49  ;;  %v1434_v49 = vunpack.c.l.s8.bf16 %v586_v63 }
 0x37e   : > { %2767 = vmatpush1.bf16.msra.mxu0 %v1409_v2  ;;  %3111 = vmatpush1.bf16.msra.mxu1 %v1411_v3  ;;  %v620_v2 = vld [vmem:[%s3825_s6 + $0xbb8] sm:$0xff]  ;;  %v1489_v3 = vunpack.c.h.s8.bf16 %v609_v30  ;;  %v651_v30 = vld [vmem:[%s3825_s6 + $0xcb0] sm:$0xff] }
 0x37f   : > { %2768 = vmatprep.subr.bf16.mxu0 %v1418_v57  ;;  %3112 = vmatprep.subr.bf16.mxu1 %v1420_v51  ;;  %v1491_v57 = vunpack.c.h.s8.bf16 %v611_v31  ;;  %v1498_v51 = vunpack.c.l.s8.bf16 %v618_v56  ;;  %v1500_v59 = vunpack.c.l.s8.bf16 %v620_v2  ;;  %v1508_v63 = vunpack.c.h.s8.bf16 %v620_v2 }
 0x382   : > { %2769 = vmatpush1.bf16.msra.mxu0 %v1417_v61  ;;  %3113 = vmatpush1.bf16.msra.mxu1 %v1419_v39  ;;  %v619_v61 = vld [vmem:[%s3825_s6 + $0xbb0] sm:$0xff]  ;;  %v1497_v39 = vunpack.c.l.s8.bf16 %v617_v60 }
 0x383   : > { %2770 = vmatprep.subr.bf16.mxu0 %v1426_v36  ;;  %3114 = vmatprep.subr.bf16.mxu1 %v1428_v62  ;;  %v1499_v36 = vunpack.c.l.s8.bf16 %v619_v61  ;;  %v1506_v62 = vunpack.c.h.s8.bf16 %v618_v56  ;;  %v660_v56 = vld [vmem:[%s3825_s6 + $0xcf8] sm:$0xff] }
 0x386   : > { %2771 = vmatpush1.bf16.msra.mxu0 %v1425_v4  ;;  %3115 = vmatpush1.bf16.msra.mxu1 %v1427_v5  ;;  %v628_v4 = vld [vmem:[%s3825_s6 + $0xbf8] sm:$0xff]  ;;  %v1505_v5 = vunpack.c.h.s8.bf16 %v617_v60  ;;  %v659_v60 = vld [vmem:[%s3825_s6 + $0xcf0] sm:$0xff] }
 0x387   : > { %2772 = vmatprep.subr.bf16.mxu0 %v1434_v49  ;;  %3116 = vmatprep.subr.bf16.mxu1 %v1436_v6  ;;  %v1507_v49 = vunpack.c.h.s8.bf16 %v619_v61  ;;  %v1514_v6 = vunpack.c.l.s8.bf16 %v626_v0  ;;  %v1516_v20 = vunpack.c.l.s8.bf16 %v628_v4  ;;  %v1524_v12 = vunpack.c.h.s8.bf16 %v628_v4 }
 0x38a   : > { %2773 = vmatpush1.bf16.msra.mxu0 %v1433_v7  ;;  %3117 = vmatpush1.bf16.msra.mxu1 %v1435_v9  ;;  %v627_v7 = vld [vmem:[%s3825_s6 + $0xbf0] sm:$0xff]  ;;  %v1513_v9 = vunpack.c.l.s8.bf16 %v625_v21 }
 0x38b   : > { %2774 = vmatprep.subr.bf16.mxu0 %v1442_v10  ;;  %3118 = vmatprep.subr.bf16.mxu1 %v1444_v11  ;;  %v1515_v10 = vunpack.c.l.s8.bf16 %v627_v7  ;;  %v1522_v11 = vunpack.c.h.s8.bf16 %v626_v0  ;;  %v668_v0 = vld [vmem:[%s3825_s6 + $0xd38] sm:$0xff] }
 0x38e   : > { %2775 = vmatpush1.bf16.msra.mxu0 %v1441_v14  ;;  %3119 = vmatpush1.bf16.msra.mxu1 %v1443_v15  ;;  %v636_v14 = vld [vmem:[%s3825_s6 + $0xc38] sm:$0xff]  ;;  %v1521_v15 = vunpack.c.h.s8.bf16 %v625_v21  ;;  %v667_v21 = vld [vmem:[%s3825_s6 + $0xd30] sm:$0xff] }
 0x38f   : > { %2776 = vmatprep.subr.bf16.mxu0 %v1450_v16  ;;  %3120 = vmatprep.subr.bf16.mxu1 %v1452_v50  ;;  %v1523_v16 = vunpack.c.h.s8.bf16 %v627_v7  ;;  %v1530_v50 = vunpack.c.l.s8.bf16 %v634_v13  ;;  %v1532_v17 = vunpack.c.l.s8.bf16 %v636_v14  ;;  %v1540_v58 = vunpack.c.h.s8.bf16 %v636_v14 }
 0x392   : > { %2777 = vmatpush1.bf16.msra.mxu0 %v1449_v22  ;;  %3121 = vmatpush1.bf16.msra.mxu1 %v1451_v23  ;;  %v635_v22 = vld [vmem:[%s3825_s6 + $0xc30] sm:$0xff]  ;;  %v1529_v23 = vunpack.c.l.s8.bf16 %v633_v18 }
 0x393   : > { %2778 = vmatprep.subr.bf16.mxu0 %v1458_v24  ;;  %3122 = vmatprep.subr.bf16.mxu1 %v1460_v45  ;;  %v1531_v24 = vunpack.c.l.s8.bf16 %v635_v22  ;;  %v1538_v45 = vunpack.c.h.s8.bf16 %v634_v13  ;;  %v676_v13 = vld [vmem:[%s3825_s6 + $0xd78] sm:$0xff] }
 0x396   : > { %2779 = vmatpush1.bf16.msra.mxu0 %v1457_v46  ;;  %3123 = vmatpush1.bf16.msra.mxu1 %v1459_v25  ;;  %v644_v46 = vld [vmem:[%s3825_s6 + $0xc78] sm:$0xff]  ;;  %v1537_v25 = vunpack.c.h.s8.bf16 %v633_v18  ;;  %v675_v18 = vld [vmem:[%s3825_s6 + $0xd70] sm:$0xff] }
 0x397   : > { %2780 = vmatprep.subr.bf16.mxu0 %v1466_v27  ;;  %3124 = vmatprep.subr.bf16.mxu1 %v1468_v37  ;;  %v1539_v27 = vunpack.c.h.s8.bf16 %v635_v22  ;;  %v1546_v37 = vunpack.c.l.s8.bf16 %v642_v1  ;;  %v1548_v38 = vunpack.c.l.s8.bf16 %v644_v46 }
 0x39a   : > { %2781 = vmatpush1.bf16.msra.mxu0 %v1465_v8  ;;  %3125 = vmatpush1.bf16.msra.mxu1 %v1467_v34  ;;  %v643_v8 = vld [vmem:[%s3825_s6 + $0xc70] sm:$0xff]  ;;  %v1545_v34 = vunpack.c.l.s8.bf16 %v641_v33 }
 0x39b   : > { %2782 = vmatprep.subr.bf16.mxu0 %v1474_v41  ;;  %3126 = vmatprep.subr.bf16.mxu1 %v1476_v47  ;;  %v1554_v41 = vunpack.c.h.s8.bf16 %v642_v1  ;;  %v1556_v47 = vunpack.c.h.s8.bf16 %v644_v46  ;;  %v684_v1 = vld [vmem:[%s3825_s6 + $0xdb8] sm:$0xff] }
 0x39e   : > { %2783 = vmatpush1.bf16.msra.mxu0 %v1473_v53  ;;  %3127 = vmatpush1.bf16.msra.mxu1 %v1475_v29  ;;  %v1553_v53 = vunpack.c.h.s8.bf16 %v641_v33  ;;  %v1555_v29 = vunpack.c.h.s8.bf16 %v643_v8  ;;  %v683_v33 = vld [vmem:[%s3825_s6 + $0xdb0] sm:$0xff] }
 0x39f   : > { %2784 = vmatprep.subr.bf16.mxu0 %v1482_v35  ;;  %3128 = vmatprep.subr.bf16.mxu1 %v1484_v48  ;;  %v1564_v35 = vunpack.c.l.s8.bf16 %v652_v19  ;;  %v649_v48 = vld [vmem:[%s3825_s6 + $0xca0] sm:$0xff] }
 0x3a0   : > { %v1561_v31 = vunpack.c.l.s8.bf16 %v649_v48  ;;  %v1569_v2 = vunpack.c.h.s8.bf16 %v649_v48  ;;  %v691_v48 = vld [vmem:[%s3825_s6 + $0xdf0] sm:$0xff] }
 0x3a2   : > { %2785 = vmatpush1.bf16.msra.mxu0 %v1481_v26  ;;  %3129 = vmatpush1.bf16.msra.mxu1 %v1483_v44  ;;  %v1563_v26 = vunpack.c.l.s8.bf16 %v651_v30  ;;  %v1570_v44 = vunpack.c.h.s8.bf16 %v650_v52 }
 0x3a3   : > { %2786 = vmatprep.subr.bf16.mxu0 %v1490_v54  ;;  %3130 = vmatprep.subr.bf16.mxu1 %v1492_v55  ;;  %v1572_v54 = vunpack.c.h.s8.bf16 %v652_v19  ;;  %v658_v55 = vld [vmem:[%s3825_s6 + $0xce8] sm:$0xff] }
 0x3a6   : > { %2787 = vmatpush1.bf16.msra.mxu0 %v1489_v3  ;;  %3131 = vmatpush1.bf16.msra.mxu1 %v1491_v57  ;;  %v1571_v3 = vunpack.c.h.s8.bf16 %v651_v30  ;;  %v1578_v57 = vunpack.c.l.s8.bf16 %v658_v55 }
 0x3a7   : > { %2788 = vmatprep.subr.bf16.mxu0 %v1498_v51  ;;  %3132 = vmatprep.subr.bf16.mxu1 %v1500_v59  ;;  %v1580_v51 = vunpack.c.l.s8.bf16 %v660_v56  ;;  %v657_v59 = vld [vmem:[%s3825_s6 + $0xce0] sm:$0xff] }
 0x3a8   : > { %v1577_v61 = vunpack.c.l.s8.bf16 %v657_v59  ;;  %v1585_v4 = vunpack.c.h.s8.bf16 %v657_v59  ;;  %v699_v59 = vld [vmem:[%s3825_s6 + $0xe30] sm:$0xff] }
 0x3aa   : > { %2789 = vmatpush1.bf16.msra.mxu0 %v1497_v39  ;;  %3133 = vmatpush1.bf16.msra.mxu1 %v1499_v36  ;;  %v1579_v39 = vunpack.c.l.s8.bf16 %v659_v60  ;;  %v1586_v36 = vunpack.c.h.s8.bf16 %v658_v55  ;;  %v700_v55 = vld [vmem:[%s3825_s6 + $0xe38] sm:$0xff] }
 0x3ab   : > { %2790 = vmatprep.subr.bf16.mxu0 %v1506_v62  ;;  %3134 = vmatprep.subr.bf16.mxu1 %v1508_v63  ;;  %v1588_v62 = vunpack.c.h.s8.bf16 %v660_v56  ;;  %v666_v63 = vld [vmem:[%s3825_s6 + $0xd28] sm:$0xff] }
 0x3ae   : > { %2791 = vmatpush1.bf16.msra.mxu0 %v1505_v5  ;;  %3135 = vmatpush1.bf16.msra.mxu1 %v1507_v49  ;;  %v1587_v5 = vunpack.c.h.s8.bf16 %v659_v60  ;;  %v1594_v49 = vunpack.c.l.s8.bf16 %v666_v63 }
 0x3af   : > { %2792 = vmatprep.subr.bf16.mxu0 %v1514_v6  ;;  %3136 = vmatprep.subr.bf16.mxu1 %v1516_v20  ;;  %v1596_v6 = vunpack.c.l.s8.bf16 %v668_v0  ;;  %v665_v20 = vld [vmem:[%s3825_s6 + $0xd20] sm:$0xff] }
 0x3b0   : > { %v1593_v7 = vunpack.c.l.s8.bf16 %v665_v20  ;;  %v1601_v14 = vunpack.c.h.s8.bf16 %v665_v20  ;;  %v707_v20 = vld [vmem:[%s3825_s6 + $0xe70] sm:$0xff] }
 0x3b2   : > { %2793 = vmatpush1.bf16.msra.mxu0 %v1513_v9  ;;  %3137 = vmatpush1.bf16.msra.mxu1 %v1515_v10  ;;  %v1595_v9 = vunpack.c.l.s8.bf16 %v667_v21  ;;  %v1602_v10 = vunpack.c.h.s8.bf16 %v666_v63  ;;  %v708_v63 = vld [vmem:[%s3825_s6 + $0xe78] sm:$0xff] }
 0x3b3   : > { %2794 = vmatprep.subr.bf16.mxu0 %v1522_v11  ;;  %3138 = vmatprep.subr.bf16.mxu1 %v1524_v12  ;;  %v1604_v11 = vunpack.c.h.s8.bf16 %v668_v0  ;;  %v674_v12 = vld [vmem:[%s3825_s6 + $0xd68] sm:$0xff] }
 0x3b6   : > { %2795 = vmatpush1.bf16.msra.mxu0 %v1521_v15  ;;  %3139 = vmatpush1.bf16.msra.mxu1 %v1523_v16  ;;  %v1603_v15 = vunpack.c.h.s8.bf16 %v667_v21  ;;  %v1610_v16 = vunpack.c.l.s8.bf16 %v674_v12 }
 0x3b7   : > { %2807 = vmatprep.subr.bf16.mxu0 %v1530_v50  ;;  %3151 = vmatprep.subr.bf16.mxu1 %v1532_v17  ;;  %v1612_v50 = vunpack.c.l.s8.bf16 %v676_v13  ;;  %v673_v17 = vld [vmem:[%s3825_s6 + $0xd60] sm:$0xff] }
 0x3b8   : > { %v1609_v22 = vunpack.c.l.s8.bf16 %v673_v17  ;;  %v1617_v46 = vunpack.c.h.s8.bf16 %v673_v17 }
 0x3b9   : > { %2797 = vmatmul.mubr.bf16.vlgmr.msra.gmra.mrb[4].mxu0 %v4155_v32  ;;  %3141 = vmatmul.mubr.bf16.vlgmr.msra.gmra.mrb[4].mxu1 %v4155_v32  ;;  %v1547_v32 = vunpack.c.l.s8.bf16 %v643_v8 }
 0x3ba   : > { %2808 = vmatpush1.bf16.msra.mxu0 %v1529_v23  ;;  %3152 = vmatpush1.bf16.msra.mxu1 %v1531_v24  ;;  %v1611_v23 = vunpack.c.l.s8.bf16 %v675_v18  ;;  %v1618_v24 = vunpack.c.h.s8.bf16 %v674_v12 }
 0x3bb   : > { %2809 = vmatprep.subr.bf16.mxu0 %v1538_v45  ;;  %3153 = vmatprep.subr.bf16.mxu1 %v1540_v58  ;;  %v1620_v45 = vunpack.c.h.s8.bf16 %v676_v13  ;;  %v682_v58 = vld [vmem:[%s3825_s6 + $0xda8] sm:$0xff]  ;;  %v1683_v13 = vunpack.c.h.s8.bf16 %v707_v20 }
 0x3bc   : > { %2839 = vmatprep.mubr.bf16.mxu0 %v4171_v43  ;;  %3183 = vmatprep.mubr.bf16.mxu1 %v4171_v43  ;;  %v1562_v43 = vunpack.c.l.s8.bf16 %v650_v52  ;;  %v692_v52 = vld [vmem:[%s3825_s6 + $0xdf8] sm:$0xff] }
 0x3be   : > { %2810 = vmatpush1.bf16.msra.mxu0 %v1537_v25  ;;  %3154 = vmatpush1.bf16.msra.mxu1 %v1539_v27  ;;  %v1619_v25 = vunpack.c.h.s8.bf16 %v675_v18  ;;  %v1626_v27 = vunpack.c.l.s8.bf16 %v682_v58 }
 0x3bf   : > { %2811 = vmatprep.subr.bf16.mxu0 %v1546_v37  ;;  %3155 = vmatprep.subr.bf16.mxu1 %v1548_v38  ;;  %v1628_v37 = vunpack.c.l.s8.bf16 %v684_v1  ;;  %v681_v38 = vld [vmem:[%s3825_s6 + $0xda0] sm:$0xff] }
 0x3c0   : > { %v1625_v8 = vunpack.c.l.s8.bf16 %v681_v38  ;;  %v1633_v19 = vunpack.c.h.s8.bf16 %v681_v38 }
 0x3c2   : > { %2812 = vmatpush1.bf16.msra.mxu0 %v1545_v34  ;;  %3156 = vmatpush1.bf16.msra.mxu1 %v1547_v32  ;;  %v1627_v34 = vunpack.c.l.s8.bf16 %v683_v33  ;;  %v1634_v32 = vunpack.c.h.s8.bf16 %v682_v58 }
 0x3c3   : > { %2813 = vmatprep.subr.bf16.mxu0 %v1554_v41  ;;  %3157 = vmatprep.subr.bf16.mxu1 %v1556_v47  ;;  %v1636_v41 = vunpack.c.h.s8.bf16 %v684_v1  ;;  %v690_v47 = vld [vmem:[%s3825_s6 + $0xde8] sm:$0xff] }
 0x3c6   : > { %2814 = vmatpush1.bf16.msra.mxu0 %v1553_v53  ;;  %3158 = vmatpush1.bf16.msra.mxu1 %v1555_v29  ;;  %v1635_v53 = vunpack.c.h.s8.bf16 %v683_v33  ;;  %v1642_v29 = vunpack.c.l.s8.bf16 %v690_v47 }
 0x3c7   : > { %2815 = vmatprep.subr.bf16.mxu0 %v1562_v43  ;;  %3159 = vmatprep.subr.bf16.mxu1 %v1564_v35  ;;  %v1644_v43 = vunpack.c.l.s8.bf16 %v692_v52  ;;  %v689_v35 = vld [vmem:[%s3825_s6 + $0xde0] sm:$0xff] }
 0x3c8   : > { %v1641_v30 = vunpack.c.l.s8.bf16 %v689_v35  ;;  %v1649_v56 = vunpack.c.h.s8.bf16 %v689_v35 }
 0x3ca   : > { %2816 = vmatpush1.bf16.msra.mxu0 %v1561_v31  ;;  %3160 = vmatpush1.bf16.msra.mxu1 %v1563_v26  ;;  %v1643_v31 = vunpack.c.l.s8.bf16 %v691_v48  ;;  %v1650_v26 = vunpack.c.h.s8.bf16 %v690_v47 }
 0x3cb   : > { %2817 = vmatprep.subr.bf16.mxu0 %v1570_v44  ;;  %3161 = vmatprep.subr.bf16.mxu1 %v1572_v54  ;;  %v1652_v44 = vunpack.c.h.s8.bf16 %v692_v52  ;;  %v698_v54 = vld [vmem:[%s3825_s6 + $0xe28] sm:$0xff] }
 0x3ce   : > { %2818 = vmatpush1.bf16.msra.mxu0 %v1569_v2  ;;  %3162 = vmatpush1.bf16.msra.mxu1 %v1571_v3  ;;  %v1651_v2 = vunpack.c.h.s8.bf16 %v691_v48  ;;  %v1658_v3 = vunpack.c.l.s8.bf16 %v698_v54 }
 0x3cf   : > { %2819 = vmatprep.subr.bf16.mxu0 %v1578_v57  ;;  %3163 = vmatprep.subr.bf16.mxu1 %v1580_v51  ;;  %v1660_v57 = vunpack.c.l.s8.bf16 %v700_v55  ;;  %v697_v51 = vld [vmem:[%s3825_s6 + $0xe20] sm:$0xff] }
 0x3d0   : > { %v1657_v60 = vunpack.c.l.s8.bf16 %v697_v51  ;;  %v1665_v0 = vunpack.c.h.s8.bf16 %v697_v51 }
 0x3d2   : > { %2820 = vmatpush1.bf16.msra.mxu0 %v1577_v61  ;;  %3164 = vmatpush1.bf16.msra.mxu1 %v1579_v39  ;;  %v1659_v61 = vunpack.c.l.s8.bf16 %v699_v59  ;;  %v1666_v39 = vunpack.c.h.s8.bf16 %v698_v54 }
 0x3d3   : > { %2821 = vmatprep.subr.bf16.mxu0 %v1586_v36  ;;  %3165 = vmatprep.subr.bf16.mxu1 %v1588_v62  ;;  %v1668_v36 = vunpack.c.h.s8.bf16 %v700_v55  ;;  %v706_v62 = vld [vmem:[%s3825_s6 + $0xe68] sm:$0xff] }
 0x3d6   : > { %2822 = vmatpush1.bf16.msra.mxu0 %v1585_v4  ;;  %3166 = vmatpush1.bf16.msra.mxu1 %v1587_v5  ;;  %v1667_v4 = vunpack.c.h.s8.bf16 %v699_v59  ;;  %v1674_v5 = vunpack.c.l.s8.bf16 %v706_v62 }
 0x3d7   : > { %2823 = vmatprep.subr.bf16.mxu0 %v1594_v49  ;;  %3167 = vmatprep.subr.bf16.mxu1 %v1596_v6  ;;  %v1676_v49 = vunpack.c.l.s8.bf16 %v708_v63  ;;  %v705_v6 = vld [vmem:[%s3825_s6 + $0xe60] sm:$0xff] }
 0x3d8   : > { %v1673_v21 = vunpack.c.l.s8.bf16 %v705_v6  ;;  %v1681_v12 = vunpack.c.h.s8.bf16 %v705_v6 }
 0x3da   : > { %2824 = vmatpush1.bf16.msra.mxu0 %v1593_v7  ;;  %3168 = vmatpush1.bf16.msra.mxu1 %v1595_v9  ;;  %v1682_v7 = vunpack.c.h.s8.bf16 %v706_v62  ;;  %v1684_v9 = vunpack.c.h.s8.bf16 %v708_v63 }
 0x3db   : > { %2825 = vmatprep.subr.bf16.mxu0 %v1602_v10  ;;  %3169 = vmatprep.subr.bf16.mxu1 %v1604_v11  ;;  %v714_v10 = vld [vmem:[%s3825_s6 + $0xea8] sm:$0xff]  ;;  %v716_v11 = vld [vmem:[%s3825_s6 + $0xeb8] sm:$0xff] }
 0x3dc   : > { %v1698_v18 = vunpack.c.h.s8.bf16 %v714_v10 }
 0x3de   : > { %2826 = vmatpush1.bf16.msra.mxu0 %v1601_v14  ;;  %3170 = vmatpush1.bf16.msra.mxu1 %v1603_v15  ;;  %v1692_v14 = vunpack.c.l.s8.bf16 %v716_v11  ;;  %v713_v15 = vld [vmem:[%s3825_s6 + $0xea0] sm:$0xff] }
 0x3df   : > { %2827 = vmatprep.subr.bf16.mxu0 %v1610_v16  ;;  %3171 = vmatprep.subr.bf16.mxu1 %v1612_v50  ;;  %v715_v16 = vld [vmem:[%s3825_s6 + $0xeb0] sm:$0xff]  ;;  %v1689_v50 = vunpack.c.l.s8.bf16 %v713_v15 }
 0x3e0   : > { %v1691_v17 = vunpack.c.l.s8.bf16 %v715_v16  ;;  %v1699_v58 = vunpack.c.h.s8.bf16 %v715_v16 }
 0x3e2   : > { %2828 = vmatpush1.bf16.msra.mxu0 %v1609_v22  ;;  %3172 = vmatpush1.bf16.msra.mxu1 %v1611_v23  ;;  %v1700_v22 = vunpack.c.h.s8.bf16 %v716_v11  ;;  %v722_v23 = vld [vmem:[%s3825_s6 + $0xee8] sm:$0xff] }
 0x3e3   : > { %2829 = vmatprep.subr.bf16.mxu0 %v1618_v24  ;;  %3173 = vmatprep.subr.bf16.mxu1 %v1620_v45  ;;  %v724_v24 = vld [vmem:[%s3825_s6 + $0xef8] sm:$0xff]  ;;  %v1697_v45 = vunpack.c.h.s8.bf16 %v713_v15  ;;  %v1706_v1 = vunpack.c.l.s8.bf16 %v722_v23  ;;  %v1714_v33 = vunpack.c.h.s8.bf16 %v722_v23 }
 0x3e6   : > { %2830 = vmatpush1.bf16.msra.mxu0 %v1617_v46  ;;  %3174 = vmatpush1.bf16.msra.mxu1 %v1619_v25  ;;  %v1708_v46 = vunpack.c.l.s8.bf16 %v724_v24  ;;  %v721_v25 = vld [vmem:[%s3825_s6 + $0xee0] sm:$0xff] }
 0x3e7   : > { %2831 = vmatprep.subr.bf16.mxu0 %v1626_v27  ;;  %3175 = vmatprep.subr.bf16.mxu1 %v1628_v37  ;;  %v723_v27 = vld [vmem:[%s3825_s6 + $0xef0] sm:$0xff]  ;;  %v1705_v37 = vunpack.c.l.s8.bf16 %v721_v25 }
 0x3e8   : > { %v1707_v38 = vunpack.c.l.s8.bf16 %v723_v27  ;;  %v1715_v47 = vunpack.c.h.s8.bf16 %v723_v27  ;;  %v3280_v27 = vld [vmem:[%s4390_s26 + $0x8] sm:$0xff] (%p4618_p8) }
 0x3e9   : > { %3281 = vst [vmem:[%s3265_s5 + $0x8] sm:$0xff] (%p4618_p8), %v3280_v27 }
 0x3ea   : > { %2832 = vmatpush1.bf16.msra.mxu0 %v1625_v8  ;;  %3176 = vmatpush1.bf16.msra.mxu1 %v1627_v34  ;;  %v1716_v8 = vunpack.c.h.s8.bf16 %v724_v24  ;;  %v730_v34 = vld [vmem:[%s3825_s6 + $0xf28] sm:$0xff] }
 0x3eb   : > { %2833 = vmatprep.subr.bf16.mxu0 %v1634_v32  ;;  %3177 = vmatprep.subr.bf16.mxu1 %v1636_v41  ;;  %v732_v32 = vld [vmem:[%s3825_s6 + $0xf38] sm:$0xff]  ;;  %v1713_v41 = vunpack.c.h.s8.bf16 %v721_v25  ;;  %v1722_v52 = vunpack.c.l.s8.bf16 %v730_v34  ;;  %v1730_v48 = vunpack.c.h.s8.bf16 %v730_v34 }
 0x3ee   : > { %2834 = vmatpush1.bf16.msra.mxu0 %v1633_v19  ;;  %3178 = vmatpush1.bf16.msra.mxu1 %v1635_v53  ;;  %v1724_v19 = vunpack.c.l.s8.bf16 %v732_v32  ;;  %v729_v53 = vld [vmem:[%s3825_s6 + $0xf20] sm:$0xff] }
 0x3ef   : > { %2835 = vmatprep.subr.bf16.mxu0 %v1642_v29  ;;  %3179 = vmatprep.subr.bf16.mxu1 %v1644_v43  ;;  %v731_v29 = vld [vmem:[%s3825_s6 + $0xf30] sm:$0xff]  ;;  %v1721_v43 = vunpack.c.l.s8.bf16 %v729_v53 }
 0x3f0   : > { %v1723_v35 = vunpack.c.l.s8.bf16 %v731_v29  ;;  %v1731_v54 = vunpack.c.h.s8.bf16 %v731_v29 }
 0x3f2   : > { %2836 = vmatpush1.bf16.msra.mxu0 %v1641_v30  ;;  %3180 = vmatpush1.bf16.msra.mxu1 %v1643_v31  ;;  %v1732_v30 = vunpack.c.h.s8.bf16 %v732_v32  ;;  %v738_v31 = vld [vmem:[%s3825_s6 + $0xf68] sm:$0xff] }
 0x3f3   : > { %2837 = vmatprep.subr.bf16.mxu0 %v1650_v26  ;;  %3181 = vmatprep.subr.bf16.mxu1 %v1652_v44  ;;  %v740_v26 = vld [vmem:[%s3825_s6 + $0xf78] sm:$0xff]  ;;  %v1729_v44 = vunpack.c.h.s8.bf16 %v729_v53  ;;  %v1738_v55 = vunpack.c.l.s8.bf16 %v738_v31  ;;  %v1746_v59 = vunpack.c.h.s8.bf16 %v738_v31 }
 0x3f6   : > { %2838 = vmatpush1.bf16.msra.mxu0 %v1649_v56  ;;  %3182 = vmatpush1.bf16.msra.mxu1 %v1651_v2  ;;  %v1740_v56 = vunpack.c.l.s8.bf16 %v740_v26  ;;  %v737_v2 = vld [vmem:[%s3825_s6 + $0xf60] sm:$0xff] }
 0x3f7   : > { %2850 = vmatprep.subr.bf16.mxu0 %v1658_v3  ;;  %3194 = vmatprep.subr.bf16.mxu1 %v1660_v57  ;;  %v739_v3 = vld [vmem:[%s3825_s6 + $0xf70] sm:$0xff]  ;;  %v1737_v57 = vunpack.c.l.s8.bf16 %v737_v2 }
 0x3f8   : > { %v1739_v51 = vunpack.c.l.s8.bf16 %v739_v3  ;;  %v1747_v62 = vunpack.c.h.s8.bf16 %v739_v3 }
 0x3f9   : > { %2840 = vmatmul.mubr.bf16.vlgmr.msra.gmra.mrb[4].mxu0 %v4209_v28  ;;  %3184 = vmatmul.mubr.bf16.vlgmr.msra.gmra.mrb[4].mxu1 %v4209_v28  ;;  %v1675_v28 = vunpack.c.l.s8.bf16 %v707_v20 }
 0x3fa   : > { %2851 = vmatpush1.bf16.msra.mxu0 %v1657_v60  ;;  %3195 = vmatpush1.bf16.msra.mxu1 %v1659_v61  ;;  %v1748_v60 = vunpack.c.h.s8.bf16 %v740_v26  ;;  %v746_v61 = vld [vmem:[%s3825_s6 + $0xfa8] sm:$0xff] }
 0x3fb   : > { %2852 = vmatprep.subr.bf16.mxu0 %v1666_v39  ;;  %3196 = vmatprep.subr.bf16.mxu1 %v1668_v36  ;;  %v748_v39 = vld [vmem:[%s3825_s6 + $0xfb8] sm:$0xff]  ;;  %v1745_v36 = vunpack.c.h.s8.bf16 %v737_v2  ;;  %v1754_v63 = vunpack.c.l.s8.bf16 %v746_v61  ;;  %v1762_v20 = vunpack.c.h.s8.bf16 %v746_v61 }
 0x3fc   : > { %2882 = vmatprep.mubr.bf16.mxu0 %v4225_v42  ;;  %3226 = vmatprep.mubr.bf16.mxu1 %v4225_v42  ;;  %v1690_v42 = vunpack.c.l.s8.bf16 %v714_v10 }
 0x3fe   : > { %2853 = vmatpush1.bf16.msra.mxu0 %v1665_v0  ;;  %3197 = vmatpush1.bf16.msra.mxu1 %v1667_v4  ;;  %v1756_v0 = vunpack.c.l.s8.bf16 %v748_v39  ;;  %v745_v4 = vld [vmem:[%s3825_s6 + $0xfa0] sm:$0xff] }
 0x3ff   : > { %2854 = vmatprep.subr.bf16.mxu0 %v1674_v5  ;;  %3198 = vmatprep.subr.bf16.mxu1 %v1676_v49  ;;  %v747_v5 = vld [vmem:[%s3825_s6 + $0xfb0] sm:$0xff]  ;;  %v1753_v49 = vunpack.c.l.s8.bf16 %v745_v4 }
 0x400   : > { %v1755_v6 = vunpack.c.l.s8.bf16 %v747_v5  ;;  %v1763_v10 = vunpack.c.h.s8.bf16 %v747_v5 }
 0x402   : > { %2855 = vmatpush1.bf16.msra.mxu0 %v1673_v21  ;;  %3199 = vmatpush1.bf16.msra.mxu1 %v1675_v28  ;;  %v1764_v21 = vunpack.c.h.s8.bf16 %v748_v39  ;;  %v754_v28 = vld [vmem:[%s3825_s6 + $0xfe8] sm:$0xff] }
 0x403   : > { %2856 = vmatprep.subr.bf16.mxu0 %v1682_v7  ;;  %3200 = vmatprep.subr.bf16.mxu1 %v1684_v9  ;;  %v756_v7 = vld [vmem:[%s3825_s6 + $0xff8] sm:$0xff]  ;;  %v1761_v9 = vunpack.c.h.s8.bf16 %v745_v4  ;;  %v1770_v11 = vunpack.c.l.s8.bf16 %v754_v28  ;;  %v1778_v16 = vunpack.c.h.s8.bf16 %v754_v28 }
 0x406   : > { %2857 = vmatpush1.bf16.msra.mxu0 %v1681_v12  ;;  %3201 = vmatpush1.bf16.msra.mxu1 %v1683_v13  ;;  %v1772_v12 = vunpack.c.l.s8.bf16 %v756_v7  ;;  %v753_v13 = vld [vmem:[%s3825_s6 + $0xfe0] sm:$0xff] }
 0x407   : > { %2858 = vmatprep.subr.bf16.mxu0 %v1690_v42  ;;  %3202 = vmatprep.subr.bf16.mxu1 %v1692_v14  ;;  %v755_v42 = vld [vmem:[%s3825_s6 + $0xff0] sm:$0xff]  ;;  %v1769_v14 = vunpack.c.l.s8.bf16 %v753_v13 }
 0x408   : > { %v1771_v15 = vunpack.c.l.s8.bf16 %v755_v42 }
 0x40a   : > { %2859 = vmatpush1.bf16.msra.mxu0 %v1689_v50  ;;  %3203 = vmatpush1.bf16.msra.mxu1 %v1691_v17  ;;  %v1780_v50 = vunpack.c.h.s8.bf16 %v756_v7  ;;  %v1777_v17 = vunpack.c.h.s8.bf16 %v753_v13 }
 0x40b   : > { %2860 = vmatprep.subr.bf16.mxu0 %v1698_v18  ;;  %3204 = vmatprep.subr.bf16.mxu1 %v1700_v22  ;;  %v1779_v18 = vunpack.c.h.s8.bf16 %v755_v42 }
 0x40e   : > { %2861 = vmatpush1.bf16.msra.mxu0 %v1697_v45  ;;  %3205 = vmatpush1.bf16.msra.mxu1 %v1699_v58 }
 0x40f   : > { %2862 = vmatprep.subr.bf16.mxu0 %v1706_v1  ;;  %3206 = vmatprep.subr.bf16.mxu1 %v1708_v46 }
 0x412   : > { %2863 = vmatpush1.bf16.msra.mxu0 %v1705_v37  ;;  %3207 = vmatpush1.bf16.msra.mxu1 %v1707_v38  ;;  %v3282_v37 = vld [vmem:[%s4390_s26 + $0x10] sm:$0xff] (%p4618_p8)  ;;  %v3284_v38 = vld [vmem:[%s4390_s26 + $0x18] sm:$0xff] (%p4618_p8) }
 0x413   : > { %2864 = vmatprep.subr.bf16.mxu0 %v1714_v33  ;;  %3208 = vmatprep.subr.bf16.mxu1 %v1716_v8  ;;  %3283 = vst [vmem:[%s3265_s5 + $0x10] sm:$0xff] (%p4618_p8), %v3282_v37  ;;  %3285 = vst [vmem:[%s3265_s5 + $0x18] sm:$0xff] (%p4618_p8), %v3284_v38 }
 0x416   : > { %2865 = vmatpush1.bf16.msra.mxu0 %v1713_v41  ;;  %3209 = vmatpush1.bf16.msra.mxu1 %v1715_v47  ;;  %v3294_v41 = vld [vmem:[%s4390_s26 + $0x40] sm:$0xff] (%p4618_p8)  ;;  %v3296_v47 = vld [vmem:[%s4390_s26 + $0x48] sm:$0xff] (%p4618_p8) }
 0x417   : > { %2866 = vmatprep.subr.bf16.mxu0 %v1722_v52  ;;  %3210 = vmatprep.subr.bf16.mxu1 %v1724_v19  ;;  %3295 = vst [vmem:[%s3265_s5 + $0x80] sm:$0xff] (%p4618_p8), %v3294_v41  ;;  %v3298_v52 = vld [vmem:[%s4390_s26 + $0x50] sm:$0xff] (%p4618_p8)  ;;  %v3300_v19 = vld [vmem:[%s4390_s26 + $0x58] sm:$0xff] (%p4618_p8)  ;;  %3297 = vst [vmem:[%s3265_s5 + $0x88] sm:$0xff] (%p4618_p8), %v3296_v47 }
 0x418   : > { %3299 = vst [vmem:[%s3265_s5 + $0x90] sm:$0xff] (%p4618_p8), %v3298_v52  ;;  %3301 = vst [vmem:[%s3265_s5 + $0x98] sm:$0xff] (%p4618_p8), %v3300_v19 }
 0x41a   : > { %2867 = vmatpush1.bf16.msra.mxu0 %v1721_v43  ;;  %3211 = vmatpush1.bf16.msra.mxu1 %v1723_v35 }
 0x41b   : > { %2868 = vmatprep.subr.bf16.mxu0 %v1730_v48  ;;  %3212 = vmatprep.subr.bf16.mxu1 %v1732_v30 }
 0x41e   : > { %2869 = vmatpush1.bf16.msra.mxu0 %v1729_v44  ;;  %3213 = vmatpush1.bf16.msra.mxu1 %v1731_v54 }
 0x41f   : > { %2870 = vmatprep.subr.bf16.mxu0 %v1738_v55  ;;  %3214 = vmatprep.subr.bf16.mxu1 %v1740_v56 }
 0x422   : > { %2871 = vmatpush1.bf16.msra.mxu0 %v1737_v57  ;;  %3215 = vmatpush1.bf16.msra.mxu1 %v1739_v51 }
 0x423   : > { %2872 = vmatprep.subr.bf16.mxu0 %v1746_v59  ;;  %3216 = vmatprep.subr.bf16.mxu1 %v1748_v60 }
 0x426   : > { %2873 = vmatpush1.bf16.msra.mxu0 %v1745_v36  ;;  %3217 = vmatpush1.bf16.msra.mxu1 %v1747_v62 }
 0x427   : > { %2874 = vmatprep.subr.bf16.mxu0 %v1754_v63  ;;  %3218 = vmatprep.subr.bf16.mxu1 %v1756_v0 }
 0x42a   : > { %2875 = vmatpush1.bf16.msra.mxu0 %v1753_v49  ;;  %3219 = vmatpush1.bf16.msra.mxu1 %v1755_v6 }
 0x42b   : > { %2876 = vmatprep.subr.bf16.mxu0 %v1762_v20  ;;  %3220 = vmatprep.subr.bf16.mxu1 %v1764_v21 }
 0x42e   : > { %2877 = vmatpush1.bf16.msra.mxu0 %v1761_v9  ;;  %3221 = vmatpush1.bf16.msra.mxu1 %v1763_v10 }
 0x42f   : > { %2878 = vmatprep.subr.bf16.mxu0 %v1770_v11  ;;  %3222 = vmatprep.subr.bf16.mxu1 %v1772_v12 }
 0x432   : > { %2879 = vmatpush1.bf16.msra.mxu0 %v1769_v14  ;;  %3223 = vmatpush1.bf16.msra.mxu1 %v1771_v15 }
 0x433   : > { %2880 = vmatprep.subr.bf16.mxu0 %v1778_v16  ;;  %3224 = vmatprep.subr.bf16.mxu1 %v1780_v50 }
 0x436   : > { %2881 = vmatpush1.bf16.msra.mxu0 %v1777_v17  ;;  %3225 = vmatpush1.bf16.msra.mxu1 %v1779_v18 }
 0x439   : > { %2883 = vmatmul.mubr.bf16.vlgmr.msra.gmra.mrb[4].mxu0 %v4263_v40  ;;  %3227 = vmatmul.mubr.bf16.vlgmr.msra.gmra.mrb[4].mxu1 %v4263_v40  ;;  %v3278_v40 = vld [vmem:[%s4390_s26] sm:$0xff] (%p4618_p8) }
 0x43a   : > { %3279 = vst [vmem:[%s3265_s5] sm:$0xff] (%p4618_p8), %v3278_v40 }
 0x50a   : > { %3259 = sbr.rel (!%p4618_p8) target bundleno = 1305 (0x519), region = 36 }
 0x50c   : > { %v2884_v22 = vpop.f32.mrb[4].mxu0  ;;  %v3228_v23 = vpop.f32.mrb[4].mxu1 }
 0x50d   : > { %3241 = vst [vmem:[%s4390_s26 + $0x20] sm:$0xff] %v2884_v22  ;;  %3243 = vst [vmem:[%s4390_s26 + $0x30] sm:$0xff] %v3228_v23  ;;  %v2886_v24 = vpop.f32.mrb[5].mxu0  ;;  %v3230_v45 = vpop.f32.mrb[5].mxu1 }
 0x50e   : > { %3242 = vst [vmem:[%s4390_s26 + $0x28] sm:$0xff] %v2886_v24  ;;  %3244 = vst [vmem:[%s4390_s26 + $0x38] sm:$0xff] %v3230_v45  ;;  %v2888_v58 = vpop.f32.mrb[6].mxu0  ;;  %v3232_v1 = vpop.f32.mrb[6].mxu1 }
 0x50f   : > { %3249 = vst [vmem:[%s4390_s26 + $0x60] sm:$0xff] %v2888_v58  ;;  %3251 = vst [vmem:[%s4390_s26 + $0x70] sm:$0xff] %v3232_v1  ;;  %v2890_v46 = vpop.f32.mrb[7].mxu0  ;;  %v3234_v25 = vpop.f32.mrb[7].mxu1 }
 0x510   : > { %3250 = vst [vmem:[%s4390_s26 + $0x68] sm:$0xff] %v2890_v46  ;;  %3252 = vst [vmem:[%s4390_s26 + $0x78] sm:$0xff] %v3234_v25 }
 0x514   : > { %v3286_v33 = vld [vmem:[%s4390_s26 + $0x20] sm:$0xff]  ;;  %v3290_v34 = vld [vmem:[%s4390_s26 + $0x30] sm:$0xff] }
 0x515   : > { %v3288_v8 = vld [vmem:[%s4390_s26 + $0x28] sm:$0xff]  ;;  %3287 = vst [vmem:[%s3265_s5 + $0x20] sm:$0xff] %v3286_v33  ;;  %v3292_v32 = vld [vmem:[%s4390_s26 + $0x38] sm:$0xff]  ;;  %3291 = vst [vmem:[%s3265_s5 + $0x30] sm:$0xff] %v3290_v34 }
 0x516   : > { %3289 = vst [vmem:[%s3265_s5 + $0x28] sm:$0xff] %v3288_v8  ;;  %3293 = vst [vmem:[%s3265_s5 + $0x38] sm:$0xff] %v3292_v32  ;;  %v3302_v53 = vld [vmem:[%s4390_s26 + $0x60] sm:$0xff]  ;;  %v3306_v43 = vld [vmem:[%s4390_s26 + $0x70] sm:$0xff] }
 0x517   : > { %v3304_v29 = vld [vmem:[%s4390_s26 + $0x68] sm:$0xff]  ;;  %3303 = vst [vmem:[%s3265_s5 + $0xa0] sm:$0xff] %v3302_v53  ;;  %3307 = vst [vmem:[%s3265_s5 + $0xb0] sm:$0xff] %v3306_v43  ;;  %v3308_v35 = vld [vmem:[%s4390_s26 + $0x78] sm:$0xff] }
 0x518   : > { %3305 = vst [vmem:[%s3265_s5 + $0xa8] sm:$0xff] %v3304_v29  ;;  %3309 = vst [vmem:[%s3265_s5 + $0xb8] sm:$0xff] %v3308_v35 }
 0x519 PF: > { %s15_s14 = sadd.s32 1, %s3697_s14   ;;  %s4619_s9 = smov %s3681_s10 }
 0x51a   : > { %p12_p9 = scmp.ge.s32.totalorder %s15_s14, 4   ;;  %s4620_s10 = smov %s3685_s11 }
 0x51b   : > { %s4621_s11 = smov %s3766_s21  ;;  %s4622_s12 = smov %s3693_s13 }
 0x51c   : > { %s4623_s13 = smov %s4625_s16  ;;  %14 = sbr.rel (!%p12_p9) target bundleno = 4 (0x4), region = 94 }
 0x523   :  { %3325 = vsyncpa [#allocation3], 1 }
 0x524   :  { %3327 = vsyncpa [#allocation3 + $0x1], 1 }

</bundles_post_ra>
